<compile_context>
chip_gen: v5e
topology: v5e:2x2
jax: 0.10.0
libtpu: 0.0.40
codegen_flags: <defaults>
</compile_context>

<pallas_src>
import jax
import jax.numpy as jnp
from jax.experimental import pallas as pl
from jax.experimental.pallas import tpu as pltpu


def _se_gate_conv1x1_kernel(x_ref, g_ref, w_ref, o_ref):
    # x_ref: (1, Cin, HW)   g_ref: (1, 1, Cin)   w_ref: (Ct, Cin)   o_ref: (1, Ct, HW)
    #
    # Fold the SE gate into the weight:  W @ (x * sig(g)) == (W * sig(g)) @ x
    gate = jax.nn.sigmoid(g_ref[0])                       # (1, Cin)  lane-dense, EUP
    w = w_ref[...].astype(jnp.float32) * gate             # (Ct, Cin) VPU, sublane broadcast
    acc = jnp.dot(w, x_ref[0].astype(jnp.float32),        # (Ct, HW)  1x1 conv == MXU matmul
                  preferred_element_type=jnp.float32)
    o_ref[0] = acc.astype(o_ref.dtype)


def _tensorcores_per_chip():
    """Best-effort detection of multi-TensorCore chips (v7x / megacore parts)."""
    try:
        kind = (jax.devices()[0].device_kind or "").lower()
    except Exception:
        return 1
    if any(tag in kind for tag in ("v7", "7x", "v4", "v5p")):
        return 2
    return 1


def _pick_cout_tile(cout, n_tc):
    # Split Cout 2-way only when there are >=2 TensorCores to feed (v7x /
    # megacore) and the half-tile stays sublane (8) aligned; otherwise use a
    # single full-Cout step (v5e/v6e: avoids extra grid-step overhead).
    if n_tc >= 2 and cout % 16 == 0:
        return cout // 2
    return cout


def prepare_conv1x1_weight(weight, dtype=jnp.bfloat16):
    """One-time (param-load-time) prep of the 1x1 conv weight.

    (Cout, Cin, 1, 1) -> (Cout, Cin), stored in `dtype` (bf16 by default) to
    halve the dominant HBM DMA of the kernel.  Accumulation stays f32 in-kernel.
    """
    cout, cin = weight.shape[0], weight.shape[1]
    return weight.reshape(cout, cin).astype(dtype)


@jax.jit
def se_gate_conv1x1(x419, x423, w_mat):
    """conv2d(x419 * sigmoid(x423), W), 1x1 conv, stride 1, no bias.

    x419:  (N, Cin, H, W)   activations
    x423:  (N, Cin, 1, 1)   SE gate logits
    w_mat: (Cout, Cin)      from prepare_conv1x1_weight() (any float dtype)
    returns (N, Cout, H, W) in x419.dtype
    """
    N, Cin, H, W = x419.shape
    Cout = w_mat.shape[0]
    HW = H * W

    # Free (contiguous) reshapes only -- no transposes, no extra HBM traffic.
    x_flat = x419.reshape(N, Cin, HW)       # (N, Cin, HW)
    gate = x423.reshape(N, 1, Cin)          # (N, 1, Cin)  lane-dense gate logits

    ct = _pick_cout_tile(Cout, _tensorcores_per_chip())
    n_ct = Cout // ct

    out_flat = pl.pallas_call(
        _se_gate_conv1x1_kernel,
        out_shape=jax.ShapeDtypeStruct((N, Cout, HW), x419.dtype),
        grid_spec=pltpu.PrefetchScalarGridSpec(
            num_scalar_prefetch=0,
            grid=(N, n_ct),
            in_specs=[
                # x / gate block indices are constant across j -> fetched once per n.
                pl.BlockSpec((1, Cin, HW), lambda n, j: (n, 0, 0)),
                pl.BlockSpec((1, 1, Cin), lambda n, j: (n, 0, 0)),
                # weight block index is constant across n -> reused across the batch.
                pl.BlockSpec((ct, Cin), lambda n, j: (j, 0)),
            ],
            out_specs=pl.BlockSpec((1, ct, HW), lambda n, j: (n, j, 0)),
        ),
        compiler_params=pltpu.CompilerParams(
            dimension_semantics=("parallel", "parallel")),
    )(x_flat, gate, w_mat)

    # Free reshape back to NCHW.
    return out_flat.reshape(N, Cout, H, W)


if __name__ == "__main__":
    # Shapes from the original module: x419 (1,1632,7,7), x423 (1,1632,1,1),
    # Conv2d(1632 -> 272, kernel 1x1, no bias).
    N, Cin, Cout, H, W = 1, 1632, 272, 7, 7

    key = jax.random.PRNGKey(0)
    k1, k2, k3 = jax.random.split(key, 3)
    x419 = jax.random.normal(k1, (N, Cin, H, W), dtype=jnp.float32)
    x423 = jax.random.normal(k2, (N, Cin, 1, 1), dtype=jnp.float32)
    # Deterministic conv weight init (kaiming-ish scale for a 1x1 conv).
    weight = jax.random.normal(k3, (Cout, Cin, 1, 1), dtype=jnp.float32) * (1.0 / (Cin ** 0.5))

    # Param-load-time weight prep (bf16 storage; f32 accumulation in-kernel).
    w_mat = prepare_conv1x1_weight(weight, dtype=jnp.bfloat16)

    out = se_gate_conv1x1(x419, x423, w_mat)
    jax.block_until_ready(out)
    assert out.shape == (N, Cout, H, W)

    gated = x419 * jax.nn.sigmoid(x423)

    # (a) Tight kernel-correctness check: reference using the SAME bf16-stored
    #     weight (isolates kernel math from the weight quantization choice).
    ref_q = jnp.einsum("nchw,oc->nohw", gated, w_mat.astype(jnp.float32),
                       precision=jax.lax.Precision.HIGHEST)
    err_q = float(jnp.max(jnp.abs(out - ref_q)))
    assert jnp.allclose(out, ref_q, atol=1e-3, rtol=1e-3), err_q

    # (b) End-to-end semantics vs. the full-f32 PyTorch formulation; the only
    #     additional error is bf16 weight quantization (~2-3e-3 abs here).
    ref = jnp.einsum("nchw,oc->nohw", gated, weight.reshape(Cout, Cin),
                     precision=jax.lax.Precision.HIGHEST)
    err = float(jnp.max(jnp.abs(out - ref)))
    assert jnp.allclose(out, ref, atol=1e-2, rtol=1e-2), err

    print("KERNEL_OK")
</pallas_src>

<mosaic_0001>
module attributes {stable_mosaic.version = 11 : i64} {
  func.func @_se_gate_conv1x1_kernel(%arg0: i32, %arg1: i32, %arg2: memref<1x1632x49xf32, #tpu.memory_space<vmem>>, %arg3: memref<1x1x1632xf32, #tpu.memory_space<vmem>>, %arg4: memref<272x1632xbf16, #tpu.memory_space<vmem>>, %arg5: memref<1x272x49xf32, #tpu.memory_space<vmem>>) attributes {dimension_semantics = [#tpu.dimension_semantics<parallel>, #tpu.dimension_semantics<parallel>], iteration_bounds = array<i64: 1, 1>, scalar_prefetch = 0 : i64, scratch_operands = 0 : i64, tpu.core_type = #tpu.core_type<tc>, window_params = [{transform_indices = @transform_0, window_bounds = array<i64: 1, 1632, 49>}, {transform_indices = @transform_1, window_bounds = array<i64: 1, 1, 1632>}, {transform_indices = @transform_2, window_bounds = array<i64: 272, 1632>}, {transform_indices = @transform_3, window_bounds = array<i64: 1, 272, 49>}]} {
    %c0 = arith.constant 0 : index
    %c0_0 = arith.constant 0 : index
    %c0_1 = arith.constant 0 : index
    %0 = vector.load %arg3[%c0, %c0_0, %c0_1] : memref<1x1x1632xf32, #tpu.memory_space<vmem>>, vector<1x1x1632xf32>
    %1 = vector.shape_cast %0 : vector<1x1x1632xf32> to vector<1x1632xf32>
    %2 = arith.negf %1 : vector<1x1632xf32>
    %3 = math.exp %2 : vector<1x1632xf32>
    %cst = arith.constant 1.000000e+00 : f32
    %4 = vector.broadcast %cst : f32 to vector<1x1632xf32>
    %5 = arith.addf %4, %3 : vector<1x1632xf32>
    %6 = arith.divf %4, %5 : vector<1x1632xf32>
    %c0_2 = arith.constant 0 : index
    %c0_3 = arith.constant 0 : index
    %7 = vector.load %arg4[%c0_2, %c0_3] : memref<272x1632xbf16, #tpu.memory_space<vmem>>, vector<272x1632xbf16>
    %8 = arith.extf %7 : vector<272x1632xbf16> to vector<272x1632xf32>
    %9 = vector.broadcast %6 : vector<1x1632xf32> to vector<272x1632xf32>
    %10 = arith.mulf %8, %9 : vector<272x1632xf32>
    %c0_4 = arith.constant 0 : index
    %c0_5 = arith.constant 0 : index
    %c0_6 = arith.constant 0 : index
    %11 = vector.load %arg2[%c0_4, %c0_5, %c0_6] : memref<1x1632x49xf32, #tpu.memory_space<vmem>>, vector<1x1632x49xf32>
    %12 = vector.shape_cast %11 : vector<1x1632x49xf32> to vector<1632x49xf32>
    %cst_7 = arith.constant dense<0.000000e+00> : vector<272x49xf32>
    %13 = tpu.matmul %10, %12, %cst_7 {dimension_numbers = #tpu.dot_dimension_numbers<[1], [0], [0], [1], [0, 0, 1, 1], [], []>} : vector<272x1632xf32>, vector<1632x49xf32>, vector<272x49xf32> -> vector<272x49xf32>
    %c0_8 = arith.constant 0 : index
    %c0_9 = arith.constant 0 : index
    %c0_10 = arith.constant 0 : index
    %14 = vector.load %arg5[%c0_8, %c0_9, %c0_10] : memref<1x272x49xf32, #tpu.memory_space<vmem>>, vector<1x272x49xf32>
    %15 = vector.shape_cast %14 : vector<1x272x49xf32> to vector<272x49xf32>
    %16 = vector.shape_cast %13 : vector<272x49xf32> to vector<1x272x49xf32>
    tpu.vector_store %arg5[%c0_8, %c0_9, %c0_10], %16 {strides = array<i32>} : memref<1x272x49xf32, #tpu.memory_space<vmem>>, vector<1x272x49xf32>,
    return
  }
  func.func @transform_0(%arg0: i32, %arg1: i32) -> (i32, i32, i32) {
    %c0_i32 = arith.constant 0 : i32
    %c0_i32_0 = arith.constant 0 : i32
    %c0_i32_1 = arith.constant 0 : i32
    return %arg0, %c0_i32, %c0_i32_0 : i32, i32, i32
  }
  func.func @transform_1(%arg0: i32, %arg1: i32) -> (i32, i32, i32) {
    %c0_i32 = arith.constant 0 : i32
    %c0_i32_0 = arith.constant 0 : i32
    %c0_i32_1 = arith.constant 0 : i32
    return %arg0, %c0_i32, %c0_i32_0 : i32, i32, i32
  }
  func.func @transform_2(%arg0: i32, %arg1: i32) -> (i32, i32) {
    %c0_i32 = arith.constant 0 : i32
    %c0_i32_0 = arith.constant 0 : i32
    return %arg1, %c0_i32 : i32, i32
  }
  func.func @transform_3(%arg0: i32, %arg1: i32) -> (i32, i32, i32) {
    %c0_i32 = arith.constant 0 : i32
    %c0_i32_0 = arith.constant 0 : i32
    return %arg0, %arg1, %c0_i32 : i32, i32, i32
  }
}

</mosaic_0001>

<bundles_post_ra>
// kernel: se_gate_conv1x1.1
= control target key start
LH: loop header
LB: loop body
LE: loop exit
PB: predicated region body
PF: predicated region fallthrough
CT: control target
= control target key end

     0   :  { %vm1408_vm8 = vcmask 785408   ;;  %vm3058_vm9 = vcmask 400384   ;;  %s6019_s0 = inlined_call_operand.vmem [shape: f32[1,1632,49], index: 0, kind: input, shape index: {}]   ;;  %s6020_s1 = inlined_call_operand.vmem [shape: f32[1,1,1632], index: 1, kind: input, shape index: {}]   ;;  %s6021_s2 = inlined_call_operand.vmem [shape: bf16[272,1632], index: 2, kind: input, shape index: {}]   ;;  %s6022_s3 = inlined_call_operand.vmem [shape: f32[1,272,49], index: 3, kind: output, shape index: {}]  }
   0x1   :  { %v1219_v0 = vld [vmem:[%s6019_s0 + $0x78] sm:$0xff]  ;;  %v1218_v1 = vld [vmem:[%s6019_s0 + $0x70] sm:$0xff]  ;;  %v1217_v2 = vld [vmem:[%s6019_s0 + $0x68] sm:$0xff] }
   0x2   :  { %3133 = vmatpush.msra.mxu1 %v1219_v0  ;;  %3134 = vmatpush.msra.mxu2 %v1219_v0  ;;  %v1216_v3 = vld [vmem:[%s6019_s0 + $0x60] sm:$0xff]  ;;  %v1215_v5 = vld [vmem:[%s6019_s0 + $0x58] sm:$0xff]  ;;  %v1214_v7 = vld [vmem:[%s6019_s0 + $0x50] sm:$0xff] }
   0x3   :  { %1511 = vmatpush.msra.mxu0 %v1219_v0  ;;  %3135 = vmatpush.msra.mxu3 %v1219_v0  ;;  %v14_v4 = vld [vmem:[%s6020_s1] sm:$0xff]  ;;  %v1213_v8 = vld [vmem:[%s6019_s0 + $0x48] sm:$0xff]  ;;  %v1211_v11 = vld [vmem:[%s6019_s0 + $0x38] sm:$0xff] }
   0x4   :  { %3136 = vmatpush.msra.mxu1 %v1218_v1  ;;  %3137 = vmatpush.msra.mxu2 %v1218_v1  ;;  %v3097_v6 = vmul.f32 -1.442695, %v14_v4  ;;  %v1212_v9 = vld [vmem:[%s6019_s0 + $0x40] sm:$0xff]  ;;  %v1210_v13 = vld [vmem:[%s6019_s0 + $0x30] sm:$0xff]  ;;  %v1209_v14 = vld [vmem:[%s6019_s0 + $0x28] sm:$0xff] }
   0x5   :  { %1512 = vmatpush.msra.mxu0 %v1218_v1  ;;  %3138 = vmatpush.msra.mxu3 %v1218_v1  ;;  %v1208_v15 = vld [vmem:[%s6019_s0 + $0x20] sm:$0xff]  ;;  %v1207_v16 = vld [vmem:[%s6019_s0 + $0x18] sm:$0xff]  ;;  %v1206_v18 = vld [vmem:[%s6019_s0 + $0x10] sm:$0xff] }
   0x6   :  { %3139 = vmatpush.msra.mxu1 %v1217_v2  ;;  %3140 = vmatpush.msra.mxu2 %v1217_v2  ;;  %3181 = vpow2.f32 %v3097_v6  ;;  %v1205_v21 = vld [vmem:[%s6019_s0 + $0x8] sm:$0xff]  ;;  %v1204_v24 = vld [vmem:[%s6019_s0] sm:$0xff]  ;;  %v3347_v26 = vld [vmem:[%s6021_s2 + $0x1d4] sm:$0xff] }
   0x7   :  { %1513 = vmatpush.msra.mxu0 %v1217_v2  ;;  %3141 = vmatpush.msra.mxu3 %v1217_v2  ;;  %v180_v27 = vld [vmem:[%s6021_s2 + $0x3a8] sm:$0xff]  ;;  %v1251_v30 = vld [vmem:[%s6019_s0 + $0x178] sm:$0xff]  ;;  %v3370_v34 = vld [vmem:[%s6021_s2] sm:$0xff]  ;;  %v409_v39 = vunpack.c.l.bf16 %v3347_v26 }
   0x8   :  { %3142 = vmatpush.msra.mxu1 %v1216_v3  ;;  %3143 = vmatpush.msra.mxu2 %v1216_v3  ;;  %v1235_v31 = vld [vmem:[%s6019_s0 + $0xf8] sm:$0xff]  ;;  %v1250_v35 = vld [vmem:[%s6019_s0 + $0x170] sm:$0xff]  ;;  %v526_v40 = vunpack.c.l.bf16 %v180_v27  ;;  %v1249_v44 = vld [vmem:[%s6019_s0 + $0x168] sm:$0xff]  ;;  %v292_v45 = vunpack.c.l.bf16 %v3370_v34 }
   0x9   :  { %1514 = vmatpush.msra.mxu0 %v1216_v3  ;;  %3144 = vmatpush.msra.mxu3 %v1216_v3  ;;  %v1234_v36 = vld [vmem:[%s6019_s0 + $0xf0] sm:$0xff]  ;;  %v243_v37 = vld [vmem:[%s6021_s2 + $0x57c] sm:$0xff]  ;;  %v1233_v47 = vld [vmem:[%s6019_s0 + $0xe8] sm:$0xff] }
   0xa   :  { %3145 = vmatpush.msra.mxu1 %v1215_v5  ;;  %3146 = vmatpush.msra.mxu2 %v1215_v5  ;;  %v1283_v41 = vld [vmem:[%s6019_s0 + $0x278] sm:$0xff]  ;;  %v1282_v48 = vld [vmem:[%s6019_s0 + $0x270] sm:$0xff]  ;;  %v643_v49 = vunpack.c.l.bf16 %v243_v37  ;;  %v3410_v50 = vld [vmem:[%s6021_s2 + $0x208] sm:$0xff] }
   0xb   :  { %1515 = vmatpush.msra.mxu0 %v1215_v5  ;;  %3147 = vmatpush.msra.mxu3 %v1215_v5  ;;  %v1267_v42 = vld [vmem:[%s6019_s0 + $0x1f8] sm:$0xff]  ;;  %v1248_v54 = vld [vmem:[%s6019_s0 + $0x160] sm:$0xff]  ;;  %v250_v58 = vld [vmem:[%s6021_s2 + $0x5b0] sm:$0xff]  ;;  %v422_v59 = vunpack.c.l.bf16 %v3410_v50 }
   0xc   :  { %3148 = vmatpush.msra.mxu1 %v1214_v7  ;;  %3149 = vmatpush.msra.mxu2 %v1214_v7  ;;  %v3182_v10 = vpop.eup %3181  ;;  %v187_v51 = vld [vmem:[%s6021_s2 + $0x3dc] sm:$0xff]  ;;  %v3423_v55 = vld [vmem:[%s6021_s2 + $0x34] sm:$0xff]  ;;  %v1281_v63 = vld [vmem:[%s6019_s0 + $0x268] sm:$0xff]  ;;  %v656_v5 = vunpack.c.l.bf16 %v250_v58 }
   0xd   :  { %1516 = vmatpush.msra.mxu0 %v1214_v7  ;;  %3150 = vmatpush.msra.mxu3 %v1214_v7  ;;  %v22_v12 = vadd.f32 1.0, %v3182_v10  ;;  %v1232_v57 = vld [vmem:[%s6019_s0 + $0xe0] sm:$0xff]  ;;  %v539_v60 = vunpack.c.l.bf16 %v187_v51  ;;  %v1247_v62 = vld [vmem:[%s6019_s0 + $0x158] sm:$0xff]  ;;  %v305_v0 = vunpack.c.l.bf16 %v3423_v55  ;;  %v1266_v2 = vld [vmem:[%s6019_s0 + $0x1f0] sm:$0xff] }
   0xe   :  { %3151 = vmatpush.msra.mxu1 %v1213_v8  ;;  %3152 = vmatpush.msra.mxu2 %v1213_v8  ;;  %v1231_v1 = vld [vmem:[%s6019_s0 + $0xd8] sm:$0xff]  ;;  %v1246_v3 = vld [vmem:[%s6019_s0 + $0x150] sm:$0xff]  ;;  %v1280_v4 = vld [vmem:[%s6019_s0 + $0x260] sm:$0xff] }
   0xf   :  { %1517 = vmatpush.msra.mxu0 %v1213_v8  ;;  %3153 = vmatpush.msra.mxu3 %v1213_v8  ;;  %3183 = vrcp.f32 %v22_v12  ;;  %v35_v20 = vand.u32 2147483648, %v22_v12  ;;  %vm29_vm0 = vweird.f32 %v22_v12  ;;  %v33_v23 = vand.u32 2147483647, %v22_v12  ;;  %v1265_v6 = vld [vmem:[%s6019_s0 + $0x1e8] sm:$0xff]  ;;  %v1230_v7 = vld [vmem:[%s6019_s0 + $0xd0] sm:$0xff]  ;;  %v1228_v27 = vld [vmem:[%s6019_s0 + $0xc0] sm:$0xff] }
  0x10   :  { %3154 = vmatpush.msra.mxu1 %v1212_v9  ;;  %3155 = vmatpush.msra.mxu2 %v1212_v9  ;;  %v1245_v10 = vld [vmem:[%s6019_s0 + $0x148] sm:$0xff]  ;;  %v1242_v37 = vld [vmem:[%s6019_s0 + $0x130] sm:$0xff] }
  0x11   :  { %1518 = vmatpush.msra.mxu0 %v1212_v9  ;;  %3156 = vmatpush.msra.mxu3 %v1212_v9  ;;  %v36_v29 = vor.u32 1.1754944e-38, %v35_v20  ;;  %vm3363_vm3 = vcmp.eq.f32.partialorder %v33_v23, 8.507059e+37  ;;  %v1263_v23 = vld [vmem:[%s6019_s0 + $0x1d8] sm:$0xff]  ;;  %v1226_v51 = vld [vmem:[%s6019_s0 + $0xb0] sm:$0xff]  ;;  %v1225_v58 = vld [vmem:[%s6019_s0 + $0xa8] sm:$0xff] }
  0x12   :  { %3157 = vmatpush.msra.mxu1 %v1211_v11  ;;  %3158 = vmatpush.msra.mxu2 %v1211_v11 }
  0x13   :  { %1519 = vmatpush.msra.mxu0 %v1211_v11  ;;  %3159 = vmatpush.msra.mxu3 %v1211_v11  ;;  %v1279_v11 = vld [vmem:[%s6019_s0 + $0x258] sm:$0xff] }
  0x14   :  { %3160 = vmatpush.msra.mxu1 %v1210_v13  ;;  %3161 = vmatpush.msra.mxu2 %v1210_v13 }
  0x15   :  { %1520 = vmatpush.msra.mxu0 %v1210_v13  ;;  %3162 = vmatpush.msra.mxu3 %v1210_v13  ;;  %v3184_v17 = vpop.eup %3183  ;;  %v194_v13 = vld [vmem:[%s6021_s2 + $0x410] sm:$0xff] }
  0x16   :  { %3163 = vmatpush.msra.mxu1 %v1209_v14  ;;  %3164 = vmatpush.msra.mxu2 %v1209_v14  ;;  %v25_v19 = vmul.f32 %v3184_v17, %v22_v12  ;;  %vm30_vm1 = vweird.f32 %v3184_v17  ;;  %v3470_v12 = vld [vmem:[%s6021_s2 + $0x23c] sm:$0xff] }
  0x17   :  { %1521 = vmatpush.msra.mxu0 %v1209_v14  ;;  %3165 = vmatpush.msra.mxu3 %v1209_v14  ;;  %vm3353_vm2 = vmor %vm29_vm0, %vm30_vm1  ;;  %v435_v20 = vunpack.c.l.bf16 %v3470_v12 }
  0x18   :  { %3166 = vmatpush.msra.mxu1 %v1208_v15  ;;  %3167 = vmatpush.msra.mxu2 %v1208_v15  ;;  %v26_v22 = vsub.f32 1.0, %v25_v19  ;;  %v257_v19 = vld [vmem:[%s6021_s2 + $0x5e4] sm:$0xff] }
  0x19   :  { %1522 = vmatpush.msra.mxu0 %v1208_v15  ;;  %3168 = vmatpush.msra.mxu3 %v1208_v15  ;;  %v3479_v15 = vld [vmem:[%s6021_s2 + $0x68] sm:$0xff]  ;;  %v669_v28 = vunpack.c.l.bf16 %v257_v19 }
  0x1a   :  { %3169 = vmatpush.msra.mxu1 %v1207_v16  ;;  %3170 = vmatpush.msra.mxu2 %v1207_v16  ;;  %v27_v25 = vmul.f32 %v3184_v17, %v26_v22  ;;  %v1244_v22 = vld [vmem:[%s6019_s0 + $0x140] sm:$0xff] }
  0x1b   :  { %1523 = vmatpush.msra.mxu0 %v1207_v16  ;;  %3171 = vmatpush.msra.mxu3 %v1207_v16 }
  0x1c   :  { %3172 = vmatpush.msra.mxu1 %v1206_v18  ;;  %3173 = vmatpush.msra.mxu2 %v1206_v18  ;;  %v28_v32 = vadd.f32 %v3184_v17, %v27_v25  ;;  %v1278_v25 = vld [vmem:[%s6019_s0 + $0x250] sm:$0xff] }
  0x1d   :  { %1524 = vmatpush.msra.mxu0 %v1206_v18  ;;  %3174 = vmatpush.msra.mxu3 %v1206_v18  ;;  %v1229_v18 = vld [vmem:[%s6019_s0 + $0xc8] sm:$0xff] }
  0x1e   :  { %3175 = vmatpush.msra.mxu1 %v1205_v21  ;;  %3176 = vmatpush.msra.mxu2 %v1205_v21  ;;  %v32_v38 = vsel %vm3353_vm2, %v3184_v17, %v28_v32  ;;  %v1264_v17 = vld [vmem:[%s6019_s0 + $0x1e0] sm:$0xff]  ;;  %v1227_v32 = vld [vmem:[%s6019_s0 + $0xb8] sm:$0xff] }
  0x1f   :  { %1525 = vmatpush.msra.mxu0 %v1205_v21  ;;  %3177 = vmatpush.msra.mxu3 %v1205_v21  ;;  %v3392_v43 = vsel %vm3363_vm3, %v36_v29, %v32_v38  ;;  %v552_v21 = vunpack.c.l.bf16 %v194_v13  ;;  %v1243_v29 = vld [vmem:[%s6019_s0 + $0x138] sm:$0xff]  ;;  %v3528_v38 = vld [vmem:[%s6021_s2 + $0x270] sm:$0xff]  ;;  %v1256_v13 = vld [vmem:[%s6019_s0 + $0x1a0] sm:$0xff] }
  0x20   :  { %3178 = vmatpush.msra.mxu1 %v1204_v24  ;;  %3179 = vmatpush.msra.mxu2 %v1204_v24  ;;  %v3399_v46 = vperm.slane %v3392_v43, 0 }
  0x21   :  { %1526 = vmatpush.msra.mxu0 %v1204_v24  ;;  %3180 = vmatpush.msra.mxu3 %v1204_v24  ;;  %v318_v24 = vunpack.c.l.bf16 %v3479_v15 }
  0x22   :  { %1749 = vmatpush.msrb.mxu2 %v1251_v30  ;;  %1630 = vmatpush.msrb.mxu1 %v1235_v31  ;;  %v879_v52 = vmul.f32 %v3399_v46, %v409_v39  ;;  %v996_v53 = vmul.f32 %v3399_v46, %v526_v40  ;;  %v762_v56 = vmul.f32 %v3399_v46, %v292_v45  ;;  %v1262_v30 = vld [vmem:[%s6019_s0 + $0x1d0] sm:$0xff]  ;;  %v1277_v31 = vld [vmem:[%s6019_s0 + $0x248] sm:$0xff]  ;;  %v264_v45 = vld [vmem:[%s6021_s2 + $0x618] sm:$0xff] }
  0x23   :  { %1987 = vmatpush.msrb.mxu0 %v1283_v41  ;;  %1868 = vmatpush.msrb.mxu3 %v1267_v42  ;;  %v1113_v61 = vmul.f32 %v3399_v46, %v643_v49  ;;  %v892_v8 = vmul.f32 %v3399_v46, %v422_v59  ;;  %v1009_v9 = vmul.f32 %v3399_v46, %v539_v60  ;;  %v201_v39 = vld [vmem:[%s6021_s2 + $0x444] sm:$0xff]  ;;  %v3537_v41 = vld [vmem:[%s6021_s2 + $0x9c] sm:$0xff]  ;;  %v1258_v60 = vld [vmem:[%s6019_s0 + $0x1b0] sm:$0xff] }
  0x24   :  { %1750 = vmatpush.msrb.mxu2 %v1250_v35  ;;  %1631 = vmatpush.msrb.mxu1 %v1234_v36  ;;  %v775_v14 = vmul.f32 %v3399_v46, %v305_v0  ;;  %v1126_v16 = vmul.f32 %v3399_v46, %v656_v5  ;;  %v905_v33 = vmul.f32 %v3399_v46, %v435_v20  ;;  %v1261_v36 = vld [vmem:[%s6019_s0 + $0x1c8] sm:$0xff]  ;;  %v565_v49 = vunpack.c.l.bf16 %v201_v39  ;;  %v1240_v59 = vld [vmem:[%s6019_s0 + $0x120] sm:$0xff]  ;;  %v3595_v5 = vld [vmem:[%s6021_s2 + $0xd0] sm:$0xff] }
  0x25   :  { %1988 = vmatpush.msrb.mxu0 %v1282_v48  ;;  %1554 = vmatmul.f32.vlgmr.msra.gmra.mxu1 %v879_v52  ;;  %v1022_v35 = vmul.f32 %v3399_v46, %v552_v21  ;;  %v788_v40 = vmul.f32 %v3399_v46, %v318_v24  ;;  %v1139_v42 = vmul.f32 %v3399_v46, %v669_v28  ;;  %v448_v48 = vunpack.c.l.bf16 %v3528_v38  ;;  %v1241_v52 = vld [vmem:[%s6019_s0 + $0x128] sm:$0xff]  ;;  %v1224_v0 = vld [vmem:[%s6019_s0 + $0xa0] sm:$0xff]  ;;  %v1255_v20 = vld [vmem:[%s6019_s0 + $0x198] sm:$0xff] }
  0x26   :  { %1751 = vmatpush.msrb.mxu2 %v1249_v44  ;;  %1632 = vmatpush.msrb.mxu1 %v1233_v47  ;;  %v1260_v44 = vld [vmem:[%s6019_s0 + $0x1c0] sm:$0xff]  ;;  %v1222_v21 = vld [vmem:[%s6019_s0 + $0x90] sm:$0xff] }
  0x27   :  { %1581 = vmatmul.f32.vlgmr.msra.gmra.mxu2 %v996_v53  ;;  %1527 = vmatmul.f32.vlgmr.msra.gmra.mxu0 %v762_v56  ;;  %v1276_v47 = vld [vmem:[%s6019_s0 + $0x240] sm:$0xff]  ;;  %v331_v53 = vunpack.c.l.bf16 %v3537_v41  ;;  %v1275_v56 = vld [vmem:[%s6019_s0 + $0x238] sm:$0xff] }
  0x28   :  { %1752 = vmatpush.msrb.mxu2 %v1248_v54  ;;  %1608 = vmatmul.f32.vlgmr.msra.gmra.mxu3 %v1113_v61  ;;  %v1259_v54 = vld [vmem:[%s6019_s0 + $0x1b8] sm:$0xff]  ;;  %v1274_v61 = vld [vmem:[%s6019_s0 + $0x230] sm:$0xff] }
  0x29   :  { %1633 = vmatpush.msrb.mxu1 %v1232_v57  ;;  %1989 = vmatpush.msrb.mxu0 %v1281_v63  ;;  %v682_v57 = vunpack.c.l.bf16 %v264_v45  ;;  %v1035_v63 = vmul.f32 %v3399_v46, %v565_v49 }
  0x2a   :  { %1753 = vmatpush.msrb.mxu2 %v1247_v62  ;;  %1869 = vmatpush.msrb.mxu3 %v1266_v2  ;;  %v918_v62 = vmul.f32 %v3399_v46, %v448_v48  ;;  %v3586_v2 = vld [vmem:[%s6021_s2 + $0x2a4] sm:$0xff] }
  0x2b   :  { %1634 = vmatpush.msrb.mxu1 %v1231_v1  ;;  %1990 = vmatpush.msrb.mxu0 %v1280_v4  ;;  %v1239_v1 = vld [vmem:[%s6019_s0 + $0x118] sm:$0xff]  ;;  %v801_v4 = vmul.f32 %v3399_v46, %v331_v53  ;;  %v1252_v48 = vld [vmem:[%s6019_s0 + $0x180] sm:$0xff] }
  0x2c   :  { %1754 = vmatpush.msrb.mxu2 %v1246_v3  ;;  %1870 = vmatpush.msrb.mxu3 %v1265_v6  ;;  %v208_v3 = vld [vmem:[%s6021_s2 + $0x478] sm:$0xff]  ;;  %v1152_v6 = vmul.f32 %v3399_v46, %v682_v57  ;;  %v222_v53 = vld [vmem:[%s6021_s2 + $0x4e0] sm:$0xff] }
  0x2d   :  { %1635 = vmatpush.msrb.mxu1 %v1230_v7  ;;  %1991 = vmatpush.msrb.mxu0 %v1279_v11  ;;  %v1257_v7 = vld [vmem:[%s6019_s0 + $0x1a8] sm:$0xff]  ;;  %v578_v11 = vunpack.c.l.bf16 %v208_v3  ;;  %v1268_v3 = vld [vmem:[%s6019_s0 + $0x200] sm:$0xff] }
  0x2e   :  { %1755 = vmatpush.msrb.mxu2 %v1245_v10  ;;  %1557 = vmatmul.f32.gmra.mxu1 %v892_v8  ;;  %v271_v8 = vld [vmem:[%s6021_s2 + $0x64c] sm:$0xff]  ;;  %v461_v10 = vunpack.c.l.bf16 %v3586_v2 }
  0x2f   :  { %1584 = vmatmul.f32.gmra.mxu2 %v1009_v9  ;;  %1530 = vmatmul.f32.gmra.mxu0 %v775_v14  ;;  %v1273_v9 = vld [vmem:[%s6019_s0 + $0x228] sm:$0xff]  ;;  %v1223_v14 = vld [vmem:[%s6019_s0 + $0x98] sm:$0xff]  ;;  %v695_v19 = vunpack.c.l.bf16 %v271_v8  ;;  %v1048_v24 = vmul.f32 %v3399_v46, %v578_v11  ;;  %v3718_v8 = vld [vmem:[%s6021_s2 + $0x340] sm:$0xff] }
  0x30   :  { %1871 = vmatpush.msrb.mxu3 %v1264_v17  ;;  %1636 = vmatpush.msrb.mxu1 %v1229_v18  ;;  %v1238_v17 = vld [vmem:[%s6019_s0 + $0x110] sm:$0xff]  ;;  %v1272_v18 = vld [vmem:[%s6019_s0 + $0x220] sm:$0xff] }
  0x31   :  { %1611 = vmatmul.f32.gmra.mxu3 %v1126_v16  ;;  %1756 = vmatpush.msrb.mxu2 %v1244_v22  ;;  %v344_v16 = vunpack.c.l.bf16 %v3595_v5  ;;  %v1237_v22 = vld [vmem:[%s6019_s0 + $0x108] sm:$0xff] }
  0x32   :  { %1872 = vmatpush.msrb.mxu3 %v1263_v23  ;;  %1992 = vmatpush.msrb.mxu0 %v1278_v25  ;;  %v931_v23 = vmul.f32 %v3399_v46, %v461_v10  ;;  %v3635_v25 = vld [vmem:[%s6021_s2 + $0x2d8] sm:$0xff]  ;;  %v3727_v11 = vld [vmem:[%s6021_s2 + $0x16c] sm:$0xff] }
  0x33   :  { %1637 = vmatpush.msrb.mxu1 %v1228_v27  ;;  %1757 = vmatpush.msrb.mxu2 %v1243_v29  ;;  %v215_v27 = vld [vmem:[%s6021_s2 + $0x4ac] sm:$0xff]  ;;  %v814_v28 = vmul.f32 %v3399_v46, %v344_v16  ;;  %v3644_v29 = vld [vmem:[%s6021_s2 + $0x104] sm:$0xff] }
  0x34   :  { %1873 = vmatpush.msrb.mxu3 %v1262_v30  ;;  %1993 = vmatpush.msrb.mxu0 %v1277_v31  ;;  %v1165_v30 = vmul.f32 %v3399_v46, %v695_v19  ;;  %v278_v31 = vld [vmem:[%s6021_s2 + $0x680] sm:$0xff]  ;;  %v357_v39 = vunpack.c.l.bf16 %v3644_v29  ;;  %v55_v19 = vld [vmem:[%s6021_s2 + $0x8] sm:$0xff] }
  0x35   :  { %1638 = vmatpush.msrb.mxu1 %v1227_v32  ;;  %1758 = vmatpush.msrb.mxu2 %v1242_v37  ;;  %v474_v32 = vunpack.c.l.bf16 %v3635_v25  ;;  %v1221_v37 = vld [vmem:[%s6019_s0 + $0x88] sm:$0xff]  ;;  %v708_v45 = vunpack.c.l.bf16 %v278_v31 }
  0x36   :  { %1874 = vmatpush.msrb.mxu3 %v1261_v36  ;;  %1560 = vmatmul.f32.gmra.mxu1 %v905_v33  ;;  %v591_v33 = vunpack.c.l.bf16 %v215_v27  ;;  %v1271_v36 = vld [vmem:[%s6019_s0 + $0x218] sm:$0xff]  ;;  %v236_v27 = vld [vmem:[%s6021_s2 + $0x548] sm:$0xff] }
  0x37   :  { %1587 = vmatmul.f32.gmra.mxu2 %v1022_v35  ;;  %1533 = vmatmul.f32.gmra.mxu0 %v788_v40  ;;  %v1254_v35 = vld [vmem:[%s6019_s0 + $0x190] sm:$0xff]  ;;  %v1253_v40 = vld [vmem:[%s6019_s0 + $0x188] sm:$0xff]  ;;  %v944_v49 = vmul.f32 %v3399_v46, %v474_v32  ;;  %v1178_v57 = vmul.f32 %v3399_v46, %v708_v45 }
  0x38   :  { %1875 = vmatpush.msrb.mxu3 %v1260_v44  ;;  %1994 = vmatpush.msrb.mxu0 %v1276_v47  ;;  %v1270_v44 = vld [vmem:[%s6019_s0 + $0x210] sm:$0xff]  ;;  %v1220_v47 = vld [vmem:[%s6019_s0 + $0x80] sm:$0xff] }
  0x39   :  { %1614 = vmatmul.f32.gmra.mxu3 %v1139_v42  ;;  %1639 = vmatpush.msrb.mxu1 %v1226_v51  ;;  %v1236_v42 = vld [vmem:[%s6019_s0 + $0x100] sm:$0xff]  ;;  %v1061_v51 = vmul.f32 %v3399_v46, %v591_v33  ;;  %v630_v33 = vunpack.c.l.bf16 %v236_v27 }
  0x3a   :  { %1759 = vmatpush.msrb.mxu2 %v1241_v52  ;;  %1876 = vmatpush.msrb.mxu3 %v1259_v54  ;;  %v3681_v52 = vld [vmem:[%s6021_s2 + $0x30c] sm:$0xff]  ;;  %v827_v54 = vmul.f32 %v3399_v46, %v357_v39 }
  0x3b   :  { %1995 = vmatpush.msrb.mxu0 %v1275_v56  ;;  %1640 = vmatpush.msrb.mxu1 %v1225_v58  ;;  %v3690_v56 = vld [vmem:[%s6021_s2 + $0x138] sm:$0xff]  ;;  %v1100_v45 = vmul.f32 %v3399_v46, %v630_v33 }
  0x3c   :  { %1760 = vmatpush.msrb.mxu2 %v1240_v59  ;;  %1877 = vmatpush.msrb.mxu3 %v1258_v60  ;;  %v285_v58 = vld [vmem:[%s6021_s2 + $0x6b4] sm:$0xff]  ;;  %v487_v59 = vunpack.c.l.bf16 %v3681_v52  ;;  %v604_v60 = vunpack.c.l.bf16 %v222_v53  ;;  %v3781_v53 = vperm.slane %v3392_v43, 1 }
  0x3d   :  { %1996 = vmatpush.msrb.mxu0 %v1274_v61  ;;  %1641 = vmatpush.msrb.mxu1 %v1224_v0  ;;  %v1315_v61 = vld [vmem:[%s6019_s0 + $0x378] sm:$0xff]  ;;  %v370_v0 = vunpack.c.l.bf16 %v3690_v56 }
  0x3e   :  { %1761 = vmatpush.msrb.mxu2 %v1239_v1  ;;  %1563 = vmatmul.f32.gmra.mxu1 %v918_v62  ;;  %v1269_v62 = vld [vmem:[%s6019_s0 + $0x208] sm:$0xff]  ;;  %v1299_v1 = vld [vmem:[%s6019_s0 + $0x2f8] sm:$0xff] }
  0x3f   :  { %1590 = vmatmul.f32.gmra.mxu2 %v1035_v63  ;;  %1536 = vmatmul.f32.gmra.mxu0 %v801_v4  ;;  %v1331_v63 = vld [vmem:[%s6019_s0 + $0x3f8] sm:$0xff]  ;;  %v721_v4 = vunpack.c.l.bf16 %v285_v58  ;;  %v840_v10 = vmul.f32 %v3399_v46, %v370_v0 }
  0x40   :  { %1878 = vmatpush.msrb.mxu3 %v1257_v7  ;;  %1997 = vmatpush.msrb.mxu0 %v1273_v9  ;;  %v1074_v7 = vmul.f32 %v3399_v46, %v604_v60  ;;  %v229_v9 = vld [vmem:[%s6021_s2 + $0x514] sm:$0xff] }
  0x41   :  { %1617 = vmatmul.f32.gmra.mxu3 %v1152_v6  ;;  %1642 = vmatpush.msrb.mxu1 %v1223_v14  ;;  %v957_v6 = vmul.f32 %v3399_v46, %v487_v59  ;;  %v500_v14 = vunpack.c.l.bf16 %v3718_v8  ;;  %v617_v16 = vunpack.c.l.bf16 %v229_v9  ;;  %v3790_v59 = vperm.slane %v3392_v43, 4  ;;  %v1297_v9 = vld [vmem:[%s6019_s0 + $0x2e8] sm:$0xff] }
  0x42   :  { %1879 = vmatpush.msrb.mxu3 %v1256_v13  ;;  %1762 = vmatpush.msrb.mxu2 %v1238_v17  ;;  %v1191_v13 = vmul.f32 %v3399_v46, %v721_v4  ;;  %v1347_v17 = vld [vmem:[%s6019_s0 + $0x478] sm:$0xff] }
  0x43   :  { %1998 = vmatpush.msrb.mxu0 %v1272_v18  ;;  %1643 = vmatpush.msrb.mxu1 %v1222_v21  ;;  %v383_v18 = vunpack.c.l.bf16 %v3727_v11  ;;  %v3739_v21 = vperm.slane %v3392_v43, 3 }
  0x44   :  { %1880 = vmatpush.msrb.mxu3 %v1255_v20  ;;  %1763 = vmatpush.msrb.mxu2 %v1237_v22  ;;  %v295_v20 = vunpack.c.h.bf16 %v55_v19  ;;  %v970_v22 = vmul.f32 %v3399_v46, %v500_v14 }
  0x45   :  { %1999 = vmatpush.msrb.mxu0 %v1271_v36  ;;  %1644 = vmatpush.msrb.mxu1 %v1221_v37  ;;  %v1330_v36 = vld [vmem:[%s6019_s0 + $0x3f0] sm:$0xff] }
  0x46   :  { %1566 = vmatmul.f32.gmra.mxu1 %v931_v23  ;;  %1881 = vmatpush.msrb.mxu3 %v1254_v35  ;;  %v1087_v23 = vmul.f32 %v3399_v46, %v617_v16  ;;  %v765_v31 = vmul.f32 %v3739_v21, %v295_v20  ;;  %v1314_v35 = vld [vmem:[%s6019_s0 + $0x370] sm:$0xff]  ;;  %v319_v20 = vunpack.c.h.bf16 %v3479_v15 }
  0x47   :  { %1593 = vmatmul.f32.gmra.mxu2 %v1048_v24  ;;  %1539 = vmatmul.f32.gmra.mxu0 %v814_v28  ;;  %v3746_v24 = vld [vmem:[%s6021_s2 + $0x374] sm:$0xff]  ;;  %v853_v28 = vmul.f32 %v3399_v46, %v383_v18 }
  0x48   :  { %1882 = vmatpush.msrb.mxu3 %v1253_v40  ;;  %1764 = vmatpush.msrb.mxu2 %v1236_v42  ;;  %v513_v32 = vunpack.c.l.bf16 %v3746_v24  ;;  %v1298_v37 = vld [vmem:[%s6019_s0 + $0x2f0] sm:$0xff]  ;;  %v62_v40 = vld [vmem:[%s6021_s2 + $0x3c] sm:$0xff] }
  0x49   :  { %1620 = vmatmul.f32.gmra.mxu3 %v1165_v30  ;;  %2000 = vmatpush.msrb.mxu0 %v1270_v44  ;;  %v3755_v30 = vld [vmem:[%s6021_s2 + $0x1a0] sm:$0xff]  ;;  %v308_v42 = vunpack.c.h.bf16 %v62_v40  ;;  %v307_v4 = vunpack.c.l.bf16 %v62_v40 }
  0x4a   :  { %1645 = vmatpush.msrb.mxu1 %v1220_v47  ;;  %1883 = vmatpush.msrb.mxu3 %v1252_v48  ;;  %v396_v39 = vunpack.c.l.bf16 %v3755_v30  ;;  %v983_v44 = vmul.f32 %v3399_v46, %v513_v32  ;;  %v789_v32 = vmul.f32 %v3781_v53, %v319_v20  ;;  %v1312_v40 = vld [vmem:[%s6019_s0 + $0x360] sm:$0xff]  ;;  %v371_v20 = vunpack.c.h.bf16 %v3690_v56 }
  0x4b   :  { %2225 = vmatpush.msra.mxu2 %v1315_v61  ;;  %2001 = vmatpush.msrb.mxu0 %v1269_v62  ;;  %v778_v48 = vmul.f32 %v3739_v21, %v308_v42 }
  0x4c   :  { %2344 = vmatpush.msra.mxu3 %v1331_v63  ;;  %2106 = vmatpush.msra.mxu1 %v1299_v1  ;;  %v866_v47 = vmul.f32 %v3399_v46, %v396_v39  ;;  %v1346_v46 = vld [vmem:[%s6019_s0 + $0x470] sm:$0xff]  ;;  %v63_v1 = vld [vmem:[%s6021_s2 + $0x44] sm:$0xff] }
  0x4d   :  { %2002 = vmatpush.msrb.mxu0 %v1268_v3  ;;  %2226 = vmatpush.msra.mxu2 %v1314_v35  ;;  %v306_v3 = vunpack.c.h.bf16 %v3423_v55 }
  0x4e   :  { %1569 = vmatmul.f32.gmra.mxu1 %v944_v49  ;;  %2345 = vmatpush.msra.mxu3 %v1330_v36  ;;  %v56_v49 = vld [vmem:[%s6021_s2 + $0x10] sm:$0xff] }
  0x4f   :  { %1596 = vmatmul.f32.gmra.mxu2 %v1061_v51  ;;  %1542 = vmatmul.f32.gmra.mxu0 %v827_v54  ;;  %v293_v51 = vunpack.c.h.bf16 %v3370_v34  ;;  %v294_v54 = vunpack.c.l.bf16 %v55_v19  ;;  %v296_v58 = vunpack.c.l.bf16 %v56_v49  ;;  %v69_v34 = vld [vmem:[%s6021_s2 + $0x70] sm:$0xff]  ;;  %v776_v14 = vmul.f32 %v3781_v53, %v306_v3  ;;  %v70_v19 = vld [vmem:[%s6021_s2 + $0x78] sm:$0xff]  ;;  %v1328_v49 = vld [vmem:[%s6019_s0 + $0x3e0] sm:$0xff] }
  0x50   :  { %2463 = vmatpush.msra.mxu0 %v1347_v17  ;;  %2107 = vmatpush.msra.mxu1 %v1298_v37  ;;  %v321_v60 = vunpack.c.h.bf16 %v69_v34  ;;  %v322_v27 = vunpack.c.l.bf16 %v70_v19  ;;  %v77_v36 = vld [vmem:[%s6021_s2 + $0xac] sm:$0xff]  ;;  %v332_v37 = vunpack.c.h.bf16 %v3537_v41  ;;  %v1344_v3 = vld [vmem:[%s6019_s0 + $0x460] sm:$0xff] }
  0x51   :  { %1623 = vmatmul.f32.gmra.mxu3 %v1178_v57  ;;  %v3784_v57 = vperm.slane %v3392_v43, 2  ;;  %v763_v61 = vmul.f32 %v3781_v53, %v293_v51  ;;  %v766_v63 = vmul.f32 %v3790_v59, %v296_v58  ;;  %v335_v42 = vunpack.c.l.bf16 %v77_v36  ;;  %v1296_v51 = vld [vmem:[%s6019_s0 + $0x2e0] sm:$0xff]  ;;  %v98_v19 = vld [vmem:[%s6021_s2 + $0x148] sm:$0xff] }
  0x52   :  { %2464 = vmatpush.msra.mxu0 %v1346_v46  ;;  %v791_v0 = vmul.f32 %v3739_v21, %v321_v60  ;;  %2108 = vmatpush.msra.mxu1 %v1297_v9  ;;  %v792_v15 = vmul.f32 %v3790_v59, %v322_v27  ;;  %v84_v46 = vld [vmem:[%s6021_s2 + $0xe0] sm:$0xff]  ;;  %v345_v58 = vunpack.c.h.bf16 %v3595_v5  ;;  %v374_v27 = vunpack.c.l.bf16 %v98_v19 }
  0x53   :  { %v764_v62 = vmul.f32 %v3784_v57, %v294_v54  ;;  %v777_v16 = vmul.f32 %v3784_v57, %v307_v4  ;;  %v805_v41 = vmul.f32 %v3790_v59, %v335_v42  ;;  %v348_v60 = vunpack.c.l.bf16 %v84_v46  ;;  %v91_v4 = vld [vmem:[%s6021_s2 + $0x114] sm:$0xff]  ;;  %v105_v36 = vld [vmem:[%s6021_s2 + $0x17c] sm:$0xff] }
  0x54   :  { %2109 = vmatpush.msra.mxu1 %v1296_v51  ;;  %v361_v9 = vunpack.c.l.bf16 %v91_v4  ;;  %v844_v56 = vmul.f32 %v3790_v59, %v374_v27  ;;  %v118_v42 = vld [vmem:[%s6021_s2 + $0x1dc] sm:$0xff]  ;;  %v112_v46 = vld [vmem:[%s6021_s2 + $0x1b0] sm:$0xff] }
  0x56   :  { %1572 = vmatmul.f32.gmra.mxu1 %v957_v6  ;;  %v1313_v6 = vld [vmem:[%s6019_s0 + $0x368] sm:$0xff] }
  0x57   :  { %1599 = vmatmul.f32.gmra.mxu2 %v1074_v7  ;;  %1545 = vmatmul.f32.gmra.mxu0 %v840_v10  ;;  %v1329_v7 = vld [vmem:[%s6019_s0 + $0x3e8] sm:$0xff]  ;;  %v309_v10 = vunpack.c.l.bf16 %v63_v1  ;;  %v818_v1 = vmul.f32 %v3790_v59, %v348_v60  ;;  %v1294_v60 = vld [vmem:[%s6019_s0 + $0x2d0] sm:$0xff] }
  0x58   :  { %2227 = vmatpush.msra.mxu2 %v1313_v6  ;;  %2346 = vmatpush.msra.mxu3 %v1329_v7  ;;  %v358_v6 = vunpack.c.h.bf16 %v3644_v29  ;;  %v831_v29 = vmul.f32 %v3790_v59, %v361_v9 }
  0x59   :  { %1626 = vmatmul.f32.gmra.mxu3 %v1191_v13  ;;  %v76_v13 = vld [vmem:[%s6021_s2 + $0xa4] sm:$0xff]  ;;  %v779_v17 = vmul.f32 %v3790_v59, %v309_v10  ;;  %v104_v10 = vld [vmem:[%s6021_s2 + $0x174] sm:$0xff] }
  0x5a   :  { %v334_v55 = vunpack.c.h.bf16 %v76_v13  ;;  %v333_v39 = vunpack.c.l.bf16 %v76_v13  ;;  %2228 = vmatpush.msra.mxu2 %v1312_v40  ;;  %2347 = vmatpush.msra.mxu3 %v1328_v49  ;;  %v386_v13 = vunpack.c.h.bf16 %v104_v10  ;;  %v387_v40 = vunpack.c.l.bf16 %v105_v36  ;;  %v1326_v49 = vld [vmem:[%s6019_s0 + $0x3d0] sm:$0xff]  ;;  %v139_v36 = vld [vmem:[%s6021_s2 + $0x278] sm:$0xff] }
  0x5c   :  { %v804_v18 = vmul.f32 %v3739_v21, %v334_v55  ;;  %v1311_v55 = vld [vmem:[%s6019_s0 + $0x358] sm:$0xff] }
  0x5d   :  { %2229 = vmatpush.msra.mxu2 %v1311_v55  ;;  %v411_v55 = vunpack.c.l.bf16 %v118_v42 }
  0x5e   :  { %1575 = vmatmul.f32.gmra.mxu1 %v970_v22  ;;  %v320_v22 = vunpack.c.l.bf16 %v69_v34 }
  0x5f   :  { %1602 = vmatmul.f32.gmra.mxu2 %v1087_v23  ;;  %1548 = vmatmul.f32.gmra.mxu0 %v853_v28  ;;  %v1345_v23 = vld [vmem:[%s6019_s0 + $0x468] sm:$0xff]  ;;  %v83_v28 = vld [vmem:[%s6021_s2 + $0xd8] sm:$0xff]  ;;  %v881_v19 = vmul.f32 %v3784_v57, %v411_v55  ;;  %v450_v55 = vunpack.c.l.bf16 %v139_v36 }
  0x60   :  { %2465 = vmatpush.msra.mxu0 %v1345_v23  ;;  %v790_v33 = vmul.f32 %v3784_v57, %v320_v22  ;;  %v346_v34 = vunpack.c.l.bf16 %v83_v28  ;;  %v1295_v23 = vld [vmem:[%s6019_s0 + $0x2d8] sm:$0xff] }
  0x61   :  { %1884 = vmatmul.f32.vlgmr.msrb.gmra.mxu3 %v765_v31  ;;  %v347_v31 = vunpack.c.h.bf16 %v83_v28  ;;  %v111_v28 = vld [vmem:[%s6021_s2 + $0x1a8] sm:$0xff]  ;;  %2110 = vmatpush.msra.mxu1 %v1295_v23 }
  0x62   :  { %2466 = vmatpush.msra.mxu0 %v1344_v3  ;;  %v1309_v23 = vld [vmem:[%s6019_s0 + $0x348] sm:$0xff] }
  0x63   :  { %v817_v35 = vmul.f32 %v3739_v21, %v347_v31  ;;  %v399_v31 = vunpack.c.h.bf16 %v111_v28  ;;  %2111 = vmatpush.msra.mxu1 %v1294_v60 }
  0x66   :  { %1578 = vmatmul.f32.gmra.mxu1 %v983_v44  ;;  %v90_v44 = vld [vmem:[%s6021_s2 + $0x10c] sm:$0xff] }
  0x67   :  { %1605 = vmatmul.f32.gmra.mxu2 %v1100_v45  ;;  %1551 = vmatmul.f32.gmra.mxu0 %v866_v47  ;;  %v360_v45 = vunpack.c.h.bf16 %v90_v44  ;;  %v802_v47 = vmul.f32 %v3781_v53, %v332_v37  ;;  %v359_v7 = vunpack.c.l.bf16 %v90_v44  ;;  %v384_v37 = vunpack.c.h.bf16 %v3727_v11  ;;  %v1310_v11 = vld [vmem:[%s6019_s0 + $0x350] sm:$0xff] }
  0x68   :  { %v412_v44 = vunpack.c.h.bf16 %v118_v42  ;;  %2230 = vmatpush.msra.mxu2 %v1310_v11  ;;  %v133_v11 = vld [vmem:[%s6021_s2 + $0x24c] sm:$0xff] }
  0x69   :  { %1887 = vmatmul.f32.gmra.mxu3 %v778_v48  ;;  %v803_v48 = vmul.f32 %v3784_v57, %v333_v39  ;;  %v830_v54 = vmul.f32 %v3739_v21, %v360_v45  ;;  %v385_v39 = vunpack.c.l.bf16 %v104_v10  ;;  %v854_v45 = vmul.f32 %v3781_v53, %v384_v37  ;;  %v119_v10 = vld [vmem:[%s6021_s2 + $0x1e4] sm:$0xff] }
  0x6a   :  { %2231 = vmatpush.msra.mxu2 %v1309_v23  ;;  %v451_v37 = vunpack.c.h.bf16 %v139_v36  ;;  %v920_v23 = vmul.f32 %v3784_v57, %v450_v55 }
  0x6e   :  { %1646 = vmatmul.f32.vlgmr.msrb.gmra.mxu1 %v763_v61  ;;  %v97_v61 = vld [vmem:[%s6021_s2 + $0x140] sm:$0xff] }
  0x6f   :  { %1765 = vmatmul.f32.vlgmr.msrb.gmra.mxu2 %v764_v62  ;;  %2003 = vmatmul.f32.vlgmr.msrb.gmra.mxu0 %v766_v63  ;;  %v373_v62 = vunpack.c.h.bf16 %v97_v61  ;;  %v815_v63 = vmul.f32 %v3781_v53, %v345_v58  ;;  %v372_v22 = vunpack.c.l.bf16 %v97_v61  ;;  %v397_v58 = vunpack.c.h.bf16 %v3755_v30 }
  0x70   :  { %v400_v61 = vunpack.c.l.bf16 %v112_v46  ;;  %v1341_v46 = vld [vmem:[%s6019_s0 + $0x448] sm:$0xff] }
  0x71   :  { %1890 = vmatmul.f32.gmra.mxu3 %v791_v0  ;;  %v816_v0 = vmul.f32 %v3784_v57, %v346_v34  ;;  %v843_v5 = vmul.f32 %v3739_v21, %v373_v62  ;;  %v398_v34 = vunpack.c.l.bf16 %v111_v28  ;;  %v125_v62 = vld [vmem:[%s6021_s2 + $0x210] sm:$0xff] }
  0x73   :  { %v868_v30 = vmul.f32 %v3784_v57, %v398_v34  ;;  %v146_v34 = vld [vmem:[%s6021_s2 + $0x2ac] sm:$0xff] }
  0x74   :  { %v464_v60 = vunpack.c.h.bf16 %v146_v34  ;;  %v463_v36 = vunpack.c.l.bf16 %v146_v34 }
  0x76   :  { %1649 = vmatmul.f32.gmra.mxu1 %v776_v14  ;;  %v828_v14 = vmul.f32 %v3781_v53, %v358_v6  ;;  %v1342_v6 = vld [vmem:[%s6019_s0 + $0x450] sm:$0xff] }
  0x77   :  { %1768 = vmatmul.f32.gmra.mxu2 %v777_v16  ;;  %2006 = vmatmul.f32.gmra.mxu0 %v779_v17  ;;  %v829_v16 = vmul.f32 %v3784_v57, %v359_v7  ;;  %v1327_v17 = vld [vmem:[%s6019_s0 + $0x3d8] sm:$0xff] }
  0x78   :  { %2348 = vmatpush.msra.mxu3 %v1327_v17 }
  0x79   :  { %1893 = vmatmul.f32.gmra.mxu3 %v804_v18  ;;  %v856_v18 = vmul.f32 %v3739_v21, %v386_v13  ;;  %v410_v13 = vunpack.c.h.bf16 %v3347_v26 }
  0x7a   :  { %2349 = vmatpush.msra.mxu3 %v1326_v49  ;;  %v436_v49 = vunpack.c.h.bf16 %v3470_v12 }
  0x7e   :  { %1652 = vmatmul.f32.gmra.mxu1 %v789_v32  ;;  %v841_v32 = vmul.f32 %v3781_v53, %v371_v20 }
  0x7f   :  { %1771 = vmatmul.f32.gmra.mxu2 %v790_v33  ;;  %2009 = vmatmul.f32.gmra.mxu0 %v792_v15  ;;  %v842_v33 = vmul.f32 %v3784_v57, %v372_v22  ;;  %v1343_v15 = vld [vmem:[%s6019_s0 + $0x458] sm:$0xff] }
  0x80   :  { %2467 = vmatpush.msra.mxu0 %v1343_v15  ;;  %v1293_v15 = vld [vmem:[%s6019_s0 + $0x2c8] sm:$0xff] }
  0x81   :  { %1896 = vmatmul.f32.gmra.mxu3 %v817_v35  ;;  %v869_v35 = vmul.f32 %v3739_v21, %v399_v31  ;;  %v126_v31 = vld [vmem:[%s6021_s2 + $0x218] sm:$0xff]  ;;  %2112 = vmatpush.msra.mxu1 %v1293_v15 }
  0x82   :  { %2468 = vmatpush.msra.mxu0 %v1342_v6  ;;  %v147_v15 = vld [vmem:[%s6021_s2 + $0x2b4] sm:$0xff] }
  0x84   :  { %2469 = vmatpush.msra.mxu0 %v1341_v46 }
  0x86   :  { %1655 = vmatmul.f32.gmra.mxu1 %v802_v47  ;;  %v855_v47 = vmul.f32 %v3784_v57, %v385_v39 }
  0x87   :  { %1774 = vmatmul.f32.gmra.mxu2 %v803_v48  ;;  %2012 = vmatmul.f32.gmra.mxu0 %v805_v41  ;;  %v857_v41 = vmul.f32 %v3790_v59, %v387_v40 }
  0x89   :  { %1899 = vmatmul.f32.gmra.mxu3 %v830_v54  ;;  %v882_v54 = vmul.f32 %v3739_v21, %v412_v44 }
  0x8e   :  { %1658 = vmatmul.f32.gmra.mxu1 %v815_v63  ;;  %v425_v63 = vunpack.c.h.bf16 %v125_v62 }
  0x8f   :  { %1777 = vmatmul.f32.gmra.mxu2 %v816_v0  ;;  %2015 = vmatmul.f32.gmra.mxu0 %v818_v1  ;;  %v867_v1 = vmul.f32 %v3781_v53, %v397_v58  ;;  %v439_v58 = vunpack.c.l.bf16 %v133_v11 }
  0x90   :  { %v895_v9 = vmul.f32 %v3739_v21, %v425_v63 }
  0x91   :  { %1902 = vmatmul.f32.gmra.mxu3 %v843_v5  ;;  %v870_v5 = vmul.f32 %v3790_v59, %v400_v61 }
  0x96   :  { %1661 = vmatmul.f32.gmra.mxu1 %v828_v14  ;;  %v413_v14 = vunpack.c.l.bf16 %v119_v10  ;;  %v140_v10 = vld [vmem:[%s6021_s2 + $0x280] sm:$0xff] }
  0x97   :  { %1780 = vmatmul.f32.gmra.mxu2 %v829_v16  ;;  %2018 = vmatmul.f32.gmra.mxu0 %v831_v29  ;;  %v132_v16 = vld [vmem:[%s6021_s2 + $0x244] sm:$0xff] }
  0x98   :  { %v438_v29 = vunpack.c.h.bf16 %v132_v16  ;;  %v883_v22 = vmul.f32 %v3790_v59, %v413_v14  ;;  %v1324_v14 = vld [vmem:[%s6019_s0 + $0x3c0] sm:$0xff] }
  0x99   :  { %1905 = vmatmul.f32.gmra.mxu3 %v856_v18  ;;  %v880_v18 = vmul.f32 %v3781_v53, %v410_v13  ;;  %v449_v13 = vunpack.c.h.bf16 %v3528_v38  ;;  %v1292_v38 = vld [vmem:[%s6019_s0 + $0x2c0] sm:$0xff] }
  0x9a   :  { %v908_v28 = vmul.f32 %v3739_v21, %v438_v29  ;;  %v153_v29 = vld [vmem:[%s6021_s2 + $0x2e0] sm:$0xff]  ;;  %2113 = vmatpush.msra.mxu1 %v1292_v38 }
  0x9e   :  { %1664 = vmatmul.f32.gmra.mxu1 %v841_v32  ;;  %v423_v32 = vunpack.c.h.bf16 %v3410_v50 }
  0x9f   :  { %1783 = vmatmul.f32.gmra.mxu2 %v842_v33  ;;  %2021 = vmatmul.f32.gmra.mxu0 %v844_v56  ;;  %v424_v33 = vunpack.c.l.bf16 %v125_v62  ;;  %v1325_v56 = vld [vmem:[%s6019_s0 + $0x3c8] sm:$0xff]  ;;  %v906_v62 = vmul.f32 %v3781_v53, %v436_v49 }
  0xa0   :  { %2350 = vmatpush.msra.mxu3 %v1325_v56  ;;  %v893_v39 = vmul.f32 %v3781_v53, %v423_v32 }
  0xa1   :  { %1908 = vmatmul.f32.gmra.mxu3 %v869_v35  ;;  %v426_v35 = vunpack.c.l.bf16 %v126_v31  ;;  %v894_v40 = vmul.f32 %v3784_v57, %v424_v33 }
  0xa2   :  { %v3910_v48 = vpop.f32.mrf.mxu1  ;;  %2351 = vmatpush.msra.mxu3 %v1324_v14 }
  0xa3   :  { %v896_v44 = vmul.f32 %v3790_v59, %v426_v35  ;;  %v462_v35 = vunpack.c.h.bf16 %v3586_v2  ;;  %v933_v2 = vmul.f32 %v3784_v57, %v463_v36 }
  0xa4   :  { %v3919_v51 = vpop.f32.mrf.mxu0 }
  0xa5   :  { %v932_v11 = vmul.f32 %v3781_v53, %v462_v35  ;;  %v1339_v35 = vld [vmem:[%s6019_s0 + $0x438] sm:$0xff] }
  0xa6   :  { %1667 = vmatmul.f32.gmra.mxu1 %v854_v45 }
  0xa7   :  { %1786 = vmatmul.f32.gmra.mxu2 %v855_v47  ;;  %2024 = vmatmul.f32.gmra.mxu0 %v857_v41  ;;  %v921_v41 = vmul.f32 %v3739_v21, %v451_v37  ;;  %v1340_v37 = vld [vmem:[%s6019_s0 + $0x440] sm:$0xff] }
  0xa8   :  { %2470 = vmatpush.msra.mxu0 %v1340_v37  ;;  %v174_v37 = vld [vmem:[%s6021_s2 + $0x37c] sm:$0xff] }
  0xa9   :  { %1911 = vmatmul.f32.gmra.mxu3 %v882_v54  ;;  %v437_v54 = vunpack.c.l.bf16 %v132_v16  ;;  %v452_v16 = vunpack.c.l.bf16 %v140_v10  ;;  %v167_v10 = vld [vmem:[%s6021_s2 + $0x348] sm:$0xff] }
  0xaa   :  { %v3932_v0 = vpop.f32.mrf.mxu2  ;;  %2471 = vmatpush.msra.mxu0 %v1339_v35  ;;  %v175_v35 = vld [vmem:[%s6021_s2 + $0x384] sm:$0xff] }
  0xab   :  { %v3936_v3 = vpop.f32.mrf.mxu1  ;;  %v3939_v4 = vpop.f32.mrf.mxu3  ;;  %v907_v12 = vmul.f32 %v3784_v57, %v437_v54  ;;  %v922_v31 = vmul.f32 %v3790_v59, %v452_v16  ;;  %v1291_v16 = vld [vmem:[%s6019_s0 + $0x2b8] sm:$0xff] }
  0xac   :  { %v3944_v7 = vpop.f32.mrf.mxu0  ;;  %2114 = vmatpush.msra.mxu1 %v1291_v16 }
  0xae   :  { %1670 = vmatmul.f32.gmra.mxu1 %v867_v1  ;;  %v909_v1 = vmul.f32 %v3790_v59, %v439_v58 }
  0xaf   :  { %1789 = vmatmul.f32.gmra.mxu2 %v868_v30  ;;  %2027 = vmatmul.f32.gmra.mxu0 %v870_v5  ;;  %v1308_v5 = vld [vmem:[%s6019_s0 + $0x340] sm:$0xff] }
  0xb0   :  { %2232 = vmatpush.msra.mxu2 %v1308_v5  ;;  %v1323_v5 = vld [vmem:[%s6019_s0 + $0x3b8] sm:$0xff] }
  0xb1   :  { %1914 = vmatmul.f32.gmra.mxu3 %v895_v9  ;;  %v934_v9 = vmul.f32 %v3739_v21, %v464_v60  ;;  %v154_v60 = vld [vmem:[%s6021_s2 + $0x2e8] sm:$0xff] }
  0xb2   :  { %v3954_v17 = vpop.f32.mrf.mxu2  ;;  %2352 = vmatpush.msra.mxu3 %v1323_v5  ;;  %v1306_v5 = vld [vmem:[%s6019_s0 + $0x330] sm:$0xff] }
  0xb3   :  { %v3958_v20 = vpop.f32.mrf.mxu1 }
  0xb4   :  { %v3961_v26 = vpop.f32.mrf.mxu3  ;;  %v3966_v27 = vpop.f32.mrf.mxu0 }
  0xb6   :  { %1673 = vmatmul.f32.gmra.mxu1 %v880_v18  ;;  %v477_v18 = vunpack.c.h.bf16 %v153_v29 }
  0xb7   :  { %1792 = vmatmul.f32.gmra.mxu2 %v881_v19  ;;  %2030 = vmatmul.f32.gmra.mxu0 %v883_v22  ;;  %v919_v22 = vmul.f32 %v3781_v53, %v449_v13  ;;  %v503_v13 = vunpack.c.h.bf16 %v167_v10 }
  0xb8   :  { %v947_v56 = vmul.f32 %v3739_v21, %v477_v18 }
  0xb9   :  { %1917 = vmatmul.f32.gmra.mxu3 %v908_v28 }
  0xba   :  { %v3982_v50 = vpop.f32.mrf.mxu2 }
  0xbb   :  { %v3986_v42 = vpop.f32.mrf.mxu1 }
  0xbc   :  { %v3989_v45 = vpop.f32.mrf.mxu3  ;;  %v3991_v47 = vpop.f32.mrf.mxu0 }
  0xbe   :  { %1676 = vmatmul.f32.gmra.mxu1 %v893_v39  ;;  %v465_v39 = vunpack.c.l.bf16 %v147_v15 }
  0xbf   :  { %1795 = vmatmul.f32.gmra.mxu2 %v894_v40  ;;  %2033 = vmatmul.f32.gmra.mxu0 %v896_v44  ;;  %v160_v40 = vld [vmem:[%s6021_s2 + $0x314] sm:$0xff] }
  0xc0   :  { %v490_v44 = vunpack.c.h.bf16 %v160_v40  ;;  %v935_v54 = vmul.f32 %v3790_v59, %v465_v39  ;;  %v489_v15 = vunpack.c.l.bf16 %v160_v40  ;;  %v516_v39 = vunpack.c.h.bf16 %v174_v37 }
  0xc1   :  { %1920 = vmatmul.f32.gmra.mxu3 %v921_v41 }
  0xc2   :  { %v4004_v61 = vpop.f32.mrf.mxu2  ;;  %v960_v34 = vmul.f32 %v3739_v21, %v490_v44 }
  0xc3   :  { %v4008_v63 = vpop.f32.mrf.mxu1 }
  0xc4   :  { %v4011_v30 = vpop.f32.mrf.mxu3  ;;  %v4016_v6 = vpop.f32.mrf.mxu0 }
  0xc6   :  { %1679 = vmatmul.f32.gmra.mxu1 %v906_v62  ;;  %v475_v62 = vunpack.c.h.bf16 %v3635_v25 }
  0xc7   :  { %1798 = vmatmul.f32.gmra.mxu2 %v907_v12  ;;  %2036 = vmatmul.f32.gmra.mxu0 %v909_v1  ;;  %v476_v12 = vunpack.c.l.bf16 %v153_v29  ;;  %v1307_v1 = vld [vmem:[%s6019_s0 + $0x338] sm:$0xff] }
  0xc8   :  { %2233 = vmatpush.msra.mxu2 %v1307_v1  ;;  %v945_v25 = vmul.f32 %v3781_v53, %v475_v62  ;;  %v168_v62 = vld [vmem:[%s6021_s2 + $0x350] sm:$0xff]  ;;  %v502_v1 = vunpack.c.l.bf16 %v167_v10 }
  0xc9   :  { %1923 = vmatmul.f32.gmra.mxu3 %v934_v9  ;;  %v478_v9 = vunpack.c.l.bf16 %v154_v60  ;;  %v946_v14 = vmul.f32 %v3784_v57, %v476_v12  ;;  %v986_v60 = vmul.f32 %v3739_v21, %v516_v39  ;;  %v501_v12 = vunpack.c.h.bf16 %v3718_v8  ;;  %v1322_v10 = vld [vmem:[%s6019_s0 + $0x3b0] sm:$0xff] }
  0xca   :  { %v4029_v19 = vpop.f32.mrf.mxu2  ;;  %2234 = vmatpush.msra.mxu2 %v1306_v5  ;;  %v972_v16 = vmul.f32 %v3784_v57, %v502_v1  ;;  %2353 = vmatpush.msra.mxu3 %v1322_v10  ;;  %v514_v39 = vunpack.c.h.bf16 %v3746_v24  ;;  %v1338_v24 = vld [vmem:[%s6019_s0 + $0x430] sm:$0xff] }
  0xcb   :  { %v4036_v28 = vpop.f32.mrf.mxu1  ;;  %v948_v18 = vmul.f32 %v3790_v59, %v478_v9  ;;  %v504_v9 = vunpack.c.l.bf16 %v168_v62  ;;  %v971_v8 = vmul.f32 %v3781_v53, %v501_v12  ;;  %2472 = vmatpush.msra.mxu0 %v1338_v24 }
  0xcc   :  { %v4039_v32 = vpop.f32.mrf.mxu3  ;;  %v4041_v33 = vpop.f32.mrf.mxu0  ;;  %v984_v5 = vmul.f32 %v3781_v53, %v514_v39 }
  0xce   :  { %1682 = vmatmul.f32.gmra.mxu1 %v919_v22 }
  0xcf   :  { %1801 = vmatmul.f32.gmra.mxu2 %v920_v23  ;;  %2039 = vmatmul.f32.gmra.mxu0 %v922_v31  ;;  %v973_v23 = vmul.f32 %v3739_v21, %v503_v13  ;;  %v161_v31 = vld [vmem:[%s6021_s2 + $0x31c] sm:$0xff]  ;;  %v181_v13 = vld [vmem:[%s6021_s2 + $0x3b0] sm:$0xff] }
  0xd0   :  { %v491_v36 = vunpack.c.l.bf16 %v161_v31 }
  0xd1   :  { %1926 = vmatmul.f32.gmra.mxu3 %v947_v56  ;;  %v488_v56 = vunpack.c.h.bf16 %v3681_v52 }
  0xd2   :  { %v4054_v41 = vpop.f32.mrf.mxu2 }
  0xd3   :  { %v4058_v49 = vpop.f32.mrf.mxu1  ;;  %v958_v52 = vmul.f32 %v3781_v53, %v488_v56 }
  0xd4   :  { %v4061_v46 = vpop.f32.mrf.mxu3  ;;  %v4063_v58 = vpop.f32.mrf.mxu0 }
  0xd6   :  { %1685 = vmatmul.f32.gmra.mxu1 %v932_v11  ;;  %v959_v11 = vmul.f32 %v3784_v57, %v489_v15 }
  0xd7   :  { %1804 = vmatmul.f32.gmra.mxu2 %v933_v2  ;;  %2042 = vmatmul.f32.gmra.mxu0 %v935_v54  ;;  %v961_v2 = vmul.f32 %v3790_v59, %v491_v36  ;;  %v1290_v36 = vld [vmem:[%s6019_s0 + $0x2b0] sm:$0xff] }
  0xd8   :  { %2115 = vmatpush.msra.mxu1 %v1290_v36  ;;  %v528_v36 = vunpack.c.l.bf16 %v181_v13 }
  0xd9   :  { %1929 = vmatmul.f32.gmra.mxu3 %v960_v34 }
  0xda   :  { %v4079_v55 = vpop.f32.mrf.mxu2 }
  0xdb   :  { %v4086_v29 = vpop.f32.mrf.mxu1 }
  0xdc   :  { %v4089_v38 = vpop.f32.mrf.mxu3  ;;  %v4091_v22 = vpop.f32.mrf.mxu0 }
  0xde   :  { %1688 = vmatmul.f32.gmra.mxu1 %v945_v25  ;;  %v529_v25 = vunpack.c.h.bf16 %v181_v13  ;;  %v998_v13 = vmul.f32 %v3784_v57, %v528_v36 }
  0xdf   :  { %1807 = vmatmul.f32.gmra.mxu2 %v946_v14  ;;  %2045 = vmatmul.f32.gmra.mxu0 %v948_v18 }
  0xe0   :  { %v999_v15 = vmul.f32 %v3739_v21, %v529_v25 }
  0xe1   :  { %1932 = vmatmul.f32.gmra.mxu3 %v973_v23  ;;  %v974_v23 = vmul.f32 %v3790_v59, %v504_v9 }
  0xe2   :  { %v4104_v44 = vpop.f32.mrf.mxu2 }
  0xe3   :  { %v4108_v40 = vpop.f32.mrf.mxu1 }
  0xe4   :  { %v1885_v54 = vpop.f32.mrf.mxu3  ;;  %v4111_v34 = vpop.f32.mrf.mxu0 }
  0xe6   :  { %1691 = vmatmul.f32.gmra.mxu1 %v958_v52  ;;  %v515_v52 = vunpack.c.l.bf16 %v174_v37 }
  0xe7   :  { %1810 = vmatmul.f32.gmra.mxu2 %v959_v11  ;;  %2048 = vmatmul.f32.gmra.mxu0 %v961_v2  ;;  %v517_v11 = vunpack.c.l.bf16 %v175_v35  ;;  %v188_v2 = vld [vmem:[%s6021_s2 + $0x3e4] sm:$0xff] }
  0xe8   :  { %v542_v62 = vunpack.c.h.bf16 %v188_v2  ;;  %v985_v9 = vmul.f32 %v3784_v57, %v515_v52  ;;  %v195_v52 = vld [vmem:[%s6021_s2 + $0x418] sm:$0xff] }
  0xe9   :  { %1935 = vmatmul.f32.gmra.mxu3 %v986_v60  ;;  %v987_v25 = vmul.f32 %v3790_v59, %v517_v11 }
  0xea   :  { %v4124_v14 = vpop.f32.mrf.mxu2 }
  0xeb   :  { %v1647_v18 = vpop.f32.mrf.mxu1 }
  0xec   :  { %v1888_v31 = vpop.f32.mrf.mxu3  ;;  %v2004_v56 = vpop.f32.mrf.mxu0  ;;  %v1648_v60 = vadd.f32 %v1647_v18, %v3919_v51  ;;  %v1012_v51 = vmul.f32 %v3739_v21, %v542_v62  ;;  %v182_v18 = vld [vmem:[%s6021_s2 + $0x3b8] sm:$0xff] }
  0xed   :  { %v530_v39 = vunpack.c.l.bf16 %v182_v18  ;;  %v3190_v18 = vld [vmem:[%s6021_s2 + $0x3dc] sm:$0xff] }
  0xee   :  { %1694 = vmatmul.f32.gmra.mxu1 %v971_v8 }
  0xef   :  { %1813 = vmatmul.f32.gmra.mxu2 %v972_v16  ;;  %2051 = vmatmul.f32.gmra.mxu0 %v974_v23  ;;  %v3189_v23 = vld [vmem:[%s6021_s2 + $0x3a8] sm:$0xff] }
  0xf1   :  { %1938 = vmatmul.f32.gmra.mxu3 %v999_v15  ;;  %v527_v15 = vunpack.c.h.bf16 %v3189_v23  ;;  %v540_v23 = vunpack.c.h.bf16 %v3190_v18  ;;  %v554_v18 = vunpack.c.l.bf16 %v195_v52 }
  0xf2   :  { %v1766_v12 = vpop.f32.mrf.mxu2 }
  0xf3   :  { %v1767_v1 = vadd.f32 %v1766_v12, %v1648_v60  ;;  %v1650_v37 = vpop.f32.mrf.mxu1  ;;  %v555_v60 = vunpack.c.h.bf16 %v195_v52  ;;  %v997_v12 = vmul.f32 %v3781_v53, %v527_v15  ;;  %v1304_v52 = vld [vmem:[%s6019_s0 + $0x320] sm:$0xff] }
  0xf4   :  { %v1891_v8 = vpop.f32.mrf.mxu3  ;;  %v2007_v10 = vpop.f32.mrf.mxu0  ;;  %v1651_v11 = vadd.f32 %v1650_v37, %v3944_v7  ;;  %v189_v37 = vld [vmem:[%s6021_s2 + $0x3ec] sm:$0xff] }
  0xf5   :  { %v1886_v16 = vadd.f32 %v1885_v54, %v1767_v1  ;;  %v1305_v54 = vld [vmem:[%s6019_s0 + $0x328] sm:$0xff]  ;;  %v1025_v7 = vmul.f32 %v3739_v21, %v555_v60  ;;  %v543_v36 = vunpack.c.l.bf16 %v189_v37 }
  0xf6   :  { %1697 = vmatmul.f32.gmra.mxu1 %v984_v5  ;;  %2235 = vmatpush.msra.mxu2 %v1305_v54  ;;  %v1321_v1 = vld [vmem:[%s6019_s0 + $0x3a8] sm:$0xff] }
  0xf7   :  { %v4157_v35 = vadd.f32 %v2004_v56, %v1886_v16  ;;  %1816 = vmatmul.f32.gmra.mxu2 %v985_v9  ;;  %2054 = vmatmul.f32.gmra.mxu0 %v987_v25  ;;  %v1000_v9 = vmul.f32 %v3790_v59, %v530_v39  ;;  %v202_v54 = vld [vmem:[%s6021_s2 + $0x44c] sm:$0xff] }
  0xf8   :  { %2354 = vmatpush.msra.mxu3 %v1321_v1  ;;  %2236 = vmatpush.msra.mxu2 %v1304_v52 }
  0xf9   :  { %1941 = vmatmul.f32.gmra.mxu3 %v1012_v51  ;;  %v1289_v51 = vld [vmem:[%s6019_s0 + $0x2a8] sm:$0xff] }
  0xfa   :  { %v1769_v56 = vpop.f32.mrf.mxu2  ;;  %2116 = vmatpush.msra.mxu1 %v1289_v51 }
  0xfb   :  { %v1770_v62 = vadd.f32 %v1769_v56, %v1651_v11  ;;  %v1653_v5 = vpop.f32.mrf.mxu1  ;;  %v568_v11 = vunpack.c.h.bf16 %v202_v54 }
  0xfc   :  { %v1894_v24 = vpop.f32.mrf.mxu3  ;;  %v2010_v16 = vpop.f32.mrf.mxu0  ;;  %v1654_v39 = vadd.f32 %v1653_v5, %v3966_v27  ;;  %v196_v5 = vld [vmem:[%s6021_s2 + $0x420] sm:$0xff] }
  0xfd   :  { %v1889_v25 = vadd.f32 %v1888_v31, %v1770_v62  ;;  %v541_v31 = vunpack.c.l.bf16 %v188_v2  ;;  %v1010_v62 = vmul.f32 %v3781_v53, %v540_v23  ;;  %v1337_v2 = vld [vmem:[%s6019_s0 + $0x428] sm:$0xff]  ;;  %v1038_v27 = vmul.f32 %v3739_v21, %v568_v11 }
  0xfe   :  { %1700 = vmatmul.f32.gmra.mxu1 %v997_v12  ;;  %2473 = vmatpush.msra.mxu0 %v1337_v2  ;;  %v556_v23 = vunpack.c.l.bf16 %v196_v5 }
  0xff   :  { %v4182_v15 = vadd.f32 %v2007_v10, %v1889_v25  ;;  %1819 = vmatmul.f32.gmra.mxu2 %v998_v13  ;;  %2057 = vmatmul.f32.gmra.mxu0 %v1000_v9  ;;  %v1011_v10 = vmul.f32 %v3784_v57, %v541_v31  ;;  %v1013_v13 = vmul.f32 %v3790_v59, %v543_v36 }
 0x101   :  { %1944 = vmatmul.f32.gmra.mxu3 %v1025_v7  ;;  %v3191_v7 = vld [vmem:[%s6021_s2 + $0x410] sm:$0xff] }
 0x102   :  { %v1772_v60 = vpop.f32.mrf.mxu2  ;;  %v553_v37 = vunpack.c.h.bf16 %v3191_v7 }
 0x103   :  { %v1773_v56 = vadd.f32 %v1772_v60, %v1654_v39  ;;  %v1656_v12 = vpop.f32.mrf.mxu1 }
 0x104   :  { %v1897_v1 = vpop.f32.mrf.mxu3  ;;  %v2013_v25 = vpop.f32.mrf.mxu0  ;;  %v1657_v31 = vadd.f32 %v1656_v12, %v3991_v47  ;;  %v1023_v60 = vmul.f32 %v3781_v53, %v553_v37  ;;  %v203_v12 = vld [vmem:[%s6021_s2 + $0x454] sm:$0xff]  ;;  %v1288_v37 = vld [vmem:[%s6019_s0 + $0x2a0] sm:$0xff] }
 0x105   :  { %v1892_v9 = vadd.f32 %v1891_v8, %v1773_v56  ;;  %v209_v8 = vld [vmem:[%s6021_s2 + $0x480] sm:$0xff]  ;;  %2117 = vmatpush.msra.mxu1 %v1288_v37 }
 0x106   :  { %1703 = vmatmul.f32.gmra.mxu1 %v1010_v62  ;;  %v581_v36 = vunpack.c.h.bf16 %v209_v8  ;;  %v1026_v62 = vmul.f32 %v3790_v59, %v556_v23  ;;  %v4231_v23 = vld [vmem:[%s6021_s2 + $0x4b4] sm:$0xff] }
 0x107   :  { %v4201_v51 = vadd.f32 %v2010_v16, %v1892_v9  ;;  %1822 = vmatmul.f32.gmra.mxu2 %v1011_v10  ;;  %2060 = vmatmul.f32.gmra.mxu0 %v1013_v13  ;;  %v1024_v16 = vmul.f32 %v3784_v57, %v554_v18  ;;  %v1320_v9 = vld [vmem:[%s6019_s0 + $0x3a0] sm:$0xff]  ;;  %v569_v18 = vunpack.c.l.bf16 %v203_v12 }
 0x108   :  { %v1051_v47 = vmul.f32 %v3739_v21, %v581_v36  ;;  %2355 = vmatpush.msra.mxu3 %v1320_v9 }
 0x109   :  { %1947 = vmatmul.f32.gmra.mxu3 %v1038_v27  ;;  %v3192_v27 = vld [vmem:[%s6021_s2 + $0x444] sm:$0xff] }
 0x10a   :  { %v1775_v39 = vpop.f32.mrf.mxu2  ;;  %v566_v5 = vunpack.c.h.bf16 %v3192_v27 }
 0x10b   :  { %v1776_v11 = vadd.f32 %v1775_v39, %v1657_v31  ;;  %v1659_v56 = vpop.f32.mrf.mxu1 }
 0x10c   :  { %v1900_v10 = vpop.f32.mrf.mxu3  ;;  %v2016_v13 = vpop.f32.mrf.mxu0  ;;  %v1660_v31 = vadd.f32 %v1659_v56, %v4016_v6  ;;  %v210_v6 = vld [vmem:[%s6021_s2 + $0x488] sm:$0xff]  ;;  %v1336_v56 = vld [vmem:[%s6019_s0 + $0x420] sm:$0xff] }
 0x10d   :  { %v1895_v2 = vadd.f32 %v1894_v24, %v1776_v11  ;;  %v567_v24 = vunpack.c.l.bf16 %v202_v54  ;;  %v1036_v54 = vmul.f32 %v3781_v53, %v566_v5  ;;  %2474 = vmatpush.msra.mxu0 %v1336_v56  ;;  %v582_v5 = vunpack.c.l.bf16 %v210_v6  ;;  %v3194_v6 = vld [vmem:[%s6021_s2 + $0x4ac] sm:$0xff] }
 0x10e   :  { %1706 = vmatmul.f32.gmra.mxu1 %v1023_v60  ;;  %v592_v56 = vunpack.c.h.bf16 %v3194_v6 }
 0x10f   :  { %v4223_v7 = vadd.f32 %v2013_v25, %v1895_v2  ;;  %1825 = vmatmul.f32.gmra.mxu2 %v1024_v16  ;;  %2063 = vmatmul.f32.gmra.mxu0 %v1026_v62  ;;  %v594_v25 = vunpack.c.h.bf16 %v4231_v23  ;;  %v1037_v11 = vmul.f32 %v3784_v57, %v567_v24  ;;  %v1039_v16 = vmul.f32 %v3790_v59, %v569_v18  ;;  %v223_v24 = vld [vmem:[%s6021_s2 + $0x4e8] sm:$0xff] }
 0x110   :  { %v607_v18 = vunpack.c.h.bf16 %v223_v24 }
 0x111   :  { %1950 = vmatmul.f32.gmra.mxu3 %v1051_v47  ;;  %v1064_v12 = vmul.f32 %v3739_v21, %v594_v25  ;;  %v3193_v47 = vld [vmem:[%s6021_s2 + $0x478] sm:$0xff] }
 0x112   :  { %v1778_v36 = vpop.f32.mrf.mxu2  ;;  %v579_v9 = vunpack.c.h.bf16 %v3193_v47 }
 0x113   :  { %v1779_v39 = vadd.f32 %v1778_v36, %v1660_v31  ;;  %v1662_v60 = vpop.f32.mrf.mxu1 }
 0x114   :  { %v1903_v52 = vpop.f32.mrf.mxu3  ;;  %v2019_v2 = vpop.f32.mrf.mxu0  ;;  %v1663_v37 = vadd.f32 %v1662_v60, %v4041_v33  ;;  %v1049_v36 = vmul.f32 %v3781_v53, %v579_v9  ;;  %v1077_v33 = vmul.f32 %v3739_v21, %v607_v18  ;;  %v217_v60 = vld [vmem:[%s6021_s2 + $0x4bc] sm:$0xff] }
 0x115   :  { %v1898_v62 = vadd.f32 %v1897_v1, %v1779_v39  ;;  %v580_v1 = vunpack.c.l.bf16 %v209_v8  ;;  %v1303_v8 = vld [vmem:[%s6019_s0 + $0x318] sm:$0xff] }
 0x116   :  { %1709 = vmatmul.f32.gmra.mxu1 %v1036_v54  ;;  %v1052_v54 = vmul.f32 %v3790_v59, %v582_v5  ;;  %2237 = vmatpush.msra.mxu2 %v1303_v8  ;;  %v1287_v9 = vld [vmem:[%s6019_s0 + $0x298] sm:$0xff] }
 0x117   :  { %v4248_v27 = vadd.f32 %v2016_v13, %v1898_v62  ;;  %1828 = vmatmul.f32.gmra.mxu2 %v1037_v11  ;;  %2066 = vmatmul.f32.gmra.mxu0 %v1039_v16  ;;  %v1050_v13 = vmul.f32 %v3784_v57, %v580_v1  ;;  %v595_v1 = vunpack.c.l.bf16 %v217_v60  ;;  %v4279_v5 = vld [vmem:[%s6021_s2 + $0x51c] sm:$0xff] }
 0x118   :  { %2118 = vmatpush.msra.mxu1 %v1287_v9 }
 0x119   :  { %1953 = vmatmul.f32.gmra.mxu3 %v1064_v12  ;;  %v1319_v12 = vld [vmem:[%s6019_s0 + $0x398] sm:$0xff] }
 0x11a   :  { %v1781_v31 = vpop.f32.mrf.mxu2  ;;  %2356 = vmatpush.msra.mxu3 %v1319_v12 }
 0x11b   :  { %v1782_v25 = vadd.f32 %v1781_v31, %v1663_v37  ;;  %v1665_v39 = vpop.f32.mrf.mxu1 }
 0x11c   :  { %v1906_v11 = vpop.f32.mrf.mxu3  ;;  %v2022_v62 = vpop.f32.mrf.mxu0  ;;  %v1666_v37 = vadd.f32 %v1665_v39, %v4063_v58  ;;  %v224_v58 = vld [vmem:[%s6021_s2 + $0x4f0] sm:$0xff]  ;;  %v1335_v39 = vld [vmem:[%s6019_s0 + $0x418] sm:$0xff] }
 0x11d   :  { %v1901_v16 = vadd.f32 %v1900_v10, %v1782_v25  ;;  %v593_v10 = vunpack.c.l.bf16 %v4231_v23  ;;  %v1062_v23 = vmul.f32 %v3781_v53, %v592_v56  ;;  %2475 = vmatpush.msra.mxu0 %v1335_v39  ;;  %v608_v56 = vunpack.c.l.bf16 %v224_v58 }
 0x11e   :  { %1712 = vmatmul.f32.gmra.mxu1 %v1049_v36 }
 0x11f   :  { %v4270_v47 = vadd.f32 %v2019_v2, %v1901_v16  ;;  %1831 = vmatmul.f32.gmra.mxu2 %v1050_v13  ;;  %2069 = vmatmul.f32.gmra.mxu0 %v1052_v54  ;;  %v620_v2 = vunpack.c.h.bf16 %v4279_v5  ;;  %v1063_v25 = vmul.f32 %v3784_v57, %v593_v10  ;;  %v1065_v13 = vmul.f32 %v3790_v59, %v595_v1  ;;  %v237_v10 = vld [vmem:[%s6021_s2 + $0x550] sm:$0xff] }
 0x120   :  { %v633_v1 = vunpack.c.h.bf16 %v237_v10 }
 0x121   :  { %1956 = vmatmul.f32.gmra.mxu3 %v1077_v33  ;;  %v1090_v60 = vmul.f32 %v3739_v21, %v620_v2  ;;  %v3195_v33 = vld [vmem:[%s6021_s2 + $0x4e0] sm:$0xff] }
 0x122   :  { %v1784_v18 = vpop.f32.mrf.mxu2  ;;  %v605_v12 = vunpack.c.h.bf16 %v3195_v33  ;;  %v1318_v33 = vld [vmem:[%s6019_s0 + $0x390] sm:$0xff] }
 0x123   :  { %v1785_v31 = vadd.f32 %v1784_v18, %v1666_v37  ;;  %v1668_v36 = vpop.f32.mrf.mxu1  ;;  %2357 = vmatpush.msra.mxu3 %v1318_v33  ;;  %v4349_v33 = vld [vmem:[%s6021_s2 + $0x5b8] sm:$0xff] }
 0x124   :  { %v1909_v8 = vpop.f32.mrf.mxu3  ;;  %v2025_v16 = vpop.f32.mrf.mxu0  ;;  %v1669_v9 = vadd.f32 %v1668_v36, %v4091_v22  ;;  %v1075_v18 = vmul.f32 %v3781_v53, %v605_v12  ;;  %v231_v22 = vld [vmem:[%s6021_s2 + $0x524] sm:$0xff]  ;;  %v1302_v36 = vld [vmem:[%s6019_s0 + $0x310] sm:$0xff] }
 0x125   :  { %v1904_v54 = vadd.f32 %v1903_v52, %v1785_v31  ;;  %v606_v52 = vunpack.c.l.bf16 %v223_v24  ;;  %2238 = vmatpush.msra.mxu2 %v1302_v36  ;;  %v1286_v12 = vld [vmem:[%s6019_s0 + $0x290] sm:$0xff] }
 0x126   :  { %1715 = vmatmul.f32.gmra.mxu1 %v1062_v23  ;;  %v1078_v23 = vmul.f32 %v3790_v59, %v608_v56  ;;  %v4327_v56 = vld [vmem:[%s6021_s2 + $0x584] sm:$0xff] }
 0x127   :  { %v4296_v6 = vadd.f32 %v2022_v62, %v1904_v54  ;;  %1834 = vmatmul.f32.gmra.mxu2 %v1063_v25  ;;  %2072 = vmatmul.f32.gmra.mxu0 %v1065_v13  ;;  %v1076_v62 = vmul.f32 %v3784_v57, %v606_v52  ;;  %v1103_v54 = vmul.f32 %v3739_v21, %v633_v1  ;;  %v621_v52 = vunpack.c.l.bf16 %v231_v22 }
 0x128   :  { %2119 = vmatpush.msra.mxu1 %v1286_v12 }
 0x129   :  { %1959 = vmatmul.f32.gmra.mxu3 %v1090_v60  ;;  %v3196_v60 = vld [vmem:[%s6021_s2 + $0x514] sm:$0xff] }
 0x12a   :  { %v1787_v37 = vpop.f32.mrf.mxu2  ;;  %v618_v58 = vunpack.c.h.bf16 %v3196_v60 }
 0x12b   :  { %v1788_v2 = vadd.f32 %v1787_v37, %v1669_v9  ;;  %v1671_v31 = vpop.f32.mrf.mxu1 }
 0x12c   :  { %v1912_v24 = vpop.f32.mrf.mxu3  ;;  %v2028_v13 = vpop.f32.mrf.mxu0  ;;  %v1088_v37 = vmul.f32 %v3781_v53, %v618_v58  ;;  %v632_v58 = vunpack.c.l.bf16 %v237_v10 }
 0x12d   :  { %v1907_v25 = vadd.f32 %v1906_v11, %v1788_v2  ;;  %v619_v11 = vunpack.c.l.bf16 %v4279_v5  ;;  %v646_v5 = vunpack.c.h.bf16 %v4327_v56 }
 0x12e   :  { %1718 = vmatmul.f32.gmra.mxu1 %v1075_v18 }
 0x12f   :  { %v4315_v39 = vadd.f32 %v2025_v16, %v1907_v25  ;;  %1837 = vmatmul.f32.gmra.mxu2 %v1076_v62  ;;  %2075 = vmatmul.f32.gmra.mxu0 %v1078_v23  ;;  %v1672_v16 = vadd.f32 %v1671_v31, %v4111_v34  ;;  %v1089_v2 = vmul.f32 %v3784_v57, %v619_v11  ;;  %v238_v34 = vld [vmem:[%s6021_s2 + $0x558] sm:$0xff]  ;;  %v3197_v31 = vld [vmem:[%s6021_s2 + $0x548] sm:$0xff] }
 0x130   :  { %v1091_v62 = vmul.f32 %v3790_v59, %v621_v52  ;;  %v1116_v36 = vmul.f32 %v3739_v21, %v646_v5  ;;  %v634_v11 = vunpack.c.l.bf16 %v238_v34  ;;  %v1102_v5 = vmul.f32 %v3784_v57, %v632_v58  ;;  %v1285_v58 = vld [vmem:[%s6019_s0 + $0x288] sm:$0xff] }
 0x131   :  { %1962 = vmatmul.f32.gmra.mxu3 %v1103_v54  ;;  %v631_v54 = vunpack.c.h.bf16 %v3197_v31  ;;  %2120 = vmatpush.msra.mxu1 %v1285_v58 }
 0x132   :  { %v1790_v9 = vpop.f32.mrf.mxu2 }
 0x133   :  { %v1791_v1 = vadd.f32 %v1790_v9, %v1672_v16  ;;  %v1674_v18 = vpop.f32.mrf.mxu1  ;;  %v1101_v10 = vmul.f32 %v3781_v53, %v631_v54  ;;  %v1317_v54 = vld [vmem:[%s6019_s0 + $0x388] sm:$0xff] }
 0x134   :  { %v1915_v23 = vpop.f32.mrf.mxu3  ;;  %v2031_v22 = vpop.f32.mrf.mxu0  ;;  %v1675_v12 = vadd.f32 %v1674_v18, %v3910_v48  ;;  %v245_v48 = vld [vmem:[%s6021_s2 + $0x58c] sm:$0xff]  ;;  %2358 = vmatpush.msra.mxu3 %v1317_v54  ;;  %v4401_v54 = vld [vmem:[%s6021_s2 + $0x620] sm:$0xff] }
 0x135   :  { %v1910_v25 = vadd.f32 %v1909_v8, %v1791_v1  ;;  %v1334_v8 = vld [vmem:[%s6019_s0 + $0x410] sm:$0xff]  ;;  %v1104_v1 = vmul.f32 %v3790_v59, %v634_v11  ;;  %v1301_v18 = vld [vmem:[%s6019_s0 + $0x308] sm:$0xff] }
 0x136   :  { %1721 = vmatmul.f32.gmra.mxu1 %v1088_v37  ;;  %2476 = vmatpush.msra.mxu0 %v1334_v8  ;;  %v647_v8 = vunpack.c.l.bf16 %v245_v48  ;;  %v4378_v11 = vld [vmem:[%s6021_s2 + $0x5ec] sm:$0xff] }
 0x137   :  { %v4341_v60 = vadd.f32 %v2028_v13, %v1910_v25  ;;  %1840 = vmatmul.f32.gmra.mxu2 %v1089_v2  ;;  %2078 = vmatmul.f32.gmra.mxu0 %v1091_v62  ;;  %v659_v13 = vunpack.c.h.bf16 %v4349_v33 }
 0x138   :  { %2239 = vmatpush.msra.mxu2 %v1301_v18 }
 0x139   :  { %1965 = vmatmul.f32.gmra.mxu3 %v1116_v36  ;;  %v1129_v25 = vmul.f32 %v3739_v21, %v659_v13  ;;  %v3198_v36 = vld [vmem:[%s6021_s2 + $0x57c] sm:$0xff] }
 0x13a   :  { %v1793_v52 = vpop.f32.mrf.mxu2  ;;  %v644_v34 = vunpack.c.h.bf16 %v3198_v36 }
 0x13b   :  { %v1794_v16 = vadd.f32 %v1793_v52, %v1675_v12  ;;  %v1677_v9 = vpop.f32.mrf.mxu1 }
 0x13c   :  { %v1918_v37 = vpop.f32.mrf.mxu3  ;;  %v2034_v62 = vpop.f32.mrf.mxu0  ;;  %v1114_v52 = vmul.f32 %v3781_v53, %v644_v34  ;;  %v658_v34 = vunpack.c.l.bf16 %v4349_v33  ;;  %v685_v33 = vunpack.c.h.bf16 %v4401_v54 }
 0x13d   :  { %v1913_v2 = vadd.f32 %v1912_v24, %v1794_v16  ;;  %v645_v24 = vunpack.c.l.bf16 %v4327_v56  ;;  %v672_v56 = vunpack.c.h.bf16 %v4378_v11 }
 0x13e   :  { %1724 = vmatmul.f32.gmra.mxu1 %v1101_v10 }
 0x13f   :  { %v4366_v31 = vadd.f32 %v2031_v22, %v1913_v2  ;;  %1843 = vmatmul.f32.gmra.mxu2 %v1102_v5  ;;  %2081 = vmatmul.f32.gmra.mxu0 %v1104_v1  ;;  %v1678_v22 = vadd.f32 %v1677_v9, %v3936_v3  ;;  %v1115_v16 = vmul.f32 %v3784_v57, %v645_v24  ;;  %v252_v3 = vld [vmem:[%s6021_s2 + $0x5c0] sm:$0xff]  ;;  %v3199_v9 = vld [vmem:[%s6021_s2 + $0x5b0] sm:$0xff] }
 0x140   :  { %v1117_v5 = vmul.f32 %v3790_v59, %v647_v8  ;;  %v1142_v18 = vmul.f32 %v3739_v21, %v672_v56  ;;  %v660_v24 = vunpack.c.l.bf16 %v252_v3 }
 0x141   :  { %1968 = vmatmul.f32.gmra.mxu3 %v1129_v25  ;;  %v657_v25 = vunpack.c.h.bf16 %v3199_v9 }
 0x142   :  { %v1796_v12 = vpop.f32.mrf.mxu2 }
 0x143   :  { %v1797_v13 = vadd.f32 %v1796_v12, %v1678_v22  ;;  %v1680_v10 = vpop.f32.mrf.mxu1  ;;  %v1127_v12 = vmul.f32 %v3781_v53, %v657_v25 }
 0x144   :  { %v1921_v1 = vpop.f32.mrf.mxu3  ;;  %v2037_v48 = vpop.f32.mrf.mxu0  ;;  %v1681_v58 = vadd.f32 %v1680_v10, %v3958_v20  ;;  %v1155_v20 = vmul.f32 %v3739_v21, %v685_v33  ;;  %v259_v10 = vld [vmem:[%s6021_s2 + $0x5f4] sm:$0xff] }
 0x145   :  { %v1916_v2 = vadd.f32 %v1915_v23, %v1797_v13  ;;  %v1333_v23 = vld [vmem:[%s6019_s0 + $0x408] sm:$0xff]  ;;  %v1128_v13 = vmul.f32 %v3784_v57, %v658_v34  ;;  %v671_v34 = vunpack.c.l.bf16 %v4378_v11 }
 0x146   :  { %1727 = vmatmul.f32.gmra.mxu1 %v1114_v52  ;;  %2477 = vmatpush.msra.mxu0 %v1333_v23  ;;  %v1316_v23 = vld [vmem:[%s6019_s0 + $0x380] sm:$0xff] }
 0x147   :  { %v4392_v36 = vadd.f32 %v2034_v62, %v1916_v2  ;;  %1846 = vmatmul.f32.gmra.mxu2 %v1115_v16  ;;  %2084 = vmatmul.f32.gmra.mxu0 %v1117_v5  ;;  %v15_v62 = vld [vmem:[%s6020_s1 + $0x8] sm:$0x1f]  ;;  %v1130_v16 = vmul.f32 %v3790_v59, %v660_v24  ;;  %v673_v24 = vunpack.c.l.bf16 %v259_v10 }
 0x148   :  { %v3098_v8 = vmul.f32 -1.442695, %v15_v62  ;;  %v4430_v62 = vld [vmem:[%s6021_s2 + $0x654] sm:$0xff]  ;;  %2359 = vmatpush.msra.mxu3 %v1316_v23  ;;  %v266_v10 = vld [vmem:[%s6021_s2 + $0x628] sm:$0xff]  ;;  %v1332_v23 = vld [vmem:[%s6019_s0 + $0x400] sm:$0xff] }
 0x149   :  { %1971 = vmatmul.f32.gmra.mxu3 %v1142_v18  ;;  %v3200_v18 = vld [vmem:[%s6021_s2 + $0x5e4] sm:$0xff]  ;;  %v698_v11 = vunpack.c.h.bf16 %v4430_v62  ;;  %2478 = vmatpush.msra.mxu0 %v1332_v23  ;;  %v1395_v23 = vld [vmem:[%s6019_s0 + $0x5f8] sm:$0xff] }
 0x14a   :  { %v1799_v22 = vpop.f32.mrf.mxu2  ;;  %3185 = vpow2.f32 %v3098_v8  ;;  %v670_v9 = vunpack.c.h.bf16 %v3200_v18  ;;  %2820 = vmatpush.msrb.mxu3 %v1395_v23 }
 0x14b   :  { %v1800_v56 = vadd.f32 %v1799_v22, %v1681_v58  ;;  %v1683_v52 = vpop.f32.mrf.mxu1 }
 0x14c   :  { %v1924_v5 = vpop.f32.mrf.mxu3  ;;  %v2040_v3 = vpop.f32.mrf.mxu0  ;;  %v1140_v22 = vmul.f32 %v3781_v53, %v670_v9  ;;  %v3201_v9 = vld [vmem:[%s6021_s2 + $0x618] sm:$0xff] }
 0x14d   :  { %v1919_v2 = vadd.f32 %v1918_v37, %v1800_v56  ;;  %v1300_v37 = vld [vmem:[%s6019_s0 + $0x300] sm:$0xff]  ;;  %v1141_v56 = vmul.f32 %v3784_v57, %v671_v34  ;;  %v683_v34 = vunpack.c.h.bf16 %v3201_v9 }
 0x14e   :  { %1730 = vmatmul.f32.gmra.mxu1 %v1127_v12  ;;  %2240 = vmatpush.msra.mxu2 %v1300_v37  ;;  %v1284_v12 = vld [vmem:[%s6019_s0 + $0x280] sm:$0xff] }
 0x14f   :  { %v4418_v25 = vadd.f32 %v2037_v48, %v1919_v2  ;;  %1849 = vmatmul.f32.gmra.mxu2 %v1128_v13  ;;  %2087 = vmatmul.f32.gmra.mxu0 %v1130_v16  ;;  %v1684_v48 = vadd.f32 %v1683_v52, %v3986_v42  ;;  %v1143_v16 = vmul.f32 %v3790_v59, %v673_v24  ;;  %v686_v24 = vunpack.c.l.bf16 %v266_v10  ;;  %v3202_v10 = vld [vmem:[%s6021_s2 + $0x64c] sm:$0xff] }
 0x150   :  { %v3186_v58 = vpop.eup %3185  ;;  %2121 = vmatpush.msra.mxu1 %v1284_v12  ;;  %v696_v9 = vunpack.c.h.bf16 %v3202_v10 }
 0x151   :  { %1974 = vmatmul.f32.gmra.mxu3 %v1155_v20  ;;  %v1168_v20 = vmul.f32 %v3739_v21, %v698_v11  ;;  %v4444_v18 = vadd.f32 1.0, %v3186_v58 }
 0x152   :  { %v1802_v33 = vpop.f32.mrf.mxu2 }
 0x153   :  { %v1803_v8 = vadd.f32 %v1802_v33, %v1684_v48  ;;  %v1686_v13 = vpop.f32.mrf.mxu1  ;;  %v4458_v48 = vld [vmem:[%s6021_s2 + $0x688] sm:$0xff]  ;;  %3187 = vrcp.f32 %v4444_v18  ;;  %v1153_v33 = vmul.f32 %v3781_v53, %v683_v34  ;;  %vm44_vm4 = vweird.f32 %v4444_v18 }
 0x154   :  { %v1927_v2 = vpop.f32.mrf.mxu3  ;;  %v2043_v52 = vpop.f32.mrf.mxu0  ;;  %v1687_v11 = vadd.f32 %v1686_v13, %v4008_v63  ;;  %v273_v13 = vld [vmem:[%s6021_s2 + $0x65c] sm:$0xff] }
 0x155   :  { %v1922_v42 = vadd.f32 %v1921_v1, %v1803_v8  ;;  %v684_v1 = vunpack.c.l.bf16 %v4401_v54 }
 0x156   :  { %1733 = vmatmul.f32.gmra.mxu1 %v1140_v22 }
 0x157   :  { %v4449_v37 = vadd.f32 %v2040_v3, %v1922_v42  ;;  %1852 = vmatmul.f32.gmra.mxu2 %v1141_v56  ;;  %2090 = vmatmul.f32.gmra.mxu0 %v1143_v16  ;;  %v711_v3 = vunpack.c.h.bf16 %v4458_v48  ;;  %v1154_v8 = vmul.f32 %v3784_v57, %v684_v1  ;;  %v1156_v56 = vmul.f32 %v3790_v59, %v686_v24  ;;  %v1379_v1 = vld [vmem:[%s6019_s0 + $0x578] sm:$0xff] }
 0x158   :  { %v699_v24 = vunpack.c.l.bf16 %v273_v13  ;;  %2701 = vmatpush.msrb.mxu2 %v1379_v1 }
 0x159   :  { %1977 = vmatmul.f32.gmra.mxu3 %v1168_v20  ;;  %v1181_v63 = vmul.f32 %v3739_v21, %v711_v3  ;;  %v4470_v20 = vpop.eup %3187 }
 0x15a   :  { %v1805_v54 = vpop.f32.mrf.mxu2  ;;  %vm45_vm5 = vweird.f32 %v4470_v20 }
 0x15b   :  { %v1806_v58 = vadd.f32 %v1805_v54, %v1687_v11  ;;  %v1689_v22 = vpop.f32.mrf.mxu1  ;;  %v4487_v11 = vld [vmem:[%s6021_s2 + $0x6bc] sm:$0xff]  ;;  %v40_v54 = vmul.f32 %v4470_v20, %v4444_v18  ;;  %vm4547_vm6 = vmor %vm44_vm4, %vm45_vm5 }
 0x15c   :  { %v1930_v12 = vpop.f32.mrf.mxu3  ;;  %v2046_v42 = vpop.f32.mrf.mxu0 }
 0x15d   :  { %v1925_v16 = vadd.f32 %v1924_v5, %v1806_v58  ;;  %v697_v5 = vunpack.c.l.bf16 %v4430_v62  ;;  %v724_v62 = vunpack.c.h.bf16 %v4487_v11  ;;  %v41_v1 = vsub.f32 1.0, %v40_v54 }
 0x15e   :  { %1736 = vmatmul.f32.gmra.mxu1 %v1153_v33  ;;  %v1166_v33 = vmul.f32 %v3781_v53, %v696_v9  ;;  %v280_v9 = vld [vmem:[%s6021_s2 + $0x690] sm:$0xff]  ;;  %v4522_v54 = vperm.slane %v3392_v43, 7 }
 0x15f   :  { %v4475_v34 = vadd.f32 %v2043_v52, %v1925_v16  ;;  %1855 = vmatmul.f32.gmra.mxu2 %v1154_v8  ;;  %2093 = vmatmul.f32.gmra.mxu0 %v1156_v56  ;;  %v1690_v52 = vadd.f32 %v1689_v22, %v4036_v28  ;;  %v1167_v8 = vmul.f32 %v3784_v57, %v697_v5  ;;  %v1363_v56 = vld [vmem:[%s6019_s0 + $0x4f8] sm:$0xff]  ;;  %v3203_v5 = vld [vmem:[%s6021_s2 + $0x680] sm:$0xff] }
 0x160   :  { %v1169_v28 = vmul.f32 %v3790_v59, %v699_v24  ;;  %2582 = vmatpush.msrb.mxu1 %v1363_v56  ;;  %v1194_v10 = vmul.f32 %v3739_v21, %v724_v62  ;;  %v709_v23 = vunpack.c.h.bf16 %v3203_v5  ;;  %v710_v24 = vunpack.c.l.bf16 %v4458_v48  ;;  %v1407_v21 = vld [vmem:[%s6019_s0 + $0x658] sm:$0xff] }
 0x161   :  { %1980 = vmatmul.f32.gmra.mxu3 %v1181_v63  ;;  %v4517_v62 = vld [vmem:[%s6021_s2 + $0x18] sm:$0xff]  ;;  %2943 = vmatpush.msrb.mxu0 %v1407_v21  ;;  %v50_v5 = vand.u32 2147483648, %v4444_v18 }
 0x162   :  { %v1808_v3 = vpop.f32.mrf.mxu2  ;;  %v1180_v56 = vmul.f32 %v3784_v57, %v710_v24  ;;  %v48_v24 = vand.u32 2147483647, %v4444_v18  ;;  %v3204_v21 = vld [vmem:[%s6021_s2 + $0x6b4] sm:$0xff] }
 0x163   :  { %v1809_v58 = vadd.f32 %v1808_v3, %v1690_v52  ;;  %v1692_v16 = vpop.f32.mrf.mxu1 }
 0x164   :  { %v4499_v22 = vpop.f32.mrf.mxu3  ;;  %v2049_v13 = vpop.f32.mrf.mxu0  ;;  %v1693_v3 = vadd.f32 %v1692_v16, %v4058_v49  ;;  %vm49_vm7 = vcmp.eq.f32.partialorder %v48_v24, 8.507059e+37 }
 0x165   :  { %v1928_v63 = vadd.f32 %v1927_v2, %v1809_v58  ;;  %v712_v2 = vunpack.c.l.bf16 %v280_v9  ;;  %v42_v58 = vmul.f32 %v4470_v20, %v41_v1 }
 0x166   :  { %1739 = vmatmul.f32.gmra.mxu1 %v1166_v33 }
 0x167   :  { %v4508_v52 = vadd.f32 %v2046_v42, %v1928_v63  ;;  %1858 = vmatmul.f32.gmra.mxu2 %v1167_v8  ;;  %2096 = vmatmul.f32.gmra.mxu0 %v1169_v28  ;;  %v299_v42 = vunpack.c.h.bf16 %v4517_v62  ;;  %v1179_v8 = vmul.f32 %v3781_v53, %v709_v23  ;;  %v1182_v63 = vmul.f32 %v3790_v59, %v712_v2 }
 0x168   :  { %v43_v23 = vadd.f32 %v4470_v20, %v42_v58  ;;  %v722_v2 = vunpack.c.h.bf16 %v3204_v21  ;;  %v1394_v21 = vld [vmem:[%s6019_s0 + $0x5f0] sm:$0xff] }
 0x169   :  { %1983 = vmatmul.f32.gmra.mxu3 %v1194_v10  ;;  %v287_v10 = vld [vmem:[%s6021_s2 + $0x6c4] sm:$0xff]  ;;  %v769_v1 = vmul.f32 %v4522_v54, %v299_v42  ;;  %v4590_v42 = vperm.slane %v3392_v43, 6 }
 0x16a   :  { %v1811_v48 = vpop.f32.mrf.mxu2  ;;  %v725_v58 = vunpack.c.l.bf16 %v287_v10  ;;  %2821 = vmatpush.msrb.mxu3 %v1394_v21 }
 0x16b   :  { %v1812_v33 = vadd.f32 %v1811_v48, %v1693_v3  ;;  %v1695_v28 = vpop.f32.mrf.mxu1  ;;  %v1378_v48 = vld [vmem:[%s6019_s0 + $0x570] sm:$0xff] }
 0x16c   :  { %v4528_v9 = vpop.f32.mrf.mxu3  ;;  %v2052_v16 = vpop.f32.mrf.mxu0  ;;  %2702 = vmatpush.msrb.mxu2 %v1378_v48 }
 0x16d   :  { %v1931_v49 = vadd.f32 %v1930_v12, %v1812_v33  ;;  %v723_v12 = vunpack.c.l.bf16 %v4487_v11  ;;  %v1696_v11 = vadd.f32 %v1695_v28, %v4086_v29  ;;  %v51_v33 = vor.u32 1.1754944e-38, %v50_v5 }
 0x16e   :  { %1742 = vmatmul.f32.gmra.mxu1 %v1179_v8  ;;  %v1195_v28 = vmul.f32 %v3790_v59, %v725_v58  ;;  %v3205_v59 = vld [vmem:[%s6021_s2 + $0x10] sm:$0xff] }
 0x16f   :  { %v4542_v3 = vadd.f32 %v2049_v13, %v1931_v49  ;;  %1861 = vmatmul.f32.gmra.mxu2 %v1180_v56  ;;  %2099 = vmatmul.f32.gmra.mxu0 %v1182_v63  ;;  %v4557_v13 = vld [vmem:[%s6021_s2 + $0x4c] sm:$0xff]  ;;  %v47_v56 = vsel %vm4547_vm6, %v4470_v20, %v43_v23  ;;  %v1192_v49 = vmul.f32 %v3781_v53, %v722_v2  ;;  %v58_v53 = vld [vmem:[%s6021_s2 + $0x20] sm:$0xff]  ;;  %v297_v24 = vunpack.c.h.bf16 %v3205_v59 }
 0x170   :  { %v312_v18 = vunpack.c.h.bf16 %v4557_v13  ;;  %v1193_v10 = vmul.f32 %v3784_v57, %v723_v12  ;;  %v4572_v23 = vsel %vm49_vm7, %v51_v33, %v47_v56  ;;  %v1362_v57 = vld [vmem:[%s6019_s0 + $0x4f0] sm:$0xff]  ;;  %v298_v12 = vunpack.c.l.bf16 %v4517_v62  ;;  %v1377_v59 = vld [vmem:[%s6019_s0 + $0x568] sm:$0xff] }
 0x171   :  { %2360 = vmatmul.f32.vlgmr.msra.gmra.mxu3 %v769_v1  ;;  %2583 = vmatpush.msrb.mxu1 %v1362_v57  ;;  %v300_v58 = vunpack.c.l.bf16 %v58_v53  ;;  %v311_v57 = vunpack.c.l.bf16 %v4557_v13 }
 0x172   :  { %v1814_v8 = vpop.f32.mrf.mxu2  ;;  %v782_v20 = vmul.f32 %v4522_v54, %v312_v18  ;;  %v71_v18 = vld [vmem:[%s6021_s2 + $0x80] sm:$0xff]  ;;  %2703 = vmatpush.msrb.mxu2 %v1377_v59  ;;  %v85_v59 = vld [vmem:[%s6021_s2 + $0xe8] sm:$0xff] }
 0x173   :  { %v1815_v63 = vadd.f32 %v1814_v8, %v1696_v11  ;;  %v1698_v29 = vpop.f32.mrf.mxu1  ;;  %v4593_v11 = vperm.slane %v4572_v23, 0 }
 0x174   :  { %v1939_v1 = vpop.f32.mrf.mxu3  ;;  %v2055_v48 = vpop.f32.mrf.mxu0  ;;  %v1699_v33 = vadd.f32 %v1698_v29, %v4108_v40  ;;  %v65_v40 = vld [vmem:[%s6021_s2 + $0x54] sm:$0xff]  ;;  %v3206_v29 = vld [vmem:[%s6021_s2 + $0x44] sm:$0xff] }
 0x175   :  { %v1934_v5 = vadd.f32 %v4499_v22, %v1815_v63  ;;  %v4584_v22 = vperm.slane %v3392_v43, 5  ;;  %v768_v43 = vmul.f32 %v4590_v42, %v298_v12  ;;  %v78_v12 = vld [vmem:[%s6021_s2 + $0xb4] sm:$0xff] }
 0x176   :  { %1745 = vmatmul.f32.gmra.mxu1 %v1192_v49  ;;  %v770_v49 = vmul.f32 %v4593_v11, %v300_v58  ;;  %v338_v58 = vunpack.c.h.bf16 %v78_v12 }
 0x177   :  { %v4586_v2 = vadd.f32 %v2052_v16, %v1934_v5  ;;  %1864 = vmatmul.f32.gmra.mxu2 %v1193_v10  ;;  %2102 = vmatmul.f32.gmra.mxu0 %v1195_v28  ;;  %v325_v16 = vunpack.c.h.bf16 %v71_v18  ;;  %v767_v56 = vmul.f32 %v4584_v22, %v297_v24  ;;  %v313_v24 = vunpack.c.l.bf16 %v65_v40  ;;  %v1361_v40 = vld [vmem:[%s6019_s0 + $0x4e8] sm:$0xff] }
 0x178   :  { %2584 = vmatpush.msrb.mxu1 %v1361_v40  ;;  %v337_v40 = vunpack.c.l.bf16 %v78_v12  ;;  %v1376_v12 = vld [vmem:[%s6019_s0 + $0x560] sm:$0xff] }
 0x179   :  { %2363 = vmatmul.f32.gmra.mxu3 %v782_v20  ;;  %v795_v5 = vmul.f32 %v4522_v54, %v325_v16  ;;  %v310_v20 = vunpack.c.h.bf16 %v3206_v29  ;;  %v3207_v29 = vld [vmem:[%s6021_s2 + $0x78] sm:$0xff]  ;;  %2704 = vmatpush.msrb.mxu2 %v1376_v12 }
 0x17a   :  { %v1817_v8 = vpop.f32.mrf.mxu2 }
 0x17b   :  { %v1818_v62 = vadd.f32 %v1817_v8, %v1699_v33  ;;  %v1701_v63 = vpop.f32.mrf.mxu1  ;;  %v780_v16 = vmul.f32 %v4584_v22, %v310_v20  ;;  %v781_v8 = vmul.f32 %v4590_v42, %v311_v57  ;;  %v323_v20 = vunpack.c.h.bf16 %v3207_v29 }
 0x17c   :  { %v1942_v10 = vpop.f32.mrf.mxu3  ;;  %v2058_v28 = vpop.f32.mrf.mxu0 }
 0x17d   :  { %v1937_v21 = vadd.f32 %v4528_v9, %v1818_v62  ;;  %v1406_v9 = vld [vmem:[%s6019_s0 + $0x650] sm:$0xff] }
 0x17e   :  { %2122 = vmatmul.f32.vlgmr.msra.gmra.mxu1 %v767_v56  ;;  %2944 = vmatpush.msrb.mxu0 %v1406_v9  ;;  %v1393_v56 = vld [vmem:[%s6019_s0 + $0x5e8] sm:$0xff] }
 0x17f   :  { %v4610_v53 = vadd.f32 %v2055_v48, %v1937_v21  ;;  %2241 = vmatmul.f32.vlgmr.msra.gmra.mxu2 %v768_v43  ;;  %2479 = vmatmul.f32.vlgmr.msra.gmra.mxu0 %v770_v49  ;;  %v1702_v48 = vadd.f32 %v1701_v63, %v3932_v0  ;;  %v783_v43 = vmul.f32 %v4593_v11, %v313_v24 }
 0x180   :  { %2822 = vmatpush.msrb.mxu3 %v1393_v56  ;;  %v808_v63 = vmul.f32 %v4522_v54, %v338_v58 }
 0x181   :  { %2366 = vmatmul.f32.gmra.mxu3 %v795_v5  ;;  %v72_v5 = vld [vmem:[%s6021_s2 + $0x88] sm:$0xff] }
 0x182   :  { %v1820_v13 = vpop.f32.mrf.mxu2  ;;  %v326_v9 = vunpack.c.l.bf16 %v72_v5 }
 0x183   :  { %v1821_v33 = vadd.f32 %v1820_v13, %v1702_v48  ;;  %v1704_v62 = vpop.f32.mrf.mxu1  ;;  %v351_v48 = vunpack.c.h.bf16 %v85_v59 }
 0x184   :  { %v1945_v49 = vpop.f32.mrf.mxu3  ;;  %v2061_v0 = vpop.f32.mrf.mxu0  ;;  %v1705_v24 = vadd.f32 %v1704_v62, %v3954_v17  ;;  %v79_v17 = vld [vmem:[%s6021_s2 + $0xbc] sm:$0xff]  ;;  %v3208_v62 = vld [vmem:[%s6021_s2 + $0xac] sm:$0xff] }
 0x185   :  { %v1940_v21 = vadd.f32 %v1939_v1, %v1821_v33  ;;  %v324_v1 = vunpack.c.l.bf16 %v71_v18  ;;  %v793_v33 = vmul.f32 %v4584_v22, %v323_v20  ;;  %v339_v29 = vunpack.c.l.bf16 %v79_v17 }
 0x186   :  { %2125 = vmatmul.f32.gmra.mxu1 %v780_v16  ;;  %v796_v16 = vmul.f32 %v4593_v11, %v326_v9 }
 0x187   :  { %v4639_v57 = vadd.f32 %v2058_v28, %v1940_v21  ;;  %2244 = vmatmul.f32.gmra.mxu2 %v781_v8  ;;  %2482 = vmatmul.f32.gmra.mxu0 %v783_v43  ;;  %v794_v28 = vmul.f32 %v4590_v42, %v324_v1  ;;  %v821_v21 = vmul.f32 %v4522_v54, %v351_v48 }
 0x189   :  { %2369 = vmatmul.f32.gmra.mxu3 %v808_v63  ;;  %v336_v63 = vunpack.c.h.bf16 %v3208_v62 }
 0x18a   :  { %v1823_v58 = vpop.f32.mrf.mxu2 }
 0x18b   :  { %v1824_v13 = vadd.f32 %v1823_v58, %v1705_v24  ;;  %v1707_v56 = vpop.f32.mrf.mxu1  ;;  %v806_v48 = vmul.f32 %v4584_v22, %v336_v63  ;;  %v1360_v63 = vld [vmem:[%s6019_s0 + $0x4e0] sm:$0xff] }
 0x18c   :  { %v1948_v18 = vpop.f32.mrf.mxu3  ;;  %v2064_v43 = vpop.f32.mrf.mxu0  ;;  %v1708_v20 = vadd.f32 %v1707_v56, %v3982_v50  ;;  %v86_v56 = vld [vmem:[%s6021_s2 + $0xf0] sm:$0xff]  ;;  %2585 = vmatpush.msrb.mxu1 %v1360_v63 }
 0x18d   :  { %v1943_v8 = vadd.f32 %v1942_v10, %v1824_v13  ;;  %v92_v10 = vld [vmem:[%s6021_s2 + $0x11c] sm:$0xff]  ;;  %v809_v13 = vmul.f32 %v4593_v11, %v339_v29  ;;  %v352_v29 = vunpack.c.l.bf16 %v86_v56 }
 0x18e   :  { %2128 = vmatmul.f32.gmra.mxu1 %v793_v33  ;;  %v364_v1 = vunpack.c.h.bf16 %v92_v10 }
 0x18f   :  { %v4655_v5 = vadd.f32 %v2061_v0, %v1943_v8  ;;  %2247 = vmatmul.f32.gmra.mxu2 %v794_v28  ;;  %2485 = vmatmul.f32.gmra.mxu0 %v796_v16  ;;  %v807_v0 = vmul.f32 %v4590_v42, %v337_v40  ;;  %v1392_v8 = vld [vmem:[%s6019_s0 + $0x5e0] sm:$0xff]  ;;  %v1405_v40 = vld [vmem:[%s6019_s0 + $0x648] sm:$0xff]  ;;  %v822_v12 = vmul.f32 %v4593_v11, %v352_v29 }
 0x190   :  { %v834_v50 = vmul.f32 %v4522_v54, %v364_v1  ;;  %2823 = vmatpush.msrb.mxu3 %v1392_v8  ;;  %2945 = vmatpush.msrb.mxu0 %v1405_v40 }
 0x191   :  { %2372 = vmatmul.f32.gmra.mxu3 %v821_v21  ;;  %v3209_v21 = vld [vmem:[%s6021_s2 + $0xe0] sm:$0xff] }
 0x192   :  { %v1826_v9 = vpop.f32.mrf.mxu2  ;;  %v349_v17 = vunpack.c.h.bf16 %v3209_v21 }
 0x193   :  { %v1827_v24 = vadd.f32 %v1826_v9, %v1708_v20  ;;  %v1710_v58 = vpop.f32.mrf.mxu1  ;;  %v99_v20 = vld [vmem:[%s6021_s2 + $0x150] sm:$0xff] }
 0x194   :  { %v1951_v33 = vpop.f32.mrf.mxu3  ;;  %v2067_v16 = vpop.f32.mrf.mxu0  ;;  %v377_v1 = vunpack.c.h.bf16 %v99_v20 }
 0x195   :  { %v1946_v28 = vadd.f32 %v1945_v49, %v1827_v24  ;;  %v350_v49 = vunpack.c.l.bf16 %v85_v59  ;;  %v819_v24 = vmul.f32 %v4584_v22, %v349_v17  ;;  %v363_v17 = vunpack.c.l.bf16 %v92_v10  ;;  %v1375_v10 = vld [vmem:[%s6019_s0 + $0x558] sm:$0xff] }
 0x196   :  { %2131 = vmatmul.f32.gmra.mxu1 %v806_v48  ;;  %v847_v8 = vmul.f32 %v4522_v54, %v377_v1  ;;  %2705 = vmatpush.msrb.mxu2 %v1375_v10 }
 0x197   :  { %v4677_v62 = vadd.f32 %v2064_v43, %v1946_v28  ;;  %2250 = vmatmul.f32.gmra.mxu2 %v807_v0  ;;  %2488 = vmatmul.f32.gmra.mxu0 %v809_v13  ;;  %v1711_v43 = vadd.f32 %v1710_v58, %v4004_v61  ;;  %v820_v48 = vmul.f32 %v4590_v42, %v350_v49  ;;  %v93_v61 = vld [vmem:[%s6021_s2 + $0x124] sm:$0xff]  ;;  %v3210_v58 = vld [vmem:[%s6021_s2 + $0x114] sm:$0xff] }
 0x198   :  { %v365_v49 = vunpack.c.l.bf16 %v93_v61 }
 0x199   :  { %2375 = vmatmul.f32.gmra.mxu3 %v834_v50  ;;  %v362_v50 = vunpack.c.h.bf16 %v3210_v58 }
 0x19a   :  { %v1829_v59 = vpop.f32.mrf.mxu2 }
 0x19b   :  { %v1830_v9 = vadd.f32 %v1829_v59, %v1711_v43  ;;  %v1713_v0 = vpop.f32.mrf.mxu1  ;;  %v832_v1 = vmul.f32 %v4584_v22, %v362_v50  ;;  %v1359_v50 = vld [vmem:[%s6019_s0 + $0x4d8] sm:$0xff] }
 0x19c   :  { %v1954_v13 = vpop.f32.mrf.mxu3  ;;  %v2070_v56 = vpop.f32.mrf.mxu0  ;;  %v1714_v63 = vadd.f32 %v1713_v0, %v4029_v19  ;;  %v100_v0 = vld [vmem:[%s6021_s2 + $0x158] sm:$0xff]  ;;  %2586 = vmatpush.msrb.mxu1 %v1359_v50 }
 0x19d   :  { %v1949_v28 = vadd.f32 %v1948_v18, %v1830_v9  ;;  %v106_v18 = vld [vmem:[%s6021_s2 + $0x184] sm:$0xff]  ;;  %v835_v9 = vmul.f32 %v4593_v11, %v365_v49  ;;  %v4729_v49 = vld [vmem:[%s6021_s2 + $0x1b8] sm:$0xff] }
 0x19e   :  { %2134 = vmatmul.f32.gmra.mxu1 %v819_v24  ;;  %v390_v40 = vunpack.c.h.bf16 %v106_v18 }
 0x19f   :  { %v4699_v21 = vadd.f32 %v2067_v16, %v1949_v28  ;;  %2253 = vmatmul.f32.gmra.mxu2 %v820_v48  ;;  %2491 = vmatmul.f32.gmra.mxu0 %v822_v12  ;;  %v833_v16 = vmul.f32 %v4590_v42, %v363_v17  ;;  %v1391_v28 = vld [vmem:[%s6019_s0 + $0x5d8] sm:$0xff]  ;;  %v378_v17 = vunpack.c.l.bf16 %v100_v0 }
 0x1a0   :  { %v860_v19 = vmul.f32 %v4522_v54, %v390_v40  ;;  %2824 = vmatpush.msrb.mxu3 %v1391_v28 }
 0x1a1   :  { %2378 = vmatmul.f32.gmra.mxu3 %v847_v8  ;;  %v3211_v8 = vld [vmem:[%s6021_s2 + $0x148] sm:$0xff] }
 0x1a2   :  { %v1832_v29 = vpop.f32.mrf.mxu2  ;;  %v375_v61 = vunpack.c.h.bf16 %v3211_v8 }
 0x1a3   :  { %v1833_v43 = vadd.f32 %v1832_v29, %v1714_v63  ;;  %v1716_v59 = vpop.f32.mrf.mxu1 }
 0x1a4   :  { %v1957_v24 = vpop.f32.mrf.mxu3  ;;  %v2073_v12 = vpop.f32.mrf.mxu0  ;;  %v1717_v63 = vadd.f32 %v1716_v59, %v4054_v41  ;;  %v107_v41 = vld [vmem:[%s6021_s2 + $0x18c] sm:$0xff]  ;;  %v1404_v59 = vld [vmem:[%s6019_s0 + $0x640] sm:$0xff] }
 0x1a5   :  { %v1952_v48 = vadd.f32 %v1951_v33, %v1833_v43  ;;  %v376_v33 = vunpack.c.l.bf16 %v99_v20  ;;  %v845_v20 = vmul.f32 %v4584_v22, %v375_v61  ;;  %2946 = vmatpush.msrb.mxu0 %v1404_v59  ;;  %v391_v61 = vunpack.c.l.bf16 %v107_v41 }
 0x1a6   :  { %2137 = vmatmul.f32.gmra.mxu1 %v832_v1 }
 0x1a7   :  { %v4721_v58 = vadd.f32 %v2070_v56, %v1952_v48  ;;  %2256 = vmatmul.f32.gmra.mxu2 %v833_v16  ;;  %2494 = vmatmul.f32.gmra.mxu0 %v835_v9  ;;  %v403_v56 = vunpack.c.h.bf16 %v4729_v49  ;;  %v846_v43 = vmul.f32 %v4590_v42, %v376_v33  ;;  %v848_v16 = vmul.f32 %v4593_v11, %v378_v17  ;;  %v120_v33 = vld [vmem:[%s6021_s2 + $0x1ec] sm:$0xff] }
 0x1a8   :  { %v416_v17 = vunpack.c.h.bf16 %v120_v33 }
 0x1a9   :  { %2381 = vmatmul.f32.gmra.mxu3 %v860_v19  ;;  %v873_v0 = vmul.f32 %v4522_v54, %v403_v56  ;;  %v3212_v19 = vld [vmem:[%s6021_s2 + $0x17c] sm:$0xff] }
 0x1aa   :  { %v1835_v40 = vpop.f32.mrf.mxu2  ;;  %v388_v28 = vunpack.c.h.bf16 %v3212_v19  ;;  %v1390_v19 = vld [vmem:[%s6019_s0 + $0x5d0] sm:$0xff] }
 0x1ab   :  { %v1836_v29 = vadd.f32 %v1835_v40, %v1717_v63  ;;  %v1719_v1 = vpop.f32.mrf.mxu1  ;;  %2825 = vmatpush.msrb.mxu3 %v1390_v19 }
 0x1ac   :  { %v1960_v10 = vpop.f32.mrf.mxu3  ;;  %v2076_v48 = vpop.f32.mrf.mxu0  ;;  %v1720_v50 = vadd.f32 %v1719_v1, %v4079_v55  ;;  %v858_v40 = vmul.f32 %v4584_v22, %v388_v28  ;;  %v114_v55 = vld [vmem:[%s6021_s2 + $0x1c0] sm:$0xff]  ;;  %v1374_v1 = vld [vmem:[%s6019_s0 + $0x550] sm:$0xff] }
 0x1ad   :  { %v1955_v9 = vadd.f32 %v1954_v13, %v1836_v29  ;;  %v389_v13 = vunpack.c.l.bf16 %v106_v18  ;;  %2706 = vmatpush.msrb.mxu2 %v1374_v1  ;;  %v1358_v28 = vld [vmem:[%s6019_s0 + $0x4d0] sm:$0xff] }
 0x1ae   :  { %2140 = vmatmul.f32.gmra.mxu1 %v845_v20  ;;  %v861_v20 = vmul.f32 %v4593_v11, %v391_v61  ;;  %v4777_v61 = vld [vmem:[%s6021_s2 + $0x220] sm:$0xff] }
 0x1af   :  { %v4746_v8 = vadd.f32 %v2073_v12, %v1955_v9  ;;  %2259 = vmatmul.f32.gmra.mxu2 %v846_v43  ;;  %2497 = vmatmul.f32.gmra.mxu0 %v848_v16  ;;  %v859_v12 = vmul.f32 %v4590_v42, %v389_v13  ;;  %v886_v9 = vmul.f32 %v4522_v54, %v416_v17  ;;  %v404_v13 = vunpack.c.l.bf16 %v114_v55 }
 0x1b0   :  { %2587 = vmatpush.msrb.mxu1 %v1358_v28 }
 0x1b1   :  { %2384 = vmatmul.f32.gmra.mxu3 %v873_v0  ;;  %v3213_v0 = vld [vmem:[%s6021_s2 + $0x1b0] sm:$0xff] }
 0x1b2   :  { %v1838_v63 = vpop.f32.mrf.mxu2  ;;  %v401_v41 = vunpack.c.h.bf16 %v3213_v0 }
 0x1b3   :  { %v1839_v56 = vadd.f32 %v1838_v63, %v1720_v50  ;;  %v1722_v29 = vpop.f32.mrf.mxu1 }
 0x1b4   :  { %v1963_v18 = vpop.f32.mrf.mxu3  ;;  %v2079_v16 = vpop.f32.mrf.mxu0  ;;  %v871_v63 = vmul.f32 %v4584_v22, %v401_v41  ;;  %v415_v41 = vunpack.c.l.bf16 %v120_v33 }
 0x1b5   :  { %v1958_v43 = vadd.f32 %v1957_v24, %v1839_v56  ;;  %v402_v24 = vunpack.c.l.bf16 %v4729_v49  ;;  %v429_v49 = vunpack.c.h.bf16 %v4777_v61 }
 0x1b6   :  { %2143 = vmatmul.f32.gmra.mxu1 %v858_v40 }
 0x1b7   :  { %v4765_v59 = vadd.f32 %v2076_v48, %v1958_v43  ;;  %2262 = vmatmul.f32.gmra.mxu2 %v859_v12  ;;  %2500 = vmatmul.f32.gmra.mxu0 %v861_v20  ;;  %v1723_v48 = vadd.f32 %v1722_v29, %v4104_v44  ;;  %v872_v56 = vmul.f32 %v4590_v42, %v402_v24  ;;  %v121_v44 = vld [vmem:[%s6021_s2 + $0x1f4] sm:$0xff]  ;;  %v3214_v29 = vld [vmem:[%s6021_s2 + $0x1e4] sm:$0xff] }
 0x1b8   :  { %v874_v12 = vmul.f32 %v4593_v11, %v404_v13  ;;  %v899_v1 = vmul.f32 %v4522_v54, %v429_v49  ;;  %v417_v24 = vunpack.c.l.bf16 %v121_v44 }
 0x1b9   :  { %2387 = vmatmul.f32.gmra.mxu3 %v886_v9  ;;  %v414_v9 = vunpack.c.h.bf16 %v3214_v29  ;;  %v428_v29 = vunpack.c.l.bf16 %v4777_v61 }
 0x1ba   :  { %v1841_v50 = vpop.f32.mrf.mxu2 }
 0x1bb   :  { %v1842_v17 = vadd.f32 %v1841_v50, %v1723_v48  ;;  %v1725_v40 = vpop.f32.mrf.mxu1  ;;  %v884_v49 = vmul.f32 %v4584_v22, %v414_v9  ;;  %v1389_v9 = vld [vmem:[%s6019_s0 + $0x5c8] sm:$0xff] }
 0x1bc   :  { %v1966_v20 = vpop.f32.mrf.mxu3  ;;  %v2082_v55 = vpop.f32.mrf.mxu0  ;;  %v1726_v19 = vadd.f32 %v1725_v40, %v4124_v14  ;;  %v128_v14 = vld [vmem:[%s6021_s2 + $0x228] sm:$0xff]  ;;  %v1403_v40 = vld [vmem:[%s6019_s0 + $0x638] sm:$0xff]  ;;  %2826 = vmatpush.msrb.mxu3 %v1389_v9 }
 0x1bd   :  { %v1961_v43 = vadd.f32 %v1960_v10, %v1842_v17  ;;  %v134_v10 = vld [vmem:[%s6021_s2 + $0x254] sm:$0xff]  ;;  %v887_v17 = vmul.f32 %v4593_v11, %v417_v24  ;;  %2947 = vmatpush.msrb.mxu0 %v1403_v40  ;;  %v430_v24 = vunpack.c.l.bf16 %v128_v14 }
 0x1be   :  { %2146 = vmatmul.f32.gmra.mxu1 %v871_v63  ;;  %v442_v28 = vunpack.c.h.bf16 %v134_v10 }
 0x1bf   :  { %v4791_v0 = vadd.f32 %v2079_v16, %v1961_v43  ;;  %2265 = vmatmul.f32.gmra.mxu2 %v872_v56  ;;  %2503 = vmatmul.f32.gmra.mxu0 %v874_v12  ;;  %v885_v16 = vmul.f32 %v4590_v42, %v415_v41  ;;  %v1373_v43 = vld [vmem:[%s6019_s0 + $0x548] sm:$0xff] }
 0x1c0   :  { %v912_v12 = vmul.f32 %v4522_v54, %v442_v28  ;;  %2707 = vmatpush.msrb.mxu2 %v1373_v43  ;;  %v1357_v41 = vld [vmem:[%s6019_s0 + $0x4c8] sm:$0xff] }
 0x1c1   :  { %2390 = vmatmul.f32.gmra.mxu3 %v899_v1  ;;  %2588 = vmatpush.msrb.mxu1 %v1357_v41 }
 0x1c2   :  { %v1844_v13 = vpop.f32.mrf.mxu2 }
 0x1c3   :  { %v1845_v48 = vadd.f32 %v1844_v13, %v1726_v19  ;;  %v1728_v50 = vpop.f32.mrf.mxu1  ;;  %v141_v19 = vld [vmem:[%s6021_s2 + $0x288] sm:$0xff] }
 0x1c4   :  { %v1969_v33 = vpop.f32.mrf.mxu3  ;;  %v2085_v56 = vpop.f32.mrf.mxu0  ;;  %v455_v28 = vunpack.c.h.bf16 %v141_v19 }
 0x1c5   :  { %v1964_v63 = vadd.f32 %v1963_v18, %v1845_v48  ;;  %v3215_v18 = vld [vmem:[%s6021_s2 + $0x218] sm:$0xff] }
 0x1c6   :  { %v427_v1 = vunpack.c.h.bf16 %v3215_v18  ;;  %2149 = vmatmul.f32.gmra.mxu1 %v884_v49  ;;  %v898_v49 = vmul.f32 %v4590_v42, %v428_v29  ;;  %v925_v43 = vmul.f32 %v4522_v54, %v455_v28 }
 0x1c7   :  { %v4813_v44 = vadd.f32 %v2082_v55, %v1964_v63  ;;  %2268 = vmatmul.f32.gmra.mxu2 %v885_v16  ;;  %2506 = vmatmul.f32.gmra.mxu0 %v887_v17  ;;  %v1729_v55 = vadd.f32 %v1728_v50, %v3939_v4  ;;  %v900_v17 = vmul.f32 %v4593_v11, %v430_v24  ;;  %v135_v4 = vld [vmem:[%s6021_s2 + $0x25c] sm:$0xff]  ;;  %v3216_v50 = vld [vmem:[%s6021_s2 + $0x24c] sm:$0xff] }
 0x1c8   :  { %v897_v48 = vmul.f32 %v4584_v22, %v427_v1  ;;  %v441_v1 = vunpack.c.l.bf16 %v134_v10  ;;  %v443_v29 = vunpack.c.l.bf16 %v135_v4  ;;  %v454_v4 = vunpack.c.l.bf16 %v141_v19 }
 0x1c9   :  { %2393 = vmatmul.f32.gmra.mxu3 %v912_v12  ;;  %v440_v12 = vunpack.c.h.bf16 %v3216_v50  ;;  %v1388_v50 = vld [vmem:[%s6019_s0 + $0x5c0] sm:$0xff] }
 0x1ca   :  { %v1847_v61 = vpop.f32.mrf.mxu2  ;;  %2827 = vmatpush.msrb.mxu3 %v1388_v50 }
 0x1cb   :  { %v1848_v13 = vadd.f32 %v1847_v61, %v1729_v55  ;;  %v1731_v16 = vpop.f32.mrf.mxu1  ;;  %v910_v28 = vmul.f32 %v4584_v22, %v440_v12 }
 0x1cc   :  { %v1972_v63 = vpop.f32.mrf.mxu3  ;;  %v2088_v40 = vpop.f32.mrf.mxu0  ;;  %v1732_v9 = vadd.f32 %v1731_v16, %v3961_v26  ;;  %v142_v26 = vld [vmem:[%s6021_s2 + $0x290] sm:$0xff]  ;;  %v3217_v16 = vld [vmem:[%s6021_s2 + $0x280] sm:$0xff] }
 0x1cd   :  { %v1967_v14 = vadd.f32 %v1966_v20, %v1848_v13  ;;  %v148_v20 = vld [vmem:[%s6021_s2 + $0x2bc] sm:$0xff]  ;;  %v913_v13 = vmul.f32 %v4593_v11, %v443_v29  ;;  %v456_v12 = vunpack.c.l.bf16 %v142_v26  ;;  %v149_v26 = vld [vmem:[%s6021_s2 + $0x2c4] sm:$0xff] }
 0x1ce   :  { %2152 = vmatmul.f32.gmra.mxu1 %v897_v48  ;;  %v468_v41 = vunpack.c.h.bf16 %v148_v20  ;;  %v469_v50 = vunpack.c.l.bf16 %v149_v26 }
 0x1cf   :  { %v4836_v18 = vadd.f32 %v2085_v56, %v1967_v14  ;;  %2271 = vmatmul.f32.gmra.mxu2 %v898_v49  ;;  %2509 = vmatmul.f32.gmra.mxu0 %v900_v17  ;;  %v911_v56 = vmul.f32 %v4590_v42, %v441_v1  ;;  %v453_v14 = vunpack.c.h.bf16 %v3217_v16  ;;  %v4863_v1 = vld [vmem:[%s6021_s2 + $0x2f0] sm:$0xff] }
 0x1d0   :  { %v938_v17 = vmul.f32 %v4522_v54, %v468_v41  ;;  %v481_v19 = vunpack.c.h.bf16 %v4863_v1  ;;  %v3218_v16 = vld [vmem:[%s6021_s2 + $0x2b4] sm:$0xff]  ;;  %v480_v26 = vunpack.c.l.bf16 %v4863_v1 }
 0x1d1   :  { %2396 = vmatmul.f32.gmra.mxu3 %v925_v43  ;;  %v923_v41 = vmul.f32 %v4584_v22, %v453_v14  ;;  %v466_v14 = vunpack.c.h.bf16 %v3218_v16  ;;  %v1387_v16 = vld [vmem:[%s6019_s0 + $0x5b8] sm:$0xff] }
 0x1d2   :  { %v1850_v24 = vpop.f32.mrf.mxu2  ;;  %2828 = vmatpush.msrb.mxu3 %v1387_v16  ;;  %v176_v16 = vld [vmem:[%s6021_s2 + $0x38c] sm:$0xff] }
 0x1d3   :  { %v1851_v55 = vadd.f32 %v1850_v24, %v1732_v9  ;;  %v1734_v61 = vpop.f32.mrf.mxu1  ;;  %v924_v24 = vmul.f32 %v4590_v42, %v454_v4 }
 0x1d4   :  { %v1975_v10 = vpop.f32.mrf.mxu3  ;;  %v2091_v49 = vpop.f32.mrf.mxu0 }
 0x1d5   :  { %v1970_v48 = vadd.f32 %v1969_v33, %v1851_v55  ;;  %v1372_v33 = vld [vmem:[%s6019_s0 + $0x540] sm:$0xff] }
 0x1d6   :  { %2155 = vmatmul.f32.gmra.mxu1 %v910_v28  ;;  %2708 = vmatpush.msrb.mxu2 %v1372_v33  ;;  %v1356_v55 = vld [vmem:[%s6019_s0 + $0x4c0] sm:$0xff]  ;;  %v1402_v28 = vld [vmem:[%s6019_s0 + $0x630] sm:$0xff]  ;;  %v467_v33 = vunpack.c.l.bf16 %v148_v20 }
 0x1d7   :  { %v4852_v43 = vadd.f32 %v2088_v40, %v1970_v48  ;;  %2274 = vmatmul.f32.gmra.mxu2 %v911_v56  ;;  %2512 = vmatmul.f32.gmra.mxu0 %v913_v13  ;;  %v1735_v40 = vadd.f32 %v1734_v61, %v3989_v45  ;;  %v926_v45 = vmul.f32 %v4593_v11, %v456_v12 }
 0x1d8   :  { %2589 = vmatpush.msrb.mxu1 %v1356_v55  ;;  %2948 = vmatpush.msrb.mxu0 %v1402_v28 }
 0x1d9   :  { %2399 = vmatmul.f32.gmra.mxu3 %v938_v17  ;;  %v951_v17 = vmul.f32 %v4522_v54, %v481_v19 }
 0x1da   :  { %v1853_v29 = vpop.f32.mrf.mxu2 }
 0x1db   :  { %v1854_v9 = vadd.f32 %v1853_v29, %v1735_v40  ;;  %v1737_v56 = vpop.f32.mrf.mxu1 }
 0x1dc   :  { %v1978_v61 = vpop.f32.mrf.mxu3  ;;  %v2094_v48 = vpop.f32.mrf.mxu0  ;;  %v1738_v12 = vadd.f32 %v1737_v56, %v4011_v30  ;;  %v156_v30 = vld [vmem:[%s6021_s2 + $0x2f8] sm:$0xff]  ;;  %v3219_v56 = vld [vmem:[%s6021_s2 + $0x2e8] sm:$0xff] }
 0x1dd   :  { %v1973_v13 = vadd.f32 %v1972_v63, %v1854_v9  ;;  %v162_v63 = vld [vmem:[%s6021_s2 + $0x324] sm:$0xff]  ;;  %v936_v9 = vmul.f32 %v4584_v22, %v466_v14  ;;  %v482_v14 = vunpack.c.l.bf16 %v156_v30 }
 0x1de   :  { %2158 = vmatmul.f32.gmra.mxu1 %v923_v41  ;;  %v494_v40 = vunpack.c.h.bf16 %v162_v63  ;;  %v939_v41 = vmul.f32 %v4593_v11, %v469_v50 }
 0x1df   :  { %v4883_v4 = vadd.f32 %v2091_v49, %v1973_v13  ;;  %2277 = vmatmul.f32.gmra.mxu2 %v924_v24  ;;  %2515 = vmatmul.f32.gmra.mxu0 %v926_v45  ;;  %v937_v49 = vmul.f32 %v4590_v42, %v467_v33  ;;  %v479_v13 = vunpack.c.h.bf16 %v3219_v56  ;;  %v169_v33 = vld [vmem:[%s6021_s2 + $0x358] sm:$0xff] }
 0x1e0   :  { %v964_v45 = vmul.f32 %v4522_v54, %v494_v40  ;;  %v507_v50 = vunpack.c.h.bf16 %v169_v33  ;;  %v3220_v56 = vld [vmem:[%s6021_s2 + $0x31c] sm:$0xff] }
 0x1e1   :  { %2402 = vmatmul.f32.gmra.mxu3 %v951_v17  ;;  %v949_v40 = vmul.f32 %v4584_v22, %v479_v13  ;;  %v492_v13 = vunpack.c.h.bf16 %v3220_v56  ;;  %v506_v56 = vunpack.c.l.bf16 %v169_v33 }
 0x1e2   :  { %v1856_v19 = vpop.f32.mrf.mxu2 }
 0x1e3   :  { %v1857_v29 = vadd.f32 %v1856_v19, %v1738_v12  ;;  %v1740_v55 = vpop.f32.mrf.mxu1  ;;  %v950_v19 = vmul.f32 %v4590_v42, %v480_v26  ;;  %v493_v26 = vunpack.c.l.bf16 %v162_v63 }
 0x1e4   :  { %v1981_v20 = vpop.f32.mrf.mxu3  ;;  %v2097_v28 = vpop.f32.mrf.mxu0 }
 0x1e5   :  { %v1976_v24 = vadd.f32 %v1975_v10, %v1857_v29  ;;  %v1371_v10 = vld [vmem:[%s6019_s0 + $0x538] sm:$0xff]  ;;  %v963_v63 = vmul.f32 %v4590_v42, %v493_v26  ;;  %v4952_v26 = vld [vmem:[%s6021_s2 + $0x3c0] sm:$0xff] }
 0x1e6   :  { %2161 = vmatmul.f32.gmra.mxu1 %v936_v9  ;;  %2709 = vmatpush.msrb.mxu2 %v1371_v10  ;;  %v1355_v29 = vld [vmem:[%s6019_s0 + $0x4b8] sm:$0xff] }
 0x1e7   :  { %v4899_v17 = vadd.f32 %v2094_v48, %v1976_v24  ;;  %2280 = vmatmul.f32.gmra.mxu2 %v937_v49  ;;  %2518 = vmatmul.f32.gmra.mxu0 %v939_v41  ;;  %v1741_v48 = vadd.f32 %v1740_v55, %v4039_v32  ;;  %v952_v49 = vmul.f32 %v4593_v11, %v482_v14  ;;  %v520_v14 = vunpack.c.h.bf16 %v176_v16 }
 0x1e8   :  { %2590 = vmatpush.msrb.mxu1 %v1355_v29  ;;  %v977_v55 = vmul.f32 %v4522_v54, %v507_v50 }
 0x1e9   :  { %2405 = vmatmul.f32.gmra.mxu3 %v964_v45  ;;  %v163_v45 = vld [vmem:[%s6021_s2 + $0x32c] sm:$0xff] }
 0x1ea   :  { %v1859_v1 = vpop.f32.mrf.mxu2  ;;  %v495_v10 = vunpack.c.l.bf16 %v163_v45 }
 0x1eb   :  { %v1860_v12 = vadd.f32 %v1859_v1, %v1741_v48  ;;  %v1743_v9 = vpop.f32.mrf.mxu1  ;;  %v962_v1 = vmul.f32 %v4584_v22, %v492_v13 }
 0x1ec   :  { %v1984_v41 = vpop.f32.mrf.mxu3  ;;  %v2100_v32 = vpop.f32.mrf.mxu0 }
 0x1ed   :  { %v1979_v24 = vadd.f32 %v1978_v61, %v1860_v12  ;;  %v1401_v61 = vld [vmem:[%s6019_s0 + $0x628] sm:$0xff] }
 0x1ee   :  { %2164 = vmatmul.f32.gmra.mxu1 %v949_v40  ;;  %2949 = vmatpush.msrb.mxu0 %v1401_v61  ;;  %v965_v40 = vmul.f32 %v4593_v11, %v495_v10  ;;  %v533_v61 = vunpack.c.h.bf16 %v4952_v26 }
 0x1ef   :  { %v4922_v30 = vadd.f32 %v2097_v28, %v1979_v24  ;;  %2283 = vmatmul.f32.gmra.mxu2 %v950_v19  ;;  %2521 = vmatmul.f32.gmra.mxu0 %v952_v49  ;;  %v1744_v28 = vadd.f32 %v1743_v9, %v4061_v46  ;;  %v990_v24 = vmul.f32 %v4522_v54, %v520_v14  ;;  %v170_v46 = vld [vmem:[%s6021_s2 + $0x360] sm:$0xff] }
 0x1f0   :  { %v508_v13 = vunpack.c.l.bf16 %v170_v46  ;;  %v976_v14 = vmul.f32 %v4590_v42, %v506_v56 }
 0x1f1   :  { %2408 = vmatmul.f32.gmra.mxu3 %v977_v55  ;;  %v3221_v55 = vld [vmem:[%s6021_s2 + $0x350] sm:$0xff] }
 0x1f2   :  { %v1862_v48 = vpop.f32.mrf.mxu2  ;;  %v505_v45 = vunpack.c.h.bf16 %v3221_v55 }
 0x1f3   :  { %v1863_v50 = vadd.f32 %v1862_v48, %v1744_v28  ;;  %v1746_v12 = vpop.f32.mrf.mxu1  ;;  %v1386_v48 = vld [vmem:[%s6019_s0 + $0x5b0] sm:$0xff] }
 0x1f4   :  { %v2361_v19 = vpop.f32.mrf.mxu3  ;;  %v2103_v49 = vpop.f32.mrf.mxu0  ;;  %v975_v33 = vmul.f32 %v4584_v22, %v505_v45  ;;  %2829 = vmatpush.msrb.mxu3 %v1386_v48  ;;  %v519_v45 = vunpack.c.l.bf16 %v176_v16 }
 0x1f5   :  { %v1982_v29 = vadd.f32 %v1981_v20, %v1863_v50  ;;  %v1370_v20 = vld [vmem:[%s6019_s0 + $0x530] sm:$0xff] }
 0x1f6   :  { %2167 = vmatmul.f32.gmra.mxu1 %v962_v1  ;;  %2710 = vmatpush.msrb.mxu2 %v1370_v20  ;;  %v978_v1 = vmul.f32 %v4593_v11, %v508_v13  ;;  %v190_v20 = vld [vmem:[%s6021_s2 + $0x3f4] sm:$0xff] }
 0x1f7   :  { %v4941_v9 = vadd.f32 %v2100_v32, %v1982_v29  ;;  %2286 = vmatmul.f32.gmra.mxu2 %v963_v63  ;;  %2524 = vmatmul.f32.gmra.mxu0 %v965_v40  ;;  %v1747_v32 = vadd.f32 %v1746_v12, %v4089_v38  ;;  %v1003_v12 = vmul.f32 %v4522_v54, %v533_v61  ;;  %v177_v29 = vld [vmem:[%s6021_s2 + $0x394] sm:$0xff] }
 0x1f8   :  { %v521_v56 = vunpack.c.l.bf16 %v177_v29 }
 0x1f9   :  { %2411 = vmatmul.f32.gmra.mxu3 %v990_v24  ;;  %v1354_v24 = vld [vmem:[%s6019_s0 + $0x4b0] sm:$0xff] }
 0x1fa   :  { %v1865_v10 = vpop.f32.mrf.mxu2  ;;  %2591 = vmatpush.msrb.mxu1 %v1354_v24  ;;  %v532_v24 = vunpack.c.l.bf16 %v4952_v26 }
 0x1fb   :  { %v1866_v28 = vadd.f32 %v1865_v10, %v1747_v32  ;;  %v2123_v50 = vpop.f32.mrf.mxu1  ;;  %v546_v32 = vunpack.c.h.bf16 %v190_v20 }
 0x1fc   :  { %v2364_v63 = vpop.f32.mrf.mxu3  ;;  %v2480_v38 = vpop.f32.mrf.mxu0  ;;  %v2124_v13 = vadd.f32 %v2123_v50, %v4157_v35  ;;  %v184_v35 = vld [vmem:[%s6021_s2 + $0x3c8] sm:$0xff] }
 0x1fd   :  { %v1985_v40 = vadd.f32 %v1984_v41, %v1866_v28  ;;  %v3222_v41 = vld [vmem:[%s6021_s2 + $0x384] sm:$0xff]  ;;  %v989_v28 = vmul.f32 %v4590_v42, %v519_v45 }
 0x1fe   :  { %2170 = vmatmul.f32.gmra.mxu1 %v975_v33  ;;  %v518_v55 = vunpack.c.h.bf16 %v3222_v41  ;;  %v1369_v41 = vld [vmem:[%s6019_s0 + $0x528] sm:$0xff] }
 0x1ff   :  { %v4969_v46 = vadd.f32 %v2103_v49, %v1985_v40  ;;  %2289 = vmatmul.f32.gmra.mxu2 %v976_v14  ;;  %2527 = vmatmul.f32.gmra.mxu0 %v978_v1  ;;  %v991_v14 = vmul.f32 %v4593_v11, %v521_v56  ;;  %v1016_v40 = vmul.f32 %v4522_v54, %v546_v32 }
 0x200   :  { %v988_v10 = vmul.f32 %v4584_v22, %v518_v55  ;;  %v197_v55 = vld [vmem:[%s6021_s2 + $0x428] sm:$0xff]  ;;  %2711 = vmatpush.msrb.mxu2 %v1369_v41  ;;  %v204_v41 = vld [vmem:[%s6021_s2 + $0x45c] sm:$0xff] }
 0x201   :  { %2414 = vmatmul.f32.gmra.mxu3 %v1003_v12  ;;  %v3223_v12 = vld [vmem:[%s6021_s2 + $0x3b8] sm:$0xff]  ;;  %v559_v56 = vunpack.c.h.bf16 %v197_v55 }
 0x202   :  { %v2242_v49 = vpop.f32.mrf.mxu2  ;;  %v531_v29 = vunpack.c.h.bf16 %v3223_v12 }
 0x203   :  { %v2243_v61 = vadd.f32 %v2242_v49, %v2124_v13  ;;  %v2126_v33 = vpop.f32.mrf.mxu1  ;;  %v1002_v49 = vmul.f32 %v4590_v42, %v532_v24  ;;  %v545_v24 = vunpack.c.l.bf16 %v190_v20 }
 0x204   :  { %v2367_v16 = vpop.f32.mrf.mxu3  ;;  %v2483_v1 = vpop.f32.mrf.mxu0  ;;  %v2127_v45 = vadd.f32 %v2126_v33, %v4182_v15  ;;  %v1001_v32 = vmul.f32 %v4584_v22, %v531_v29  ;;  %v1029_v33 = vmul.f32 %v4522_v54, %v559_v56 }
 0x205   :  { %v2362_v48 = vadd.f32 %v2361_v19, %v2243_v61  ;;  %v1400_v19 = vld [vmem:[%s6019_s0 + $0x620] sm:$0xff]  ;;  %v1385_v61 = vld [vmem:[%s6019_s0 + $0x5a8] sm:$0xff] }
 0x206   :  { %2173 = vmatmul.f32.gmra.mxu1 %v988_v10  ;;  %2950 = vmatpush.msrb.mxu0 %v1400_v19 }
 0x207   :  { %v4985_v50 = vadd.f32 %v2480_v38, %v2362_v48  ;;  %2292 = vmatmul.f32.gmra.mxu2 %v989_v28  ;;  %2530 = vmatmul.f32.gmra.mxu0 %v991_v14  ;;  %v534_v38 = vunpack.c.l.bf16 %v184_v35  ;;  %v1353_v35 = vld [vmem:[%s6019_s0 + $0x4a8] sm:$0xff] }
 0x208   :  { %2830 = vmatpush.msrb.mxu3 %v1385_v61  ;;  %2592 = vmatpush.msrb.mxu1 %v1353_v35  ;;  %v558_v35 = vunpack.c.l.bf16 %v197_v55  ;;  %v1368_v55 = vld [vmem:[%s6019_s0 + $0x520] sm:$0xff] }
 0x209   :  { %2417 = vmatmul.f32.gmra.mxu3 %v1016_v40  ;;  %v1004_v28 = vmul.f32 %v4593_v11, %v534_v38  ;;  %v191_v40 = vld [vmem:[%s6021_s2 + $0x3fc] sm:$0xff]  ;;  %2712 = vmatpush.msrb.mxu2 %v1368_v55 }
 0x20a   :  { %v2245_v26 = vpop.f32.mrf.mxu2  ;;  %v547_v19 = vunpack.c.l.bf16 %v191_v40 }
 0x20b   :  { %v2246_v13 = vadd.f32 %v2245_v26, %v2127_v45  ;;  %v2129_v10 = vpop.f32.mrf.mxu1  ;;  %v572_v45 = vunpack.c.h.bf16 %v204_v41 }
 0x20c   :  { %v2370_v14 = vpop.f32.mrf.mxu3  ;;  %v2486_v15 = vpop.f32.mrf.mxu0  ;;  %v2130_v38 = vadd.f32 %v2129_v10, %v4201_v51  ;;  %v198_v51 = vld [vmem:[%s6021_s2 + $0x430] sm:$0xff] }
 0x20d   :  { %v2365_v48 = vadd.f32 %v2364_v63, %v2246_v13  ;;  %v3224_v63 = vld [vmem:[%s6021_s2 + $0x3ec] sm:$0xff]  ;;  %v1015_v13 = vmul.f32 %v4590_v42, %v545_v24 }
 0x20e   :  { %2176 = vmatmul.f32.gmra.mxu1 %v1001_v32  ;;  %v544_v29 = vunpack.c.h.bf16 %v3224_v63  ;;  %v560_v63 = vunpack.c.l.bf16 %v198_v51 }
 0x20f   :  { %v5014_v12 = vadd.f32 %v2483_v1, %v2365_v48  ;;  %2295 = vmatmul.f32.gmra.mxu2 %v1002_v49  ;;  %2533 = vmatmul.f32.gmra.mxu0 %v1004_v28  ;;  %v1017_v49 = vmul.f32 %v4593_v11, %v547_v19  ;;  %v1042_v48 = vmul.f32 %v4522_v54, %v572_v45 }
 0x210   :  { %v1014_v26 = vmul.f32 %v4584_v22, %v544_v29  ;;  %v1028_v45 = vmul.f32 %v4590_v42, %v558_v35  ;;  %v1399_v35 = vld [vmem:[%s6019_s0 + $0x618] sm:$0xff] }
 0x211   :  { %2420 = vmatmul.f32.gmra.mxu3 %v1029_v33  ;;  %v3225_v33 = vld [vmem:[%s6021_s2 + $0x420] sm:$0xff]  ;;  %2951 = vmatpush.msrb.mxu0 %v1399_v35 }
 0x212   :  { %v2248_v1 = vpop.f32.mrf.mxu2  ;;  %v557_v40 = vunpack.c.h.bf16 %v3225_v33  ;;  %v571_v33 = vunpack.c.l.bf16 %v204_v41 }
 0x213   :  { %v2249_v56 = vadd.f32 %v2248_v1, %v2130_v38  ;;  %v2132_v32 = vpop.f32.mrf.mxu1 }
 0x214   :  { %v2373_v20 = vpop.f32.mrf.mxu3  ;;  %v2489_v28 = vpop.f32.mrf.mxu0  ;;  %v2133_v29 = vadd.f32 %v2132_v32, %v4223_v7  ;;  %v1027_v38 = vmul.f32 %v4584_v22, %v557_v40  ;;  %v205_v32 = vld [vmem:[%s6021_s2 + $0x464] sm:$0xff] }
 0x215   :  { %v2368_v61 = vadd.f32 %v2367_v16, %v2249_v56  ;;  %v211_v16 = vld [vmem:[%s6021_s2 + $0x490] sm:$0xff]  ;;  %v1030_v56 = vmul.f32 %v4593_v11, %v560_v63  ;;  %v1352_v40 = vld [vmem:[%s6019_s0 + $0x4a0] sm:$0xff]  ;;  %v573_v63 = vunpack.c.l.bf16 %v205_v32 }
 0x216   :  { %2179 = vmatmul.f32.gmra.mxu1 %v1014_v26  ;;  %v585_v24 = vunpack.c.h.bf16 %v211_v16 }
 0x217   :  { %v5030_v10 = vadd.f32 %v2486_v15, %v2368_v61  ;;  %2298 = vmatmul.f32.gmra.mxu2 %v1015_v13  ;;  %2536 = vmatmul.f32.gmra.mxu0 %v1017_v49  ;;  %v1384_v61 = vld [vmem:[%s6019_s0 + $0x5a0] sm:$0xff]  ;;  %v1043_v55 = vmul.f32 %v4593_v11, %v573_v63 }
 0x218   :  { %v1055_v7 = vmul.f32 %v4522_v54, %v585_v24  ;;  %2831 = vmatpush.msrb.mxu3 %v1384_v61  ;;  %2593 = vmatpush.msrb.mxu1 %v1352_v40 }
 0x219   :  { %2423 = vmatmul.f32.gmra.mxu3 %v1042_v48 }
 0x21a   :  { %v2251_v15 = vpop.f32.mrf.mxu2 }
 0x21b   :  { %v2252_v19 = vadd.f32 %v2251_v15, %v2133_v29  ;;  %v2135_v1 = vpop.f32.mrf.mxu1 }
 0x21c   :  { %v2376_v26 = vpop.f32.mrf.mxu3  ;;  %v2492_v49 = vpop.f32.mrf.mxu0  ;;  %v2136_v29 = vadd.f32 %v2135_v1, %v4248_v27  ;;  %v212_v27 = vld [vmem:[%s6021_s2 + $0x498] sm:$0xff] }
 0x21d   :  { %v2371_v13 = vadd.f32 %v2370_v14, %v2252_v19  ;;  %v3226_v14 = vld [vmem:[%s6021_s2 + $0x454] sm:$0xff] }
 0x21e   :  { %2182 = vmatmul.f32.gmra.mxu1 %v1027_v38  ;;  %v570_v51 = vunpack.c.h.bf16 %v3226_v14  ;;  %v1041_v38 = vmul.f32 %v4590_v42, %v571_v33  ;;  %v586_v33 = vunpack.c.l.bf16 %v212_v27 }
 0x21f   :  { %v5052_v48 = vadd.f32 %v2489_v28, %v2371_v13  ;;  %2301 = vmatmul.f32.gmra.mxu2 %v1028_v45  ;;  %2539 = vmatmul.f32.gmra.mxu0 %v1030_v56  ;;  %v218_v28 = vld [vmem:[%s6021_s2 + $0x4c4] sm:$0xff] }
 0x220   :  { %v598_v24 = vunpack.c.h.bf16 %v218_v28  ;;  %v1040_v19 = vmul.f32 %v4584_v22, %v570_v51  ;;  %v584_v51 = vunpack.c.l.bf16 %v211_v16  ;;  %v1367_v16 = vld [vmem:[%s6019_s0 + $0x518] sm:$0xff] }
 0x221   :  { %2426 = vmatmul.f32.gmra.mxu3 %v1055_v7  ;;  %v3227_v7 = vld [vmem:[%s6021_s2 + $0x488] sm:$0xff]  ;;  %2713 = vmatpush.msrb.mxu2 %v1367_v16 }
 0x222   :  { %v2254_v41 = vpop.f32.mrf.mxu2  ;;  %v1068_v61 = vmul.f32 %v4522_v54, %v598_v24  ;;  %v583_v14 = vunpack.c.h.bf16 %v3227_v7  ;;  %v1054_v24 = vmul.f32 %v4590_v42, %v584_v51  ;;  %v597_v7 = vunpack.c.l.bf16 %v218_v28 }
 0x223   :  { %v2255_v15 = vadd.f32 %v2254_v41, %v2136_v29  ;;  %v2138_v45 = vpop.f32.mrf.mxu1 }
 0x224   :  { %v2379_v56 = vpop.f32.mrf.mxu3  ;;  %v2495_v32 = vpop.f32.mrf.mxu0  ;;  %v2139_v40 = vadd.f32 %v2138_v45, %v4270_v47  ;;  %v1053_v29 = vmul.f32 %v4584_v22, %v583_v14  ;;  %v219_v45 = vld [vmem:[%s6021_s2 + $0x4cc] sm:$0xff]  ;;  %v1351_v14 = vld [vmem:[%s6019_s0 + $0x498] sm:$0xff] }
 0x225   :  { %v2374_v13 = vadd.f32 %v2373_v20, %v2255_v15  ;;  %v225_v20 = vld [vmem:[%s6021_s2 + $0x4f8] sm:$0xff]  ;;  %v1056_v15 = vmul.f32 %v4593_v11, %v586_v33  ;;  %v599_v51 = vunpack.c.l.bf16 %v219_v45  ;;  %v5107_v33 = vld [vmem:[%s6021_s2 + $0x52c] sm:$0xff]  ;;  %2594 = vmatpush.msrb.mxu1 %v1351_v14 }
 0x226   :  { %2185 = vmatmul.f32.gmra.mxu1 %v1040_v19  ;;  %v611_v35 = vunpack.c.h.bf16 %v225_v20 }
 0x227   :  { %v5074_v1 = vadd.f32 %v2492_v49, %v2374_v13  ;;  %2304 = vmatmul.f32.gmra.mxu2 %v1041_v38  ;;  %2542 = vmatmul.f32.gmra.mxu0 %v1043_v55  ;;  %v1383_v13 = vld [vmem:[%s6019_s0 + $0x598] sm:$0xff] }
 0x228   :  { %v1081_v47 = vmul.f32 %v4522_v54, %v611_v35  ;;  %2832 = vmatpush.msrb.mxu3 %v1383_v13 }
 0x229   :  { %2429 = vmatmul.f32.gmra.mxu3 %v1068_v61 }
 0x22a   :  { %v2257_v49 = vpop.f32.mrf.mxu2 }
 0x22b   :  { %v2258_v63 = vadd.f32 %v2257_v49, %v2139_v40  ;;  %v2141_v41 = vpop.f32.mrf.mxu1  ;;  %v624_v40 = vunpack.c.h.bf16 %v5107_v33 }
 0x22c   :  { %v2382_v19 = vpop.f32.mrf.mxu3  ;;  %v2498_v55 = vpop.f32.mrf.mxu0 }
 0x22d   :  { %v2377_v38 = vadd.f32 %v2376_v26, %v2258_v63  ;;  %v3228_v26 = vld [vmem:[%s6021_s2 + $0x4bc] sm:$0xff]  ;;  %v1067_v63 = vmul.f32 %v4590_v42, %v597_v7  ;;  %v1094_v45 = vmul.f32 %v4522_v54, %v624_v40 }
 0x22e   :  { %2188 = vmatmul.f32.gmra.mxu1 %v1053_v29  ;;  %v596_v27 = vunpack.c.h.bf16 %v3228_v26  ;;  %v610_v26 = vunpack.c.l.bf16 %v225_v20  ;;  %v239_v7 = vld [vmem:[%s6021_s2 + $0x560] sm:$0xff] }
 0x22f   :  { %v5096_v61 = vadd.f32 %v2495_v32, %v2377_v38  ;;  %2307 = vmatmul.f32.gmra.mxu2 %v1054_v24  ;;  %2545 = vmatmul.f32.gmra.mxu0 %v1056_v15  ;;  %v2142_v32 = vadd.f32 %v2141_v41, %v4296_v6  ;;  %v1069_v24 = vmul.f32 %v4593_v11, %v599_v51  ;;  %v226_v6 = vld [vmem:[%s6021_s2 + $0x500] sm:$0xff]  ;;  %v1398_v41 = vld [vmem:[%s6019_s0 + $0x610] sm:$0xff]  ;;  %v637_v51 = vunpack.c.h.bf16 %v239_v7 }
 0x230   :  { %v1066_v28 = vmul.f32 %v4584_v22, %v596_v27  ;;  %2952 = vmatpush.msrb.mxu0 %v1398_v41  ;;  %v612_v27 = vunpack.c.l.bf16 %v226_v6  ;;  %v623_v41 = vunpack.c.l.bf16 %v5107_v33 }
 0x231   :  { %2432 = vmatmul.f32.gmra.mxu3 %v1081_v47 }
 0x232   :  { %v2260_v35 = vpop.f32.mrf.mxu2 }
 0x233   :  { %v2261_v49 = vadd.f32 %v2260_v35, %v2142_v32  ;;  %v2144_v29 = vpop.f32.mrf.mxu1  ;;  %v1080_v35 = vmul.f32 %v4590_v42, %v610_v26  ;;  %v5155_v26 = vld [vmem:[%s6021_s2 + $0x594] sm:$0xff] }
 0x234   :  { %v2385_v16 = vpop.f32.mrf.mxu3  ;;  %v2501_v38 = vpop.f32.mrf.mxu0  ;;  %v2145_v14 = vadd.f32 %v2144_v29, %v4315_v39  ;;  %v233_v39 = vld [vmem:[%s6021_s2 + $0x534] sm:$0xff]  ;;  %v650_v33 = vunpack.c.h.bf16 %v5155_v26 }
 0x235   :  { %v2380_v15 = vadd.f32 %v2379_v56, %v2261_v49  ;;  %v3229_v56 = vld [vmem:[%s6021_s2 + $0x4f0] sm:$0xff] }
 0x236   :  { %2191 = vmatmul.f32.gmra.mxu1 %v1066_v28  ;;  %v609_v13 = vunpack.c.h.bf16 %v3229_v56  ;;  %v1082_v28 = vmul.f32 %v4593_v11, %v612_v27  ;;  %v1366_v29 = vld [vmem:[%s6019_s0 + $0x510] sm:$0xff] }
 0x237   :  { %v5121_v47 = vadd.f32 %v2498_v55, %v2380_v15  ;;  %2310 = vmatmul.f32.gmra.mxu2 %v1067_v63  ;;  %2548 = vmatmul.f32.gmra.mxu0 %v1069_v24  ;;  %v1107_v15 = vmul.f32 %v4522_v54, %v637_v51  ;;  %v1382_v56 = vld [vmem:[%s6019_s0 + $0x590] sm:$0xff] }
 0x238   :  { %v1079_v40 = vmul.f32 %v4584_v22, %v609_v13  ;;  %2714 = vmatpush.msrb.mxu2 %v1366_v29  ;;  %v1350_v13 = vld [vmem:[%s6019_s0 + $0x490] sm:$0xff]  ;;  %2833 = vmatpush.msrb.mxu3 %v1382_v56  ;;  %v1120_v29 = vmul.f32 %v4522_v54, %v650_v33 }
 0x239   :  { %2435 = vmatmul.f32.gmra.mxu3 %v1094_v45  ;;  %2595 = vmatpush.msrb.mxu1 %v1350_v13 }
 0x23a   :  { %v2263_v55 = vpop.f32.mrf.mxu2 }
 0x23b   :  { %v2264_v32 = vadd.f32 %v2263_v55, %v2145_v14  ;;  %v2147_v49 = vpop.f32.mrf.mxu1 }
 0x23c   :  { %v2388_v20 = vpop.f32.mrf.mxu3  ;;  %v2504_v24 = vpop.f32.mrf.mxu0  ;;  %v2148_v27 = vadd.f32 %v2147_v49, %v4341_v60  ;;  %v240_v60 = vld [vmem:[%s6021_s2 + $0x568] sm:$0xff] }
 0x23d   :  { %v2383_v63 = vadd.f32 %v2382_v19, %v2264_v32  ;;  %v3230_v19 = vld [vmem:[%s6021_s2 + $0x524] sm:$0xff]  ;;  %v1093_v32 = vmul.f32 %v4590_v42, %v623_v41  ;;  %v638_v41 = vunpack.c.l.bf16 %v240_v60 }
 0x23e   :  { %2194 = vmatmul.f32.gmra.mxu1 %v1079_v40  ;;  %v622_v6 = vunpack.c.h.bf16 %v3230_v19 }
 0x23f   :  { %v5140_v45 = vadd.f32 %v2501_v38, %v2383_v63  ;;  %2313 = vmatmul.f32.gmra.mxu2 %v1080_v35  ;;  %2551 = vmatmul.f32.gmra.mxu0 %v1082_v28  ;;  %v625_v38 = vunpack.c.l.bf16 %v233_v39 }
 0x240   :  { %v1092_v55 = vmul.f32 %v4584_v22, %v622_v6  ;;  %v636_v6 = vunpack.c.l.bf16 %v239_v7 }
 0x241   :  { %2438 = vmatmul.f32.gmra.mxu3 %v1107_v15  ;;  %v1095_v35 = vmul.f32 %v4593_v11, %v625_v38  ;;  %v3231_v15 = vld [vmem:[%s6021_s2 + $0x558] sm:$0xff] }
 0x242   :  { %v2266_v14 = vpop.f32.mrf.mxu2  ;;  %v635_v19 = vunpack.c.h.bf16 %v3231_v15  ;;  %v1106_v33 = vmul.f32 %v4590_v42, %v636_v6  ;;  %v649_v15 = vunpack.c.l.bf16 %v5155_v26  ;;  %v1349_v6 = vld [vmem:[%s6019_s0 + $0x488] sm:$0xff] }
 0x243   :  { %v2267_v51 = vadd.f32 %v2266_v14, %v2148_v27  ;;  %v2150_v40 = vpop.f32.mrf.mxu1  ;;  %2596 = vmatpush.msrb.mxu1 %v1349_v6 }
 0x244   :  { %v2391_v28 = vpop.f32.mrf.mxu3  ;;  %v2507_v39 = vpop.f32.mrf.mxu0  ;;  %v2151_v56 = vadd.f32 %v2150_v40, %v4366_v31  ;;  %v1105_v27 = vmul.f32 %v4584_v22, %v635_v19  ;;  %v247_v31 = vld [vmem:[%s6021_s2 + $0x59c] sm:$0xff]  ;;  %v1397_v40 = vld [vmem:[%s6019_s0 + $0x608] sm:$0xff] }
 0x245   :  { %v2386_v63 = vadd.f32 %v2385_v16, %v2267_v51  ;;  %v253_v16 = vld [vmem:[%s6021_s2 + $0x5c8] sm:$0xff]  ;;  %v1108_v51 = vmul.f32 %v4593_v11, %v638_v41  ;;  %2953 = vmatpush.msrb.mxu0 %v1397_v40  ;;  %v260_v41 = vld [vmem:[%s6021_s2 + $0x5fc] sm:$0xff] }
 0x246   :  { %2197 = vmatmul.f32.gmra.mxu1 %v1092_v55  ;;  %v663_v13 = vunpack.c.h.bf16 %v253_v16  ;;  %v1381_v19 = vld [vmem:[%s6019_s0 + $0x588] sm:$0xff] }
 0x247   :  { %v5166_v49 = vadd.f32 %v2504_v24, %v2386_v63  ;;  %2316 = vmatmul.f32.gmra.mxu2 %v1093_v32  ;;  %2554 = vmatmul.f32.gmra.mxu0 %v1095_v35  ;;  %v1365_v63 = vld [vmem:[%s6019_s0 + $0x508] sm:$0xff] }
 0x248   :  { %v1133_v35 = vmul.f32 %v4522_v54, %v663_v13  ;;  %2715 = vmatpush.msrb.mxu2 %v1365_v63  ;;  %2834 = vmatpush.msrb.mxu3 %v1381_v19  ;;  %v676_v13 = vunpack.c.h.bf16 %v260_v41 }
 0x249   :  { %2441 = vmatmul.f32.gmra.mxu3 %v1120_v29 }
 0x24a   :  { %v2269_v24 = vpop.f32.mrf.mxu2  ;;  %v1146_v63 = vmul.f32 %v4522_v54, %v676_v13 }
 0x24b   :  { %v2270_v38 = vadd.f32 %v2269_v24, %v2151_v56  ;;  %v2153_v14 = vpop.f32.mrf.mxu1 }
 0x24c   :  { %v2394_v7 = vpop.f32.mrf.mxu3  ;;  %v2510_v32 = vpop.f32.mrf.mxu0  ;;  %v2154_v56 = vadd.f32 %v2153_v14, %v4392_v36  ;;  %v254_v36 = vld [vmem:[%s6021_s2 + $0x5d0] sm:$0xff] }
 0x24d   :  { %v2389_v55 = vadd.f32 %v2388_v20, %v2270_v38  ;;  %v3232_v20 = vld [vmem:[%s6021_s2 + $0x58c] sm:$0xff] }
 0x24e   :  { %2200 = vmatmul.f32.gmra.mxu1 %v1105_v27  ;;  %v648_v60 = vunpack.c.h.bf16 %v3232_v20  ;;  %v1119_v27 = vmul.f32 %v4590_v42, %v649_v15  ;;  %v664_v15 = vunpack.c.l.bf16 %v254_v36  ;;  %v675_v36 = vunpack.c.l.bf16 %v260_v41 }
 0x24f   :  { %v5188_v29 = vadd.f32 %v2507_v39, %v2389_v55  ;;  %2319 = vmatmul.f32.gmra.mxu2 %v1106_v33  ;;  %2557 = vmatmul.f32.gmra.mxu0 %v1108_v51  ;;  %v651_v39 = vunpack.c.l.bf16 %v247_v31 }
 0x250   :  { %v1118_v38 = vmul.f32 %v4584_v22, %v648_v60  ;;  %v662_v60 = vunpack.c.l.bf16 %v253_v16 }
 0x251   :  { %2444 = vmatmul.f32.gmra.mxu3 %v1133_v35  ;;  %v1121_v51 = vmul.f32 %v4593_v11, %v651_v39  ;;  %v3233_v35 = vld [vmem:[%s6021_s2 + $0x5c0] sm:$0xff] }
 0x252   :  { %v2272_v26 = vpop.f32.mrf.mxu2  ;;  %v661_v20 = vunpack.c.h.bf16 %v3233_v35  ;;  %v1132_v13 = vmul.f32 %v4590_v42, %v662_v60  ;;  %v1380_v35 = vld [vmem:[%s6019_s0 + $0x580] sm:$0xff] }
 0x253   :  { %v2273_v24 = vadd.f32 %v2272_v26, %v2154_v56  ;;  %v2156_v33 = vpop.f32.mrf.mxu1  ;;  %2835 = vmatpush.msrb.mxu3 %v1380_v35 }
 0x254   :  { %v2397_v55 = vpop.f32.mrf.mxu3  ;;  %v2513_v40 = vpop.f32.mrf.mxu0  ;;  %v2157_v19 = vadd.f32 %v2156_v33, %v4418_v25  ;;  %v1131_v56 = vmul.f32 %v4584_v22, %v661_v20  ;;  %v261_v25 = vld [vmem:[%s6021_s2 + $0x604] sm:$0xff] }
 0x255   :  { %v2392_v31 = vadd.f32 %v2391_v28, %v2273_v24  ;;  %v267_v28 = vld [vmem:[%s6021_s2 + $0x630] sm:$0xff]  ;;  %v1134_v24 = vmul.f32 %v4593_v11, %v664_v15  ;;  %v677_v20 = vunpack.c.l.bf16 %v261_v25  ;;  %v268_v25 = vld [vmem:[%s6021_s2 + $0x638] sm:$0xff] }
 0x256   :  { %2203 = vmatmul.f32.gmra.mxu1 %v1118_v38  ;;  %v689_v6 = vunpack.c.h.bf16 %v267_v28  ;;  %v690_v35 = vunpack.c.l.bf16 %v268_v25 }
 0x257   :  { %v5211_v14 = vadd.f32 %v2510_v32, %v2392_v31  ;;  %2322 = vmatmul.f32.gmra.mxu2 %v1119_v27  ;;  %2560 = vmatmul.f32.gmra.mxu0 %v1121_v51  ;;  %v3234_v31 = vld [vmem:[%s6021_s2 + $0x5f4] sm:$0xff] }
 0x258   :  { %v1159_v51 = vmul.f32 %v4522_v54, %v689_v6 }
 0x259   :  { %2447 = vmatmul.f32.gmra.mxu3 %v1146_v63  ;;  %v674_v63 = vunpack.c.h.bf16 %v3234_v31 }
 0x25a   :  { %v2275_v32 = vpop.f32.mrf.mxu2 }
 0x25b   :  { %v2276_v39 = vadd.f32 %v2275_v32, %v2157_v19  ;;  %v2159_v26 = vpop.f32.mrf.mxu1  ;;  %v1144_v6 = vmul.f32 %v4584_v22, %v674_v63  ;;  %v1145_v32 = vmul.f32 %v4590_v42, %v675_v36  ;;  %v3235_v63 = vld [vmem:[%s6021_s2 + $0x628] sm:$0xff] }
 0x25c   :  { %v2400_v16 = vpop.f32.mrf.mxu3  ;;  %v2516_v27 = vpop.f32.mrf.mxu0  ;;  %v2160_v60 = vadd.f32 %v2159_v26, %v4449_v37  ;;  %v1147_v37 = vmul.f32 %v4593_v11, %v677_v20  ;;  %v687_v36 = vunpack.c.h.bf16 %v3235_v63 }
 0x25d   :  { %v2395_v38 = vadd.f32 %v2394_v7, %v2276_v39  ;;  %v1364_v7 = vld [vmem:[%s6019_s0 + $0x500] sm:$0xff] }
 0x25e   :  { %2206 = vmatmul.f32.gmra.mxu1 %v1131_v56  ;;  %2716 = vmatpush.msrb.mxu2 %v1364_v7  ;;  %v1348_v39 = vld [vmem:[%s6019_s0 + $0x480] sm:$0xff]  ;;  %v688_v7 = vunpack.c.l.bf16 %v267_v28 }
 0x25f   :  { %v5227_v33 = vadd.f32 %v2513_v40, %v2395_v38  ;;  %2325 = vmatmul.f32.gmra.mxu2 %v1132_v13  ;;  %2563 = vmatmul.f32.gmra.mxu0 %v1134_v24  ;;  %v274_v40 = vld [vmem:[%s6021_s2 + $0x664] sm:$0xff] }
 0x260   :  { %v702_v15 = vunpack.c.h.bf16 %v274_v40  ;;  %v1396_v56 = vld [vmem:[%s6019_s0 + $0x600] sm:$0xff]  ;;  %2597 = vmatpush.msrb.mxu1 %v1348_v39  ;;  %v701_v25 = vunpack.c.l.bf16 %v274_v40 }
 0x261   :  { %2450 = vmatmul.f32.gmra.mxu3 %v1159_v51  ;;  %2954 = vmatpush.msrb.mxu0 %v1396_v56 }
 0x262   :  { %v2278_v41 = vpop.f32.mrf.mxu2  ;;  %v1172_v51 = vmul.f32 %v4522_v54, %v702_v15 }
 0x263   :  { %v2279_v19 = vadd.f32 %v2278_v41, %v2160_v60  ;;  %v2162_v13 = vpop.f32.mrf.mxu1  ;;  %v1157_v41 = vmul.f32 %v4584_v22, %v687_v36 }
 0x264   :  { %v2403_v26 = vpop.f32.mrf.mxu3  ;;  %v2519_v38 = vpop.f32.mrf.mxu0  ;;  %v2163_v20 = vadd.f32 %v2162_v13, %v4475_v34  ;;  %v275_v34 = vld [vmem:[%s6021_s2 + $0x66c] sm:$0xff] }
 0x265   :  { %v2398_v24 = vadd.f32 %v2397_v55, %v2279_v19  ;;  %v281_v55 = vld [vmem:[%s6021_s2 + $0x698] sm:$0xff]  ;;  %v1158_v19 = vmul.f32 %v4590_v42, %v688_v7  ;;  %v703_v63 = vunpack.c.l.bf16 %v275_v34 }
 0x266   :  { %2209 = vmatmul.f32.gmra.mxu1 %v1144_v6  ;;  %v715_v60 = vunpack.c.h.bf16 %v281_v55  ;;  %v714_v34 = vunpack.c.l.bf16 %v281_v55 }
 0x267   :  { %v5255_v31 = vadd.f32 %v2516_v27, %v2398_v24  ;;  %2328 = vmatmul.f32.gmra.mxu2 %v1145_v32  ;;  %2566 = vmatmul.f32.gmra.mxu0 %v1147_v37  ;;  %v1160_v32 = vmul.f32 %v4593_v11, %v690_v35  ;;  %v3236_v24 = vld [vmem:[%s6021_s2 + $0x65c] sm:$0xff] }
 0x268   :  { %v1185_v37 = vmul.f32 %v4522_v54, %v715_v60  ;;  %v1171_v60 = vmul.f32 %v4590_v42, %v701_v25 }
 0x269   :  { %2453 = vmatmul.f32.gmra.mxu3 %v1172_v51  ;;  %v700_v51 = vunpack.c.h.bf16 %v3236_v24 }
 0x26a   :  { %v2281_v27 = vpop.f32.mrf.mxu2 }
 0x26b   :  { %v2282_v15 = vadd.f32 %v2281_v27, %v2163_v20  ;;  %v2165_v6 = vpop.f32.mrf.mxu1  ;;  %v1170_v20 = vmul.f32 %v4584_v22, %v700_v51 }
 0x26c   :  { %v2406_v28 = vpop.f32.mrf.mxu3  ;;  %v2522_v56 = vpop.f32.mrf.mxu0  ;;  %v2166_v36 = vadd.f32 %v2165_v6, %v4508_v52  ;;  %v282_v52 = vld [vmem:[%s6021_s2 + $0x6a0] sm:$0xff] }
 0x26d   :  { %v2401_v39 = vadd.f32 %v2400_v16, %v2282_v15  ;;  %v288_v16 = vld [vmem:[%s6021_s2 + $0x6cc] sm:$0xff]  ;;  %v1173_v15 = vmul.f32 %v4593_v11, %v703_v63  ;;  %v716_v24 = vunpack.c.l.bf16 %v282_v52 }
 0x26e   :  { %2212 = vmatmul.f32.gmra.mxu1 %v1157_v41  ;;  %v728_v7 = vunpack.c.h.bf16 %v288_v16  ;;  %v727_v52 = vunpack.c.l.bf16 %v288_v16 }
 0x26f   :  { %v5271_v13 = vadd.f32 %v2519_v38, %v2401_v39  ;;  %2331 = vmatmul.f32.gmra.mxu2 %v1158_v19  ;;  %2569 = vmatmul.f32.gmra.mxu0 %v1160_v32  ;;  %v3237_v39 = vld [vmem:[%s6021_s2 + $0x690] sm:$0xff] }
 0x270   :  { %v1198_v32 = vmul.f32 %v4522_v54, %v728_v7  ;;  %v59_v54 = vld [vmem:[%s6021_s2 + $0x28] sm:$0xff]  ;;  %v1184_v7 = vmul.f32 %v4590_v42, %v714_v34 }
 0x271   :  { %2456 = vmatmul.f32.gmra.mxu3 %v1185_v37  ;;  %v713_v37 = vunpack.c.h.bf16 %v3237_v39  ;;  %v303_v51 = vunpack.c.h.bf16 %v59_v54 }
 0x272   :  { %v2284_v38 = vpop.f32.mrf.mxu2 }
 0x273   :  { %v2285_v35 = vadd.f32 %v2284_v38, %v2166_v36  ;;  %v2168_v27 = vpop.f32.mrf.mxu1  ;;  %v1183_v36 = vmul.f32 %v4584_v22, %v713_v37  ;;  %v1186_v38 = vmul.f32 %v4593_v11, %v716_v24 }
 0x274   :  { %v2409_v40 = vpop.f32.mrf.mxu3  ;;  %v2525_v19 = vpop.f32.mrf.mxu0 }
 0x275   :  { %v2404_v41 = vadd.f32 %v2403_v26, %v2285_v35  ;;  %v2169_v26 = vadd.f32 %v2168_v27, %v4542_v3  ;;  %v289_v3 = vld [vmem:[%s6021_s2 + $0x6d4] sm:$0xff] }
 0x276   :  { %2215 = vmatmul.f32.gmra.mxu1 %v1170_v20  ;;  %v729_v39 = vunpack.c.l.bf16 %v289_v3 }
 0x277   :  { %v5287_v6 = vadd.f32 %v2522_v56, %v2404_v41  ;;  %2334 = vmatmul.f32.gmra.mxu2 %v1171_v60  ;;  %2572 = vmatmul.f32.gmra.mxu0 %v1173_v15  ;;  %v5297_v56 = vperm.slane %v4572_v23, 3  ;;  %v3238_v41 = vld [vmem:[%s6021_s2 + $0x6c4] sm:$0xff] }
 0x279   :  { %2459 = vmatmul.f32.gmra.mxu3 %v1198_v32  ;;  %v773_v27 = vmul.f32 %v5297_v56, %v303_v51  ;;  %v726_v32 = vunpack.c.h.bf16 %v3238_v41  ;;  %v1197_v51 = vmul.f32 %v4590_v42, %v727_v52  ;;  %v5328_v42 = vperm.slane %v4572_v23, 1  ;;  %v73_v41 = vld [vmem:[%s6021_s2 + $0x90] sm:$0xff] }
 0x27a   :  { %v2287_v25 = vpop.f32.mrf.mxu2 }
 0x27b   :  { %v2288_v63 = vadd.f32 %v2287_v25, %v2169_v26  ;;  %v2171_v55 = vpop.f32.mrf.mxu1  ;;  %v1196_v26 = vmul.f32 %v4584_v22, %v726_v32  ;;  %v329_v32 = vunpack.c.h.bf16 %v73_v41 }
 0x27c   :  { %v2412_v35 = vpop.f32.mrf.mxu3  ;;  %v2528_v60 = vpop.f32.mrf.mxu0  ;;  %v2172_v37 = vadd.f32 %v2171_v55, %v4586_v2  ;;  %v60_v2 = vld [vmem:[%s6021_s2 + $0x30] sm:$0xf]  ;;  %v3239_v55 = vld [vmem:[%s6021_s2 + $0x20] sm:$0xff] }
 0x27d   :  { %v2407_v20 = vadd.f32 %v2406_v28, %v2288_v63  ;;  %v66_v28 = vld [vmem:[%s6021_s2 + $0x5c] sm:$0xff]  ;;  %v1199_v63 = vmul.f32 %v4593_v11, %v729_v39  ;;  %v302_v11 = vunpack.c.l.bf16 %v59_v54  ;;  %v304_v3 = vunpack.c.l.bf16 %v60_v2  ;;  %v80_v2 = vld [vmem:[%s6021_s2 + $0xc4] sm:$0xff] }
 0x27e   :  { %2218 = vmatmul.f32.gmra.mxu1 %v1183_v36  ;;  %v316_v34 = vunpack.c.h.bf16 %v66_v28 }
 0x27f   :  { %v5306_v15 = vadd.f32 %v2525_v19, %v2407_v20  ;;  %2337 = vmatmul.f32.gmra.mxu2 %v1184_v7  ;;  %2575 = vmatmul.f32.gmra.mxu0 %v1186_v38  ;;  %v301_v20 = vunpack.c.h.bf16 %v3239_v55 }
 0x280   :  { %v786_v38 = vmul.f32 %v5297_v56, %v316_v34 }
 0x281   :  { %2836 = vmatmul.f32.vlgmr.msrb.gmra.mxu3 %v773_v27  ;;  %v5334_v27 = vperm.slane %v4572_v23, 4  ;;  %v771_v54 = vmul.f32 %v5328_v42, %v301_v20 }
 0x282   :  { %v2290_v19 = vpop.f32.mrf.mxu2 }
 0x283   :  { %v2291_v24 = vadd.f32 %v2290_v19, %v2172_v37  ;;  %v2174_v25 = vpop.f32.mrf.mxu1  ;;  %v774_v19 = vmul.f32 %v5334_v27, %v304_v3 }
 0x284   :  { %v2415_v16 = vpop.f32.mrf.mxu3  ;;  %v2531_v7 = vpop.f32.mrf.mxu0 }
 0x285   :  { %v2410_v36 = vadd.f32 %v2409_v40, %v2291_v24  ;;  %v5331_v40 = vperm.slane %v4572_v23, 2 }
 0x286   :  { %2221 = vmatmul.f32.gmra.mxu1 %v1196_v26 }
 0x287   :  { %v5325_v22 = vadd.f32 %v2528_v60, %v2410_v36  ;;  %2340 = vmatmul.f32.gmra.mxu2 %v1197_v51  ;;  %2578 = vmatmul.f32.gmra.mxu0 %v1199_v63  ;;  %v2175_v60 = vadd.f32 %v2174_v25, %v4610_v53  ;;  %v772_v37 = vmul.f32 %v5331_v40, %v302_v11  ;;  %v67_v53 = vld [vmem:[%s6021_s2 + $0x64] sm:$0xf]  ;;  %v3240_v63 = vld [vmem:[%s6021_s2 + $0x54] sm:$0xff] }
 0x288   :  { %v799_v51 = vmul.f32 %v5297_v56, %v329_v32  ;;  %v314_v36 = vunpack.c.h.bf16 %v3240_v63 }
 0x289   :  { %2839 = vmatmul.f32.gmra.mxu3 %v786_v38  ;;  %v315_v38 = vunpack.c.l.bf16 %v66_v28 }
 0x28a   :  { %v2293_v52 = vpop.f32.mrf.mxu2  ;;  %v784_v3 = vmul.f32 %v5328_v42, %v314_v36 }
 0x28b   :  { %v2294_v39 = vadd.f32 %v2293_v52, %v2175_v60  ;;  %v2177_v34 = vpop.f32.mrf.mxu1  ;;  %v785_v60 = vmul.f32 %v5331_v40, %v315_v38 }
 0x28c   :  { %v2418_v24 = vpop.f32.mrf.mxu3  ;;  %v2534_v26 = vpop.f32.mrf.mxu0  ;;  %v2178_v55 = vadd.f32 %v2177_v34, %v4639_v57  ;;  %v74_v57 = vld [vmem:[%s6021_s2 + $0x98] sm:$0xf] }
 0x28d   :  { %v2413_v23 = vadd.f32 %v2412_v35, %v2294_v39  ;;  %v317_v35 = vunpack.c.l.bf16 %v67_v53  ;;  %v87_v53 = vld [vmem:[%s6021_s2 + $0xf8] sm:$0xff] }
 0x28e   :  { %2598 = vmatmul.f32.vlgmr.msrb.gmra.mxu1 %v771_v54 }
 0x28f   :  { %v5347_v25 = vadd.f32 %v2531_v7, %v2413_v23  ;;  %2717 = vmatmul.f32.vlgmr.msrb.gmra.mxu2 %v772_v37  ;;  %3099 = vmatmul.msk.f32.vlgmr.msrb.gmra.mxu0 %vm1408_vm8, %v774_v19  ;;  %v342_v7 = vunpack.c.h.bf16 %v80_v2  ;;  %v787_v28 = vmul.f32 %v5334_v27, %v317_v35  ;;  %v3241_v19 = vld [vmem:[%s6021_s2 + $0x88] sm:$0xff] }
 0x290   :  { %v327_v23 = vunpack.c.h.bf16 %v3241_v19 }
 0x291   :  { %2842 = vmatmul.f32.gmra.mxu3 %v799_v51  ;;  %v812_v37 = vmul.f32 %v5297_v56, %v342_v7  ;;  %v328_v51 = vunpack.c.l.bf16 %v73_v41 }
 0x292   :  { %v2296_v20 = vpop.f32.mrf.mxu2  ;;  %v797_v35 = vmul.f32 %v5328_v42, %v327_v23 }
 0x293   :  { %v2297_v11 = vadd.f32 %v2296_v20, %v2178_v55  ;;  %v2180_v32 = vpop.f32.mrf.mxu1  ;;  %v798_v55 = vmul.f32 %v5331_v40, %v328_v51 }
 0x294   :  { %v2421_v52 = vpop.f32.mrf.mxu3  ;;  %v2537_v54 = vpop.f32.mrf.mxu0  ;;  %v2181_v63 = vadd.f32 %v2180_v32, %v4655_v5  ;;  %v81_v5 = vld [vmem:[%s6021_s2 + $0xcc] sm:$0xf] }
 0x295   :  { %v2416_v39 = vadd.f32 %v2415_v16, %v2297_v11  ;;  %v330_v16 = vunpack.c.l.bf16 %v74_v57  ;;  %v94_v57 = vld [vmem:[%s6021_s2 + $0x12c] sm:$0xff] }
 0x296   :  { %2601 = vmatmul.f32.gmra.mxu1 %v784_v3 }
 0x297   :  { %v5364_v34 = vadd.f32 %v2534_v26, %v2416_v39  ;;  %2720 = vmatmul.f32.gmra.mxu2 %v785_v60  ;;  %3100 = vmatmul.msk.f32.gmra.mxu0 %vm1408_vm8, %v787_v28  ;;  %v355_v26 = vunpack.c.h.bf16 %v87_v53  ;;  %v800_v41 = vmul.f32 %v5334_v27, %v330_v16  ;;  %v3242_v28 = vld [vmem:[%s6021_s2 + $0xbc] sm:$0xff] }
 0x298   :  { %v340_v39 = vunpack.c.h.bf16 %v3242_v28 }
 0x299   :  { %2845 = vmatmul.f32.gmra.mxu3 %v812_v37  ;;  %v825_v60 = vmul.f32 %v5297_v56, %v355_v26  ;;  %v341_v37 = vunpack.c.l.bf16 %v80_v2 }
 0x29a   :  { %v2299_v36 = vpop.f32.mrf.mxu2  ;;  %v810_v16 = vmul.f32 %v5328_v42, %v340_v39 }
 0x29b   :  { %v2300_v38 = vadd.f32 %v2299_v36, %v2181_v63  ;;  %v2183_v7 = vpop.f32.mrf.mxu1  ;;  %v811_v63 = vmul.f32 %v5331_v40, %v341_v37 }
 0x29c   :  { %v2424_v20 = vpop.f32.mrf.mxu3  ;;  %v2540_v3 = vpop.f32.mrf.mxu0  ;;  %v2184_v19 = vadd.f32 %v2183_v7, %v4677_v62  ;;  %v88_v62 = vld [vmem:[%s6021_s2 + $0x100] sm:$0xf] }
 0x29d   :  { %v2419_v11 = vadd.f32 %v2418_v24, %v2300_v38  ;;  %v343_v24 = vunpack.c.l.bf16 %v81_v5  ;;  %v101_v5 = vld [vmem:[%s6021_s2 + $0x160] sm:$0xff] }
 0x29e   :  { %2604 = vmatmul.f32.gmra.mxu1 %v797_v35 }
 0x29f   :  { %v5381_v32 = vadd.f32 %v2537_v54, %v2419_v11  ;;  %2723 = vmatmul.f32.gmra.mxu2 %v798_v55  ;;  %3101 = vmatmul.msk.f32.gmra.mxu0 %vm1408_vm8, %v800_v41  ;;  %v368_v54 = vunpack.c.h.bf16 %v94_v57  ;;  %v813_v2 = vmul.f32 %v5334_v27, %v343_v24  ;;  %v3243_v41 = vld [vmem:[%s6021_s2 + $0xf0] sm:$0xff] }
 0x2a0   :  { %v353_v11 = vunpack.c.h.bf16 %v3243_v41 }
 0x2a1   :  { %2848 = vmatmul.f32.gmra.mxu3 %v825_v60  ;;  %v838_v55 = vmul.f32 %v5297_v56, %v368_v54  ;;  %v354_v60 = vunpack.c.l.bf16 %v87_v53 }
 0x2a2   :  { %v2302_v23 = vpop.f32.mrf.mxu2  ;;  %v823_v24 = vmul.f32 %v5328_v42, %v353_v11 }
 0x2a3   :  { %v2303_v51 = vadd.f32 %v2302_v23, %v2184_v19  ;;  %v2186_v26 = vpop.f32.mrf.mxu1  ;;  %v824_v19 = vmul.f32 %v5331_v40, %v354_v60 }
 0x2a4   :  { %v2427_v36 = vpop.f32.mrf.mxu3  ;;  %v2543_v35 = vpop.f32.mrf.mxu0  ;;  %v2187_v28 = vadd.f32 %v2186_v26, %v4699_v21  ;;  %v95_v21 = vld [vmem:[%s6021_s2 + $0x134] sm:$0xf] }
 0x2a5   :  { %v2422_v38 = vadd.f32 %v2421_v52, %v2303_v51  ;;  %v356_v52 = vunpack.c.l.bf16 %v88_v62  ;;  %v108_v62 = vld [vmem:[%s6021_s2 + $0x194] sm:$0xff] }
 0x2a6   :  { %2607 = vmatmul.f32.gmra.mxu1 %v810_v16 }
 0x2a7   :  { %v5398_v7 = vadd.f32 %v2540_v3, %v2422_v38  ;;  %2726 = vmatmul.f32.gmra.mxu2 %v811_v63  ;;  %3102 = vmatmul.msk.f32.gmra.mxu0 %vm1408_vm8, %v813_v2  ;;  %v381_v3 = vunpack.c.h.bf16 %v101_v5  ;;  %v826_v53 = vmul.f32 %v5334_v27, %v356_v52  ;;  %v3244_v2 = vld [vmem:[%s6021_s2 + $0x124] sm:$0xff] }
 0x2a8   :  { %v366_v38 = vunpack.c.h.bf16 %v3244_v2 }
 0x2a9   :  { %2851 = vmatmul.f32.gmra.mxu3 %v838_v55  ;;  %v851_v63 = vmul.f32 %v5297_v56, %v381_v3  ;;  %v367_v55 = vunpack.c.l.bf16 %v94_v57 }
 0x2aa   :  { %v2305_v39 = vpop.f32.mrf.mxu2  ;;  %v836_v52 = vmul.f32 %v5328_v42, %v366_v38 }
 0x2ab   :  { %v2306_v37 = vadd.f32 %v2305_v39, %v2187_v28  ;;  %v2189_v54 = vpop.f32.mrf.mxu1  ;;  %v837_v28 = vmul.f32 %v5331_v40, %v367_v55 }
 0x2ac   :  { %v2430_v23 = vpop.f32.mrf.mxu3  ;;  %v2546_v16 = vpop.f32.mrf.mxu0  ;;  %v2190_v41 = vadd.f32 %v2189_v54, %v4721_v58  ;;  %v102_v58 = vld [vmem:[%s6021_s2 + $0x168] sm:$0xf] }
 0x2ad   :  { %v2425_v51 = vadd.f32 %v2424_v20, %v2306_v37  ;;  %v369_v20 = vunpack.c.l.bf16 %v95_v21  ;;  %v115_v21 = vld [vmem:[%s6021_s2 + $0x1c8] sm:$0xff] }
 0x2ae   :  { %2610 = vmatmul.f32.gmra.mxu1 %v823_v24 }
 0x2af   :  { %v5415_v26 = vadd.f32 %v2543_v35, %v2425_v51  ;;  %2729 = vmatmul.f32.gmra.mxu2 %v824_v19  ;;  %3103 = vmatmul.msk.f32.gmra.mxu0 %vm1408_vm8, %v826_v53  ;;  %v394_v35 = vunpack.c.h.bf16 %v108_v62  ;;  %v839_v57 = vmul.f32 %v5334_v27, %v369_v20  ;;  %v3245_v53 = vld [vmem:[%s6021_s2 + $0x158] sm:$0xff] }
 0x2b0   :  { %v379_v51 = vunpack.c.h.bf16 %v3245_v53 }
 0x2b1   :  { %2854 = vmatmul.f32.gmra.mxu3 %v851_v63  ;;  %v864_v19 = vmul.f32 %v5297_v56, %v394_v35  ;;  %v380_v63 = vunpack.c.l.bf16 %v101_v5 }
 0x2b2   :  { %v2308_v11 = vpop.f32.mrf.mxu2  ;;  %v849_v20 = vmul.f32 %v5328_v42, %v379_v51 }
 0x2b3   :  { %v2309_v60 = vadd.f32 %v2308_v11, %v2190_v41  ;;  %v2192_v3 = vpop.f32.mrf.mxu1  ;;  %v850_v41 = vmul.f32 %v5331_v40, %v380_v63 }
 0x2b4   :  { %v2433_v39 = vpop.f32.mrf.mxu3  ;;  %v2549_v24 = vpop.f32.mrf.mxu0  ;;  %v2193_v2 = vadd.f32 %v2192_v3, %v4746_v8  ;;  %v109_v8 = vld [vmem:[%s6021_s2 + $0x19c] sm:$0xf] }
 0x2b5   :  { %v2428_v37 = vadd.f32 %v2427_v36, %v2309_v60  ;;  %v382_v36 = vunpack.c.l.bf16 %v102_v58  ;;  %v122_v58 = vld [vmem:[%s6021_s2 + $0x1fc] sm:$0xff] }
 0x2b6   :  { %2613 = vmatmul.f32.gmra.mxu1 %v836_v52 }
 0x2b7   :  { %v5432_v54 = vadd.f32 %v2546_v16, %v2428_v37  ;;  %2732 = vmatmul.f32.gmra.mxu2 %v837_v28  ;;  %3104 = vmatmul.msk.f32.gmra.mxu0 %vm1408_vm8, %v839_v57  ;;  %v407_v16 = vunpack.c.h.bf16 %v115_v21  ;;  %v852_v5 = vmul.f32 %v5334_v27, %v382_v36  ;;  %v3246_v57 = vld [vmem:[%s6021_s2 + $0x18c] sm:$0xff] }
 0x2b8   :  { %v392_v37 = vunpack.c.h.bf16 %v3246_v57 }
 0x2b9   :  { %2857 = vmatmul.f32.gmra.mxu3 %v864_v19  ;;  %v877_v28 = vmul.f32 %v5297_v56, %v407_v16  ;;  %v393_v19 = vunpack.c.l.bf16 %v108_v62 }
 0x2ba   :  { %v2311_v38 = vpop.f32.mrf.mxu2  ;;  %v862_v36 = vmul.f32 %v5328_v42, %v392_v37 }
 0x2bb   :  { %v2312_v55 = vadd.f32 %v2311_v38, %v2193_v2  ;;  %v2195_v35 = vpop.f32.mrf.mxu1  ;;  %v863_v2 = vmul.f32 %v5331_v40, %v393_v19 }
 0x2bc   :  { %v2436_v11 = vpop.f32.mrf.mxu3  ;;  %v2552_v52 = vpop.f32.mrf.mxu0  ;;  %v2196_v53 = vadd.f32 %v2195_v35, %v4765_v59  ;;  %v116_v59 = vld [vmem:[%s6021_s2 + $0x1d0] sm:$0xf] }
 0x2bd   :  { %v2431_v60 = vadd.f32 %v2430_v23, %v2312_v55  ;;  %v395_v23 = vunpack.c.l.bf16 %v109_v8  ;;  %v129_v8 = vld [vmem:[%s6021_s2 + $0x230] sm:$0xff] }
 0x2be   :  { %2616 = vmatmul.f32.gmra.mxu1 %v849_v20 }
 0x2bf   :  { %v5449_v3 = vadd.f32 %v2549_v24, %v2431_v60  ;;  %2735 = vmatmul.f32.gmra.mxu2 %v850_v41  ;;  %3105 = vmatmul.msk.f32.gmra.mxu0 %vm1408_vm8, %v852_v5  ;;  %v420_v24 = vunpack.c.h.bf16 %v122_v58  ;;  %v865_v62 = vmul.f32 %v5334_v27, %v395_v23  ;;  %v3247_v5 = vld [vmem:[%s6021_s2 + $0x1c0] sm:$0xff] }
 0x2c0   :  { %v405_v60 = vunpack.c.h.bf16 %v3247_v5 }
 0x2c1   :  { %2860 = vmatmul.f32.gmra.mxu3 %v877_v28  ;;  %v890_v41 = vmul.f32 %v5297_v56, %v420_v24  ;;  %v406_v28 = vunpack.c.l.bf16 %v115_v21 }
 0x2c2   :  { %v2314_v51 = vpop.f32.mrf.mxu2  ;;  %v875_v23 = vmul.f32 %v5328_v42, %v405_v60 }
 0x2c3   :  { %v2315_v63 = vadd.f32 %v2314_v51, %v2196_v53  ;;  %v2198_v16 = vpop.f32.mrf.mxu1  ;;  %v876_v53 = vmul.f32 %v5331_v40, %v406_v28 }
 0x2c4   :  { %v2439_v38 = vpop.f32.mrf.mxu3  ;;  %v2555_v20 = vpop.f32.mrf.mxu0  ;;  %v2199_v57 = vadd.f32 %v2198_v16, %v4791_v0  ;;  %v123_v0 = vld [vmem:[%s6021_s2 + $0x204] sm:$0xf] }
 0x2c5   :  { %v2434_v55 = vadd.f32 %v2433_v39, %v2315_v63  ;;  %v408_v39 = vunpack.c.l.bf16 %v116_v59  ;;  %v136_v59 = vld [vmem:[%s6021_s2 + $0x264] sm:$0xff] }
 0x2c6   :  { %2619 = vmatmul.f32.gmra.mxu1 %v862_v36 }
 0x2c7   :  { %v5466_v35 = vadd.f32 %v2552_v52, %v2434_v55  ;;  %2738 = vmatmul.f32.gmra.mxu2 %v863_v2  ;;  %3106 = vmatmul.msk.f32.gmra.mxu0 %vm1408_vm8, %v865_v62  ;;  %v433_v52 = vunpack.c.h.bf16 %v129_v8  ;;  %v878_v21 = vmul.f32 %v5334_v27, %v408_v39  ;;  %v3248_v62 = vld [vmem:[%s6021_s2 + $0x1f4] sm:$0xff] }
 0x2c8   :  { %v418_v55 = vunpack.c.h.bf16 %v3248_v62 }
 0x2c9   :  { %2863 = vmatmul.f32.gmra.mxu3 %v890_v41  ;;  %v903_v2 = vmul.f32 %v5297_v56, %v433_v52  ;;  %v419_v41 = vunpack.c.l.bf16 %v122_v58 }
 0x2ca   :  { %v2317_v37 = vpop.f32.mrf.mxu2  ;;  %v888_v39 = vmul.f32 %v5328_v42, %v418_v55 }
 0x2cb   :  { %v2318_v19 = vadd.f32 %v2317_v37, %v2199_v57  ;;  %v2201_v24 = vpop.f32.mrf.mxu1  ;;  %v889_v57 = vmul.f32 %v5331_v40, %v419_v41 }
 0x2cc   :  { %v2442_v51 = vpop.f32.mrf.mxu3  ;;  %v2558_v36 = vpop.f32.mrf.mxu0  ;;  %v2202_v5 = vadd.f32 %v2201_v24, %v4813_v44  ;;  %v130_v44 = vld [vmem:[%s6021_s2 + $0x238] sm:$0xf] }
 0x2cd   :  { %v2437_v63 = vadd.f32 %v2436_v11, %v2318_v19  ;;  %v421_v11 = vunpack.c.l.bf16 %v123_v0  ;;  %v143_v0 = vld [vmem:[%s6021_s2 + $0x298] sm:$0xff] }
 0x2ce   :  { %2622 = vmatmul.f32.gmra.mxu1 %v875_v23 }
 0x2cf   :  { %v5483_v16 = vadd.f32 %v2555_v20, %v2437_v63  ;;  %2741 = vmatmul.f32.gmra.mxu2 %v876_v53  ;;  %3107 = vmatmul.msk.f32.gmra.mxu0 %vm1408_vm8, %v878_v21  ;;  %v446_v20 = vunpack.c.h.bf16 %v136_v59  ;;  %v891_v58 = vmul.f32 %v5334_v27, %v421_v11  ;;  %v3249_v21 = vld [vmem:[%s6021_s2 + $0x228] sm:$0xff] }
 0x2d0   :  { %v431_v63 = vunpack.c.h.bf16 %v3249_v21 }
 0x2d1   :  { %2866 = vmatmul.f32.gmra.mxu3 %v903_v2  ;;  %v916_v53 = vmul.f32 %v5297_v56, %v446_v20  ;;  %v432_v2 = vunpack.c.l.bf16 %v129_v8 }
 0x2d2   :  { %v2320_v60 = vpop.f32.mrf.mxu2  ;;  %v901_v11 = vmul.f32 %v5328_v42, %v431_v63 }
 0x2d3   :  { %v2321_v28 = vadd.f32 %v2320_v60, %v2202_v5  ;;  %v2204_v52 = vpop.f32.mrf.mxu1  ;;  %v902_v5 = vmul.f32 %v5331_v40, %v432_v2 }
 0x2d4   :  { %v2445_v37 = vpop.f32.mrf.mxu3  ;;  %v2561_v23 = vpop.f32.mrf.mxu0  ;;  %v2205_v62 = vadd.f32 %v2204_v52, %v4836_v18  ;;  %v137_v18 = vld [vmem:[%s6021_s2 + $0x26c] sm:$0xf] }
 0x2d5   :  { %v2440_v19 = vadd.f32 %v2439_v38, %v2321_v28  ;;  %v434_v38 = vunpack.c.l.bf16 %v130_v44  ;;  %v150_v44 = vld [vmem:[%s6021_s2 + $0x2cc] sm:$0xff] }
 0x2d6   :  { %2625 = vmatmul.f32.gmra.mxu1 %v888_v39 }
 0x2d7   :  { %v5500_v24 = vadd.f32 %v2558_v36, %v2440_v19  ;;  %2744 = vmatmul.f32.gmra.mxu2 %v889_v57  ;;  %3108 = vmatmul.msk.f32.gmra.mxu0 %vm1408_vm8, %v891_v58  ;;  %v459_v36 = vunpack.c.h.bf16 %v143_v0  ;;  %v904_v8 = vmul.f32 %v5334_v27, %v434_v38  ;;  %v3250_v58 = vld [vmem:[%s6021_s2 + $0x25c] sm:$0xff] }
 0x2d8   :  { %v444_v19 = vunpack.c.h.bf16 %v3250_v58 }
 0x2d9   :  { %2869 = vmatmul.f32.gmra.mxu3 %v916_v53  ;;  %v929_v57 = vmul.f32 %v5297_v56, %v459_v36  ;;  %v445_v53 = vunpack.c.l.bf16 %v136_v59 }
 0x2da   :  { %v2323_v55 = vpop.f32.mrf.mxu2  ;;  %v914_v38 = vmul.f32 %v5328_v42, %v444_v19 }
 0x2db   :  { %v2324_v41 = vadd.f32 %v2323_v55, %v2205_v62  ;;  %v2207_v20 = vpop.f32.mrf.mxu1  ;;  %v915_v62 = vmul.f32 %v5331_v40, %v445_v53 }
 0x2dc   :  { %v2448_v60 = vpop.f32.mrf.mxu3  ;;  %v2564_v39 = vpop.f32.mrf.mxu0  ;;  %v2208_v21 = vadd.f32 %v2207_v20, %v4852_v43  ;;  %v144_v43 = vld [vmem:[%s6021_s2 + $0x2a0] sm:$0xf] }
 0x2dd   :  { %v2443_v28 = vadd.f32 %v2442_v51, %v2324_v41  ;;  %v447_v51 = vunpack.c.l.bf16 %v137_v18  ;;  %v157_v18 = vld [vmem:[%s6021_s2 + $0x300] sm:$0xff] }
 0x2de   :  { %2628 = vmatmul.f32.gmra.mxu1 %v901_v11 }
 0x2df   :  { %v5517_v52 = vadd.f32 %v2561_v23, %v2443_v28  ;;  %2747 = vmatmul.f32.gmra.mxu2 %v902_v5  ;;  %3109 = vmatmul.msk.f32.gmra.mxu0 %vm1408_vm8, %v904_v8  ;;  %v472_v23 = vunpack.c.h.bf16 %v150_v44  ;;  %v917_v59 = vmul.f32 %v5334_v27, %v447_v51  ;;  %v3251_v8 = vld [vmem:[%s6021_s2 + $0x290] sm:$0xff] }
 0x2e0   :  { %v457_v28 = vunpack.c.h.bf16 %v3251_v8 }
 0x2e1   :  { %2872 = vmatmul.f32.gmra.mxu3 %v929_v57  ;;  %v942_v5 = vmul.f32 %v5297_v56, %v472_v23  ;;  %v458_v57 = vunpack.c.l.bf16 %v143_v0 }
 0x2e2   :  { %v2326_v63 = vpop.f32.mrf.mxu2  ;;  %v927_v51 = vmul.f32 %v5328_v42, %v457_v28 }
 0x2e3   :  { %v2327_v2 = vadd.f32 %v2326_v63, %v2208_v21  ;;  %v2210_v36 = vpop.f32.mrf.mxu1  ;;  %v928_v21 = vmul.f32 %v5331_v40, %v458_v57 }
 0x2e4   :  { %v2451_v55 = vpop.f32.mrf.mxu3  ;;  %v2567_v11 = vpop.f32.mrf.mxu0  ;;  %v2211_v58 = vadd.f32 %v2210_v36, %v4883_v4  ;;  %v151_v4 = vld [vmem:[%s6021_s2 + $0x2d4] sm:$0xf] }
 0x2e5   :  { %v2446_v41 = vadd.f32 %v2445_v37, %v2327_v2  ;;  %v460_v37 = vunpack.c.l.bf16 %v144_v43  ;;  %v164_v43 = vld [vmem:[%s6021_s2 + $0x334] sm:$0xff] }
 0x2e6   :  { %2631 = vmatmul.f32.gmra.mxu1 %v914_v38 }
 0x2e7   :  { %v5534_v20 = vadd.f32 %v2564_v39, %v2446_v41  ;;  %2750 = vmatmul.f32.gmra.mxu2 %v915_v62  ;;  %3110 = vmatmul.msk.f32.gmra.mxu0 %vm1408_vm8, %v917_v59  ;;  %v485_v39 = vunpack.c.h.bf16 %v157_v18  ;;  %v930_v0 = vmul.f32 %v5334_v27, %v460_v37  ;;  %v3252_v59 = vld [vmem:[%s6021_s2 + $0x2c4] sm:$0xff] }
 0x2e8   :  { %v470_v41 = vunpack.c.h.bf16 %v3252_v59 }
 0x2e9   :  { %2875 = vmatmul.f32.gmra.mxu3 %v942_v5  ;;  %v955_v62 = vmul.f32 %v5297_v56, %v485_v39  ;;  %v471_v5 = vunpack.c.l.bf16 %v150_v44 }
 0x2ea   :  { %v2329_v19 = vpop.f32.mrf.mxu2  ;;  %v940_v37 = vmul.f32 %v5328_v42, %v470_v41 }
 0x2eb   :  { %v2330_v53 = vadd.f32 %v2329_v19, %v2211_v58  ;;  %v2213_v23 = vpop.f32.mrf.mxu1  ;;  %v941_v58 = vmul.f32 %v5331_v40, %v471_v5 }
 0x2ec   :  { %v2454_v63 = vpop.f32.mrf.mxu3  ;;  %v2570_v38 = vpop.f32.mrf.mxu0  ;;  %v2214_v8 = vadd.f32 %v2213_v23, %v4899_v17  ;;  %v158_v17 = vld [vmem:[%s6021_s2 + $0x308] sm:$0xf] }
 0x2ed   :  { %v2449_v2 = vadd.f32 %v2448_v60, %v2330_v53  ;;  %v473_v60 = vunpack.c.l.bf16 %v151_v4  ;;  %v171_v4 = vld [vmem:[%s6021_s2 + $0x368] sm:$0xff] }
 0x2ee   :  { %2634 = vmatmul.f32.gmra.mxu1 %v927_v51 }
 0x2ef   :  { %v5551_v36 = vadd.f32 %v2567_v11, %v2449_v2  ;;  %2753 = vmatmul.f32.gmra.mxu2 %v928_v21  ;;  %3111 = vmatmul.msk.f32.gmra.mxu0 %vm1408_vm8, %v930_v0  ;;  %v498_v11 = vunpack.c.h.bf16 %v164_v43  ;;  %v943_v44 = vmul.f32 %v5334_v27, %v473_v60  ;;  %v3253_v0 = vld [vmem:[%s6021_s2 + $0x2f8] sm:$0xff] }
 0x2f0   :  { %v483_v2 = vunpack.c.h.bf16 %v3253_v0 }
 0x2f1   :  { %2878 = vmatmul.f32.gmra.mxu3 %v955_v62  ;;  %v968_v21 = vmul.f32 %v5297_v56, %v498_v11  ;;  %v484_v62 = vunpack.c.l.bf16 %v157_v18 }
 0x2f2   :  { %v2332_v28 = vpop.f32.mrf.mxu2  ;;  %v953_v60 = vmul.f32 %v5328_v42, %v483_v2 }
 0x2f3   :  { %v2333_v57 = vadd.f32 %v2332_v28, %v2214_v8  ;;  %v2216_v39 = vpop.f32.mrf.mxu1  ;;  %v954_v8 = vmul.f32 %v5331_v40, %v484_v62 }
 0x2f4   :  { %v2457_v19 = vpop.f32.mrf.mxu3  ;;  %v2573_v51 = vpop.f32.mrf.mxu0  ;;  %v2217_v59 = vadd.f32 %v2216_v39, %v4922_v30  ;;  %v165_v30 = vld [vmem:[%s6021_s2 + $0x33c] sm:$0xf] }
 0x2f5   :  { %v2452_v53 = vadd.f32 %v2451_v55, %v2333_v57  ;;  %v486_v55 = vunpack.c.l.bf16 %v158_v17  ;;  %v178_v17 = vld [vmem:[%s6021_s2 + $0x39c] sm:$0xff] }
 0x2f6   :  { %2637 = vmatmul.f32.gmra.mxu1 %v940_v37 }
 0x2f7   :  { %v5568_v23 = vadd.f32 %v2570_v38, %v2452_v53  ;;  %2756 = vmatmul.f32.gmra.mxu2 %v941_v58  ;;  %3112 = vmatmul.msk.f32.gmra.mxu0 %vm1408_vm8, %v943_v44  ;;  %v511_v38 = vunpack.c.h.bf16 %v171_v4  ;;  %v956_v18 = vmul.f32 %v5334_v27, %v486_v55  ;;  %v3254_v44 = vld [vmem:[%s6021_s2 + $0x32c] sm:$0xff] }
 0x2f8   :  { %v496_v53 = vunpack.c.h.bf16 %v3254_v44 }
 0x2f9   :  { %2881 = vmatmul.f32.gmra.mxu3 %v968_v21  ;;  %v981_v58 = vmul.f32 %v5297_v56, %v511_v38  ;;  %v497_v21 = vunpack.c.l.bf16 %v164_v43 }
 0x2fa   :  { %v2335_v41 = vpop.f32.mrf.mxu2  ;;  %v966_v55 = vmul.f32 %v5328_v42, %v496_v53 }
 0x2fb   :  { %v2336_v5 = vadd.f32 %v2335_v41, %v2217_v59  ;;  %v2219_v11 = vpop.f32.mrf.mxu1  ;;  %v967_v59 = vmul.f32 %v5331_v40, %v497_v21 }
 0x2fc   :  { %v2460_v28 = vpop.f32.mrf.mxu3  ;;  %v2576_v37 = vpop.f32.mrf.mxu0  ;;  %v2220_v0 = vadd.f32 %v2219_v11, %v4941_v9  ;;  %v172_v9 = vld [vmem:[%s6021_s2 + $0x370] sm:$0xf] }
 0x2fd   :  { %v2455_v57 = vadd.f32 %v2454_v63, %v2336_v5  ;;  %v499_v63 = vunpack.c.l.bf16 %v165_v30  ;;  %v185_v30 = vld [vmem:[%s6021_s2 + $0x3d0] sm:$0xff] }
 0x2fe   :  { %2640 = vmatmul.f32.gmra.mxu1 %v953_v60 }
 0x2ff   :  { %v5585_v39 = vadd.f32 %v2573_v51, %v2455_v57  ;;  %2759 = vmatmul.f32.gmra.mxu2 %v954_v8  ;;  %3113 = vmatmul.msk.f32.gmra.mxu0 %vm1408_vm8, %v956_v18  ;;  %v524_v51 = vunpack.c.h.bf16 %v178_v17  ;;  %v969_v43 = vmul.f32 %v5334_v27, %v499_v63  ;;  %v3255_v18 = vld [vmem:[%s6021_s2 + $0x360] sm:$0xff] }
 0x300   :  { %v509_v57 = vunpack.c.h.bf16 %v3255_v18 }
 0x301   :  { %2884 = vmatmul.f32.gmra.mxu3 %v981_v58  ;;  %v994_v8 = vmul.f32 %v5297_v56, %v524_v51  ;;  %v510_v58 = vunpack.c.l.bf16 %v171_v4 }
 0x302   :  { %v2338_v2 = vpop.f32.mrf.mxu2  ;;  %v979_v63 = vmul.f32 %v5328_v42, %v509_v57 }
 0x303   :  { %v2339_v62 = vadd.f32 %v2338_v2, %v2220_v0  ;;  %v2222_v38 = vpop.f32.mrf.mxu1  ;;  %v980_v0 = vmul.f32 %v5331_v40, %v510_v58 }
 0x304   :  { %v2837_v41 = vpop.f32.mrf.mxu3  ;;  %v2579_v60 = vpop.f32.mrf.mxu0  ;;  %v2223_v44 = vadd.f32 %v2222_v38, %v4969_v46  ;;  %v179_v46 = vld [vmem:[%s6021_s2 + $0x3a4] sm:$0xf] }
 0x305   :  { %v2458_v5 = vadd.f32 %v2457_v19, %v2339_v62  ;;  %v512_v19 = vunpack.c.l.bf16 %v172_v9  ;;  %v192_v9 = vld [vmem:[%s6021_s2 + $0x404] sm:$0xff] }
 0x306   :  { %2643 = vmatmul.f32.gmra.mxu1 %v966_v55 }
 0x307   :  { %v5602_v11 = vadd.f32 %v2576_v37, %v2458_v5  ;;  %2762 = vmatmul.f32.gmra.mxu2 %v967_v59  ;;  %3114 = vmatmul.msk.f32.gmra.mxu0 %vm1408_vm8, %v969_v43  ;;  %v537_v37 = vunpack.c.h.bf16 %v185_v30  ;;  %v982_v4 = vmul.f32 %v5334_v27, %v512_v19  ;;  %v3256_v43 = vld [vmem:[%s6021_s2 + $0x394] sm:$0xff] }
 0x308   :  { %v522_v5 = vunpack.c.h.bf16 %v3256_v43 }
 0x309   :  { %2887 = vmatmul.f32.gmra.mxu3 %v994_v8  ;;  %v1007_v59 = vmul.f32 %v5297_v56, %v537_v37  ;;  %v523_v8 = vunpack.c.l.bf16 %v178_v17 }
 0x30a   :  { %v2341_v53 = vpop.f32.mrf.mxu2  ;;  %v992_v19 = vmul.f32 %v5328_v42, %v522_v5 }
 0x30b   :  { %v2342_v21 = vadd.f32 %v2341_v53, %v2223_v44  ;;  %v2599_v51 = vpop.f32.mrf.mxu1  ;;  %v993_v44 = vmul.f32 %v5331_v40, %v523_v8 }
 0x30c   :  { %v2840_v2 = vpop.f32.mrf.mxu3  ;;  %v2956_v55 = vpop.f32.mrf.mxu0  ;;  %v2600_v18 = vadd.f32 %v2599_v51, %v4985_v50  ;;  %v186_v50 = vld [vmem:[%s6021_s2 + $0x3d8] sm:$0xf] }
 0x30d   :  { %v2461_v62 = vadd.f32 %v2460_v28, %v2342_v21  ;;  %v525_v28 = vunpack.c.l.bf16 %v179_v46  ;;  %v199_v46 = vld [vmem:[%s6021_s2 + $0x438] sm:$0xff] }
 0x30e   :  { %2646 = vmatmul.f32.gmra.mxu1 %v979_v63 }
 0x30f   :  { %v5619_v38 = vadd.f32 %v2579_v60, %v2461_v62  ;;  %2765 = vmatmul.f32.gmra.mxu2 %v980_v0  ;;  %3115 = vmatmul.msk.f32.gmra.mxu0 %vm1408_vm8, %v982_v4  ;;  %v550_v60 = vunpack.c.h.bf16 %v192_v9  ;;  %v995_v17 = vmul.f32 %v5334_v27, %v525_v28  ;;  %v3257_v4 = vld [vmem:[%s6021_s2 + $0x3c8] sm:$0xff] }
 0x310   :  { %v535_v62 = vunpack.c.h.bf16 %v3257_v4 }
 0x311   :  { %2890 = vmatmul.f32.gmra.mxu3 %v1007_v59  ;;  %v1020_v0 = vmul.f32 %v5297_v56, %v550_v60  ;;  %v536_v59 = vunpack.c.l.bf16 %v185_v30 }
 0x312   :  { %v2718_v57 = vpop.f32.mrf.mxu2  ;;  %v1005_v30 = vmul.f32 %v5328_v42, %v535_v62 }
 0x313   :  { %v2719_v58 = vadd.f32 %v2718_v57, %v2600_v18  ;;  %v2602_v37 = vpop.f32.mrf.mxu1  ;;  %v1006_v28 = vmul.f32 %v5331_v40, %v536_v59 }
 0x314   :  { %v2843_v53 = vpop.f32.mrf.mxu3  ;;  %v2959_v63 = vpop.f32.mrf.mxu0  ;;  %v2603_v43 = vadd.f32 %v2602_v37, %v5014_v12 }
 0x315   :  { %v2838_v21 = vadd.f32 %v2837_v41, %v2719_v58  ;;  %v538_v41 = vunpack.c.l.bf16 %v186_v50 }
 0x316   :  { %2649 = vmatmul.f32.gmra.mxu1 %v992_v19 }
 0x317   :  { %v2957_v51 = vadd.f32 %v2956_v55, %v2838_v21  ;;  %2768 = vmatmul.f32.gmra.mxu2 %v993_v44  ;;  %3116 = vmatmul.msk.f32.gmra.mxu0 %vm1408_vm8, %v995_v17  ;;  %v563_v55 = vunpack.c.h.bf16 %v199_v46  ;;  %v1008_v60 = vmul.f32 %v5334_v27, %v538_v41  ;;  %v193_v44 = vld [vmem:[%s6021_s2 + $0x40c] sm:$0xf]  ;;  %v3258_v17 = vld [vmem:[%s6021_s2 + $0x3fc] sm:$0xff] }
 0x318   :  { %v548_v21 = vunpack.c.h.bf16 %v3258_v17  ;;  %v551_v50 = vunpack.c.l.bf16 %v193_v44 }
 0x319   :  { %3059 = vst.msk [vmem:[%s6022_s3] sm:$0xff] %vm3058_vm9, %v2957_v51  ;;  %2893 = vmatmul.f32.gmra.mxu3 %v1020_v0  ;;  %v1033_v12 = vmul.f32 %v5297_v56, %v563_v55  ;;  %v549_v0 = vunpack.c.l.bf16 %v192_v9 }
 0x31a   :  { %v2721_v5 = vpop.f32.mrf.mxu2  ;;  %v1018_v9 = vmul.f32 %v5328_v42, %v548_v21 }
 0x31b   :  { %v2722_v8 = vadd.f32 %v2721_v5, %v2603_v43  ;;  %v2605_v18 = vpop.f32.mrf.mxu1  ;;  %v1019_v59 = vmul.f32 %v5331_v40, %v549_v0  ;;  %v1021_v43 = vmul.f32 %v5334_v27, %v551_v50 }
 0x31c   :  { %v2846_v57 = vpop.f32.mrf.mxu3  ;;  %v2962_v19 = vpop.f32.mrf.mxu0  ;;  %v2606_v51 = vadd.f32 %v2605_v18, %v5030_v10  ;;  %v3259_v18 = vld [vmem:[%s6021_s2 + $0x430] sm:$0xff] }
 0x31d   :  { %v2841_v58 = vadd.f32 %v2840_v2, %v2722_v8  ;;  %v206_v2 = vld [vmem:[%s6021_s2 + $0x46c] sm:$0xff] }
 0x31e   :  { %2652 = vmatmul.f32.gmra.mxu1 %v1005_v30  ;;  %v200_v30 = vld [vmem:[%s6021_s2 + $0x440] sm:$0xf] }
 0x31f   :  { %v2960_v37 = vadd.f32 %v2959_v63, %v2841_v58  ;;  %2771 = vmatmul.f32.gmra.mxu2 %v1006_v28  ;;  %3117 = vmatmul.msk.f32.gmra.mxu0 %vm1408_vm8, %v1008_v60  ;;  %v576_v63 = vunpack.c.h.bf16 %v206_v2  ;;  %v561_v60 = vunpack.c.h.bf16 %v3259_v18  ;;  %v562_v58 = vunpack.c.l.bf16 %v199_v46 }
 0x321   :  { %3060 = vst.msk [vmem:[%s6022_s3 + $0x8] sm:$0xff] %vm3058_vm9, %v2960_v37  ;;  %2896 = vmatmul.f32.gmra.mxu3 %v1033_v12  ;;  %v1046_v10 = vmul.f32 %v5297_v56, %v576_v63  ;;  %v564_v12 = vunpack.c.l.bf16 %v200_v30  ;;  %v1031_v46 = vmul.f32 %v5328_v42, %v561_v60  ;;  %v1032_v21 = vmul.f32 %v5331_v40, %v562_v58 }
 0x322   :  { %v2724_v4 = vpop.f32.mrf.mxu2 }
 0x323   :  { %v2725_v62 = vadd.f32 %v2724_v4, %v2606_v51  ;;  %v2608_v41 = vpop.f32.mrf.mxu1  ;;  %v1034_v50 = vmul.f32 %v5334_v27, %v564_v12 }
 0x324   :  { %v2849_v55 = vpop.f32.mrf.mxu3  ;;  %v2965_v8 = vpop.f32.mrf.mxu0  ;;  %v2609_v44 = vadd.f32 %v2608_v41, %v5052_v48 }
 0x325   :  { %v2844_v5 = vadd.f32 %v2843_v53, %v2725_v62  ;;  %v213_v53 = vld [vmem:[%s6021_s2 + $0x4a0] sm:$0xff]  ;;  %v207_v62 = vld [vmem:[%s6021_s2 + $0x474] sm:$0xf] }
 0x326   :  { %2655 = vmatmul.f32.gmra.mxu1 %v1018_v9 }
 0x327   :  { %v2963_v28 = vadd.f32 %v2962_v19, %v2844_v5  ;;  %2774 = vmatmul.f32.gmra.mxu2 %v1019_v59  ;;  %3118 = vmatmul.msk.f32.gmra.mxu0 %vm1408_vm8, %v1021_v43  ;;  %v589_v19 = vunpack.c.h.bf16 %v213_v53  ;;  %v3260_v59 = vld [vmem:[%s6021_s2 + $0x464] sm:$0xff]  ;;  %v575_v43 = vunpack.c.l.bf16 %v206_v2  ;;  %v577_v5 = vunpack.c.l.bf16 %v207_v62 }
 0x328   :  { %v574_v41 = vunpack.c.h.bf16 %v3260_v59 }
 0x329   :  { %3061 = vst.msk [vmem:[%s6022_s3 + $0x10] sm:$0xff] %vm3058_vm9, %v2963_v28  ;;  %2899 = vmatmul.f32.gmra.mxu3 %v1046_v10  ;;  %v1059_v48 = vmul.f32 %v5297_v56, %v589_v19  ;;  %v1045_v18 = vmul.f32 %v5331_v40, %v575_v43  ;;  %v1047_v58 = vmul.f32 %v5334_v27, %v577_v5 }
 0x32a   :  { %v2727_v37 = vpop.f32.mrf.mxu2  ;;  %v1044_v2 = vmul.f32 %v5328_v42, %v574_v41 }
 0x32b   :  { %v2728_v17 = vadd.f32 %v2727_v37, %v2609_v44  ;;  %v2611_v0 = vpop.f32.mrf.mxu1  ;;  %v214_v37 = vld [vmem:[%s6021_s2 + $0x4a8] sm:$0xf] }
 0x32c   :  { %v2852_v51 = vpop.f32.mrf.mxu3  ;;  %v2968_v4 = vpop.f32.mrf.mxu0  ;;  %v2612_v10 = vadd.f32 %v2611_v0, %v5074_v1  ;;  %v588_v0 = vunpack.c.l.bf16 %v213_v53 }
 0x32d   :  { %v2847_v63 = vadd.f32 %v2846_v57, %v2728_v17  ;;  %v220_v57 = vld [vmem:[%s6021_s2 + $0x4d4] sm:$0xff] }
 0x32e   :  { %2658 = vmatmul.f32.gmra.mxu1 %v1031_v46  ;;  %v3261_v46 = vld [vmem:[%s6021_s2 + $0x498] sm:$0xff] }
 0x32f   :  { %v2966_v9 = vadd.f32 %v2965_v8, %v2847_v63  ;;  %2777 = vmatmul.f32.gmra.mxu2 %v1032_v21  ;;  %3119 = vmatmul.msk.f32.gmra.mxu0 %vm1408_vm8, %v1034_v50  ;;  %v602_v8 = vunpack.c.h.bf16 %v220_v57  ;;  %v587_v21 = vunpack.c.h.bf16 %v3261_v46  ;;  %v590_v50 = vunpack.c.l.bf16 %v214_v37 }
 0x331   :  { %3062 = vst.msk [vmem:[%s6022_s3 + $0x18] sm:$0xff] %vm3058_vm9, %v2966_v9  ;;  %2902 = vmatmul.f32.gmra.mxu3 %v1059_v48  ;;  %v1072_v1 = vmul.f32 %v5297_v56, %v602_v8  ;;  %v1057_v53 = vmul.f32 %v5328_v42, %v587_v21  ;;  %v1058_v9 = vmul.f32 %v5331_v40, %v588_v0  ;;  %v221_v8 = vld [vmem:[%s6021_s2 + $0x4dc] sm:$0xf] }
 0x332   :  { %v2730_v30 = vpop.f32.mrf.mxu2  ;;  %v1060_v41 = vmul.f32 %v5334_v27, %v590_v50 }
 0x333   :  { %v2731_v28 = vadd.f32 %v2730_v30, %v2612_v10  ;;  %v2614_v60 = vpop.f32.mrf.mxu1 }
 0x334   :  { %v2855_v12 = vpop.f32.mrf.mxu3  ;;  %v2971_v19 = vpop.f32.mrf.mxu0  ;;  %v2615_v63 = vadd.f32 %v2614_v60, %v5096_v61  ;;  %v603_v60 = vunpack.c.l.bf16 %v221_v8 }
 0x335   :  { %v2850_v44 = vadd.f32 %v2849_v55, %v2731_v28  ;;  %v227_v55 = vld [vmem:[%s6021_s2 + $0x508] sm:$0xff] }
 0x336   :  { %2661 = vmatmul.f32.gmra.mxu1 %v1044_v2  ;;  %v3262_v28 = vld [vmem:[%s6021_s2 + $0x4cc] sm:$0xff]  ;;  %v1073_v46 = vmul.f32 %v5334_v27, %v603_v60  ;;  %v235_v60 = vld [vmem:[%s6021_s2 + $0x544] sm:$0xf] }
 0x337   :  { %v2969_v17 = vadd.f32 %v2968_v4, %v2850_v44  ;;  %2780 = vmatmul.f32.gmra.mxu2 %v1045_v18  ;;  %3120 = vmatmul.msk.f32.gmra.mxu0 %vm1408_vm8, %v1047_v58  ;;  %v615_v4 = vunpack.c.h.bf16 %v227_v55  ;;  %v600_v2 = vunpack.c.h.bf16 %v3262_v28  ;;  %v601_v18 = vunpack.c.l.bf16 %v220_v57 }
 0x339   :  { %3063 = vst.msk [vmem:[%s6022_s3 + $0x20] sm:$0xff] %vm3058_vm9, %v2969_v17  ;;  %2905 = vmatmul.f32.gmra.mxu3 %v1072_v1  ;;  %v1085_v61 = vmul.f32 %v5297_v56, %v615_v4  ;;  %v1070_v57 = vmul.f32 %v5328_v42, %v600_v2  ;;  %v1071_v37 = vmul.f32 %v5331_v40, %v601_v18 }
 0x33a   :  { %v2733_v48 = vpop.f32.mrf.mxu2 }
 0x33b   :  { %v2734_v62 = vadd.f32 %v2733_v48, %v2615_v63  ;;  %v2617_v59 = vpop.f32.mrf.mxu1  ;;  %v228_v63 = vld [vmem:[%s6021_s2 + $0x510] sm:$0xf]  ;;  %v3263_v48 = vld [vmem:[%s6021_s2 + $0x500] sm:$0xff] }
 0x33c   :  { %v2858_v43 = vpop.f32.mrf.mxu3  ;;  %v2974_v10 = vpop.f32.mrf.mxu0  ;;  %v2618_v58 = vadd.f32 %v2617_v59, %v5121_v47 }
 0x33d   :  { %v2853_v5 = vadd.f32 %v2852_v51, %v2734_v62  ;;  %v234_v51 = vld [vmem:[%s6021_s2 + $0x53c] sm:$0xff]  ;;  %v613_v62 = vunpack.c.h.bf16 %v3263_v48 }
 0x33e   :  { %2664 = vmatmul.f32.gmra.mxu1 %v1057_v53  ;;  %v628_v44 = vunpack.c.h.bf16 %v234_v51  ;;  %v614_v53 = vunpack.c.l.bf16 %v227_v55 }
 0x33f   :  { %v2972_v30 = vadd.f32 %v2971_v19, %v2853_v5  ;;  %2783 = vmatmul.f32.gmra.mxu2 %v1058_v9  ;;  %3121 = vmatmul.msk.f32.gmra.mxu0 %vm1408_vm8, %v1060_v41  ;;  %v616_v9 = vunpack.c.l.bf16 %v228_v63  ;;  %v1083_v55 = vmul.f32 %v5328_v42, %v613_v62 }
 0x340   :  { %v1098_v47 = vmul.f32 %v5297_v56, %v628_v44  ;;  %v3264_v44 = vld [vmem:[%s6021_s2 + $0x534] sm:$0xff] }
 0x341   :  { %3064 = vst.msk [vmem:[%s6022_s3 + $0x28] sm:$0xff] %vm3058_vm9, %v2972_v30  ;;  %2908 = vmatmul.f32.gmra.mxu3 %v1085_v61  ;;  %v1084_v61 = vmul.f32 %v5331_v40, %v614_v53  ;;  %v1086_v30 = vmul.f32 %v5334_v27, %v616_v9  ;;  %v242_v53 = vld [vmem:[%s6021_s2 + $0x578] sm:$0xf] }
 0x342   :  { %v2736_v19 = vpop.f32.mrf.mxu2 }
 0x343   :  { %v2737_v1 = vadd.f32 %v2736_v19, %v2618_v58  ;;  %v2620_v17 = vpop.f32.mrf.mxu1  ;;  %v626_v19 = vunpack.c.h.bf16 %v3264_v44 }
 0x344   :  { %v2861_v21 = vpop.f32.mrf.mxu3  ;;  %v2977_v50 = vpop.f32.mrf.mxu0  ;;  %v2621_v59 = vadd.f32 %v2620_v17, %v5140_v45 }
 0x345   :  { %v2856_v0 = vadd.f32 %v2855_v12, %v2737_v1  ;;  %v241_v12 = vld [vmem:[%s6021_s2 + $0x570] sm:$0xff]  ;;  %v627_v1 = vunpack.c.l.bf16 %v234_v51  ;;  %v1096_v51 = vmul.f32 %v5328_v42, %v626_v19  ;;  %v249_v19 = vld [vmem:[%s6021_s2 + $0x5ac] sm:$0xf] }
 0x346   :  { %2667 = vmatmul.f32.gmra.mxu1 %v1070_v57  ;;  %v641_v41 = vunpack.c.h.bf16 %v241_v12  ;;  %v629_v57 = vunpack.c.l.bf16 %v235_v60 }
 0x347   :  { %v2975_v4 = vadd.f32 %v2974_v10, %v2856_v0  ;;  %2786 = vmatmul.f32.gmra.mxu2 %v1071_v37  ;;  %3122 = vmatmul.msk.f32.gmra.mxu0 %vm1408_vm8, %v1073_v46 }
 0x348   :  { %v1111_v45 = vmul.f32 %v5297_v56, %v641_v41  ;;  %v1099_v63 = vmul.f32 %v5334_v27, %v629_v57  ;;  %v3266_v57 = vld [vmem:[%s6021_s2 + $0x59c] sm:$0xff] }
 0x349   :  { %3065 = vst.msk [vmem:[%s6022_s3 + $0x30] sm:$0xff] %vm3058_vm9, %v2975_v4  ;;  %2911 = vmatmul.f32.gmra.mxu3 %v1098_v47 }
 0x34a   :  { %v2739_v5 = vpop.f32.mrf.mxu2 }
 0x34b   :  { %v2740_v10 = vadd.f32 %v2739_v5, %v2621_v59  ;;  %v2623_v8 = vpop.f32.mrf.mxu1  ;;  %v3265_v59 = vld [vmem:[%s6021_s2 + $0x568] sm:$0xff]  ;;  %v640_v5 = vunpack.c.l.bf16 %v241_v12 }
 0x34c   :  { %v2864_v28 = vpop.f32.mrf.mxu3  ;;  %v2980_v18 = vpop.f32.mrf.mxu0  ;;  %v2624_v37 = vadd.f32 %v2623_v8, %v5166_v49  ;;  %v639_v41 = vunpack.c.h.bf16 %v3265_v59  ;;  %v256_v59 = vld [vmem:[%s6021_s2 + $0x5e0] sm:$0xf] }
 0x34d   :  { %v2859_v2 = vadd.f32 %v2858_v43, %v2740_v10  ;;  %v248_v43 = vld [vmem:[%s6021_s2 + $0x5a4] sm:$0xff]  ;;  %v642_v10 = vunpack.c.l.bf16 %v242_v53 }
 0x34e   :  { %2670 = vmatmul.f32.gmra.mxu1 %v1083_v55  ;;  %v654_v17 = vunpack.c.h.bf16 %v248_v43  ;;  %v1109_v12 = vmul.f32 %v5328_v42, %v639_v41 }
 0x34f   :  { %v2978_v58 = vadd.f32 %v2977_v50, %v2859_v2  ;;  %2789 = vmatmul.f32.gmra.mxu2 %v1084_v61  ;;  %3123 = vmatmul.msk.f32.gmra.mxu0 %vm1408_vm8, %v1086_v30  ;;  %v1097_v50 = vmul.f32 %v5331_v40, %v627_v1  ;;  %v1110_v2 = vmul.f32 %v5331_v40, %v640_v5  ;;  %v3267_v5 = vld [vmem:[%s6021_s2 + $0x5d0] sm:$0xff] }
 0x350   :  { %v1124_v49 = vmul.f32 %v5297_v56, %v654_v17  ;;  %v653_v17 = vunpack.c.l.bf16 %v248_v43 }
 0x351   :  { %3066 = vst.msk [vmem:[%s6022_s3 + $0x38] sm:$0xff] %vm3058_vm9, %v2978_v58  ;;  %2914 = vmatmul.f32.gmra.mxu3 %v1111_v45  ;;  %v1112_v45 = vmul.f32 %v5334_v27, %v642_v10  ;;  %v665_v10 = vunpack.c.h.bf16 %v3267_v5  ;;  %v3269_v5 = vld [vmem:[%s6021_s2 + $0x638] sm:$0xff] }
 0x352   :  { %v2742_v46 = vpop.f32.mrf.mxu2 }
 0x353   :  { %v2743_v0 = vadd.f32 %v2742_v46, %v2624_v37  ;;  %v2626_v47 = vpop.f32.mrf.mxu1  ;;  %v652_v37 = vunpack.c.h.bf16 %v3266_v57  ;;  %v655_v46 = vunpack.c.l.bf16 %v249_v19 }
 0x354   :  { %v2867_v4 = vpop.f32.mrf.mxu3  ;;  %v2983_v62 = vpop.f32.mrf.mxu0  ;;  %v2627_v55 = vadd.f32 %v2626_v47, %v5188_v29 }
 0x355   :  { %v2862_v48 = vadd.f32 %v2861_v21, %v2743_v0  ;;  %v255_v21 = vld [vmem:[%s6021_s2 + $0x5d8] sm:$0xff]  ;;  %v1122_v43 = vmul.f32 %v5328_v42, %v652_v37  ;;  %v3268_v37 = vld [vmem:[%s6021_s2 + $0x604] sm:$0xff] }
 0x356   :  { %2673 = vmatmul.f32.gmra.mxu1 %v1096_v51  ;;  %v667_v61 = vunpack.c.h.bf16 %v255_v21 }
 0x357   :  { %v2981_v9 = vadd.f32 %v2980_v18, %v2862_v48  ;;  %2792 = vmatmul.f32.gmra.mxu2 %v1097_v50  ;;  %3124 = vmatmul.msk.f32.gmra.mxu0 %vm1408_vm8, %v1099_v63  ;;  %v1123_v63 = vmul.f32 %v5331_v40, %v653_v17  ;;  %v678_v17 = vunpack.c.h.bf16 %v3268_v37 }
 0x358   :  { %v1137_v29 = vmul.f32 %v5297_v56, %v667_v61  ;;  %v668_v61 = vunpack.c.l.bf16 %v256_v59  ;;  %v270_v59 = vld [vmem:[%s6021_s2 + $0x648] sm:$0xf] }
 0x359   :  { %3067 = vst.msk [vmem:[%s6022_s3 + $0x40] sm:$0xff] %vm3058_vm9, %v2981_v9  ;;  %2917 = vmatmul.f32.gmra.mxu3 %v1124_v49 }
 0x35a   :  { %v2745_v8 = vpop.f32.mrf.mxu2 }
 0x35b   :  { %v2746_v30 = vadd.f32 %v2745_v8, %v2627_v55  ;;  %v2629_v18 = vpop.f32.mrf.mxu1  ;;  %v666_v55 = vunpack.c.l.bf16 %v255_v21  ;;  %v1135_v21 = vmul.f32 %v5328_v42, %v665_v10  ;;  %v691_v10 = vunpack.c.h.bf16 %v3269_v5 }
 0x35c   :  { %v2870_v60 = vpop.f32.mrf.mxu3  ;;  %v2986_v44 = vpop.f32.mrf.mxu0  ;;  %v2630_v0 = vadd.f32 %v2629_v18, %v5211_v14 }
 0x35d   :  { %v2865_v58 = vadd.f32 %v2864_v28, %v2746_v30  ;;  %v262_v28 = vld [vmem:[%s6021_s2 + $0x60c] sm:$0xff]  ;;  %v1136_v18 = vmul.f32 %v5331_v40, %v666_v55 }
 0x35e   :  { %2676 = vmatmul.f32.gmra.mxu1 %v1109_v12  ;;  %v680_v51 = vunpack.c.h.bf16 %v262_v28 }
 0x35f   :  { %v2984_v1 = vadd.f32 %v2983_v62, %v2865_v58  ;;  %2795 = vmatmul.f32.gmra.mxu2 %v1110_v2  ;;  %3125 = vmatmul.msk.f32.gmra.mxu0 %vm1408_vm8, %v1112_v45  ;;  %v1125_v62 = vmul.f32 %v5334_v27, %v655_v46  ;;  %v1138_v58 = vmul.f32 %v5334_v27, %v668_v61  ;;  %v679_v46 = vunpack.c.l.bf16 %v262_v28 }
 0x360   :  { %v1150_v14 = vmul.f32 %v5297_v56, %v680_v51  ;;  %v1148_v28 = vmul.f32 %v5328_v42, %v678_v17  ;;  %v694_v61 = vunpack.c.l.bf16 %v270_v59  ;;  %v3271_v59 = vld [vmem:[%s6021_s2 + $0x6a0] sm:$0xff] }
 0x361   :  { %3068 = vst.msk [vmem:[%s6022_s3 + $0x48] sm:$0xff] %vm3058_vm9, %v2984_v1  ;;  %2920 = vmatmul.f32.gmra.mxu3 %v1137_v29  ;;  %v263_v1 = vld [vmem:[%s6021_s2 + $0x614] sm:$0xf] }
 0x362   :  { %v2748_v50 = vpop.f32.mrf.mxu2 }
 0x363   :  { %v2749_v47 = vadd.f32 %v2748_v50, %v2630_v0  ;;  %v2632_v48 = vpop.f32.mrf.mxu1  ;;  %v681_v0 = vunpack.c.l.bf16 %v263_v1 }
 0x364   :  { %v2873_v49 = vpop.f32.mrf.mxu3  ;;  %v2989_v9 = vpop.f32.mrf.mxu0  ;;  %v2633_v8 = vadd.f32 %v2632_v48, %v5227_v33 }
 0x365   :  { %v2868_v53 = vadd.f32 %v2867_v4, %v2749_v47  ;;  %v269_v4 = vld [vmem:[%s6021_s2 + $0x640] sm:$0xff] }
 0x366   :  { %2679 = vmatmul.f32.gmra.mxu1 %v1122_v43  ;;  %v693_v30 = vunpack.c.h.bf16 %v269_v4  ;;  %v692_v55 = vunpack.c.l.bf16 %v269_v4  ;;  %v1161_v4 = vmul.f32 %v5328_v42, %v691_v10 }
 0x367   :  { %v2987_v41 = vadd.f32 %v2986_v44, %v2868_v53  ;;  %2798 = vmatmul.f32.gmra.mxu2 %v1123_v63  ;;  %3126 = vmatmul.msk.f32.gmra.mxu0 %vm1408_vm8, %v1125_v62  ;;  %v1149_v63 = vmul.f32 %v5331_v40, %v679_v46  ;;  %v1151_v62 = vmul.f32 %v5334_v27, %v681_v0 }
 0x368   :  { %v1163_v33 = vmul.f32 %v5297_v56, %v693_v30 }
 0x369   :  { %3069 = vst.msk [vmem:[%s6022_s3 + $0x50] sm:$0xff] %vm3058_vm9, %v2987_v41  ;;  %2923 = vmatmul.f32.gmra.mxu3 %v1150_v14 }
 0x36a   :  { %v2751_v12 = vpop.f32.mrf.mxu2 }
 0x36b   :  { %v2752_v2 = vadd.f32 %v2751_v12, %v2633_v8  ;;  %v2635_v45 = vpop.f32.mrf.mxu1 }
 0x36c   :  { %v2876_v44 = vpop.f32.mrf.mxu3  ;;  %v2992_v19 = vpop.f32.mrf.mxu0  ;;  %v2636_v51 = vadd.f32 %v2635_v45, %v5255_v31  ;;  %v1164_v45 = vmul.f32 %v5334_v27, %v694_v61 }
 0x36d   :  { %v2871_v29 = vadd.f32 %v2870_v60, %v2752_v2  ;;  %v276_v60 = vld [vmem:[%s6021_s2 + $0x674] sm:$0xff] }
 0x36e   :  { %2682 = vmatmul.f32.gmra.mxu1 %v1135_v21  ;;  %v706_v50 = vunpack.c.h.bf16 %v276_v60  ;;  %v1162_v21 = vmul.f32 %v5331_v40, %v692_v55  ;;  %v705_v17 = vunpack.c.l.bf16 %v276_v60 }
 0x36f   :  { %v2990_v57 = vadd.f32 %v2989_v9, %v2871_v29  ;;  %2801 = vmatmul.f32.gmra.mxu2 %v1136_v18  ;;  %3127 = vmatmul.msk.f32.gmra.mxu0 %vm1408_vm8, %v1138_v58 }
 0x370   :  { %v1176_v31 = vmul.f32 %v5297_v56, %v706_v50 }
 0x371   :  { %3070 = vst.msk [vmem:[%s6022_s3 + $0x58] sm:$0xff] %vm3058_vm9, %v2990_v57  ;;  %2926 = vmatmul.f32.gmra.mxu3 %v1163_v33  ;;  %v277_v33 = vld [vmem:[%s6021_s2 + $0x67c] sm:$0xf]  ;;  %v3270_v57 = vld [vmem:[%s6021_s2 + $0x66c] sm:$0xff] }
 0x372   :  { %v2754_v47 = vpop.f32.mrf.mxu2  ;;  %v704_v37 = vunpack.c.h.bf16 %v3270_v57  ;;  %v707_v46 = vunpack.c.l.bf16 %v277_v33 }
 0x373   :  { %v2755_v43 = vadd.f32 %v2754_v47, %v2636_v51  ;;  %v2638_v48 = vpop.f32.mrf.mxu1 }
 0x374   :  { %v2879_v53 = vpop.f32.mrf.mxu3  ;;  %v2995_v14 = vpop.f32.mrf.mxu0  ;;  %v2639_v8 = vadd.f32 %v2638_v48, %v5271_v13  ;;  %v1174_v60 = vmul.f32 %v5328_v42, %v704_v37 }
 0x375   :  { %v2874_v9 = vadd.f32 %v2873_v49, %v2755_v43  ;;  %v283_v49 = vld [vmem:[%s6021_s2 + $0x6a8] sm:$0xff]  ;;  %v1175_v43 = vmul.f32 %v5331_v40, %v705_v17 }
 0x376   :  { %2685 = vmatmul.f32.gmra.mxu1 %v1148_v28  ;;  %v719_v30 = vunpack.c.h.bf16 %v283_v49  ;;  %v718_v5 = vunpack.c.l.bf16 %v283_v49 }
 0x377   :  { %v2993_v41 = vadd.f32 %v2992_v19, %v2874_v9  ;;  %2804 = vmatmul.f32.gmra.mxu2 %v1149_v63  ;;  %3128 = vmatmul.msk.f32.gmra.mxu0 %vm1408_vm8, %v1151_v62  ;;  %v1177_v63 = vmul.f32 %v5334_v27, %v707_v46 }
 0x378   :  { %v1189_v13 = vmul.f32 %v5297_v56, %v719_v30 }
 0x379   :  { %3071 = vst.msk [vmem:[%s6022_s3 + $0x60] sm:$0xff] %vm3058_vm9, %v2993_v41  ;;  %2929 = vmatmul.f32.gmra.mxu3 %v1176_v31  ;;  %v717_v41 = vunpack.c.h.bf16 %v3271_v59 }
 0x37a   :  { %v2757_v12 = vpop.f32.mrf.mxu2 }
 0x37b   :  { %v2758_v2 = vadd.f32 %v2757_v12, %v2639_v8  ;;  %v2641_v18 = vpop.f32.mrf.mxu1  ;;  %v1187_v61 = vmul.f32 %v5328_v42, %v717_v41  ;;  %v1188_v8 = vmul.f32 %v5331_v40, %v718_v5 }
 0x37c   :  { %v2882_v58 = vpop.f32.mrf.mxu3  ;;  %v2998_v19 = vpop.f32.mrf.mxu0  ;;  %v2642_v0 = vadd.f32 %v2641_v18, %v5287_v6  ;;  %v3272_v18 = vld [vmem:[%s6021_s2 + $0x6d4] sm:$0xff] }
 0x37d   :  { %v2877_v29 = vadd.f32 %v2876_v44, %v2758_v2  ;;  %v290_v44 = vld [vmem:[%s6021_s2 + $0x6dc] sm:$0xff] }
 0x37e   :  { %2688 = vmatmul.f32.gmra.mxu1 %v1161_v4  ;;  %v732_v51 = vunpack.c.h.bf16 %v290_v44 }
 0x37f   :  { %v2996_v1 = vadd.f32 %v2995_v14, %v2877_v29  ;;  %2807 = vmatmul.f32.gmra.mxu2 %v1162_v21  ;;  %3129 = vmatmul.msk.f32.gmra.mxu0 %vm1408_vm8, %v1164_v45  ;;  %v284_v14 = vld [vmem:[%s6021_s2 + $0x6b0] sm:$0xf]  ;;  %v730_v45 = vunpack.c.h.bf16 %v3272_v18  ;;  %v731_v29 = vunpack.c.l.bf16 %v290_v44 }
 0x380   :  { %v1202_v6 = vmul.f32 %v5297_v56, %v732_v51  ;;  %v720_v10 = vunpack.c.l.bf16 %v284_v14 }
 0x381   :  { %3072 = vst.msk [vmem:[%s6022_s3 + $0x68] sm:$0xff] %vm3058_vm9, %v2996_v1  ;;  %2932 = vmatmul.f32.gmra.mxu3 %v1189_v13  ;;  %v1200_v1 = vmul.f32 %v5328_v42, %v730_v45  ;;  %v1201_v57 = vmul.f32 %v5331_v40, %v731_v29 }
 0x382   :  { %v2760_v50 = vpop.f32.mrf.mxu2  ;;  %v1190_v49 = vmul.f32 %v5334_v27, %v720_v10 }
 0x383   :  { %v2761_v47 = vadd.f32 %v2760_v50, %v2642_v0  ;;  %v2644_v28 = vpop.f32.mrf.mxu1 }
 0x384   :  { %v2885_v48 = vpop.f32.mrf.mxu3  ;;  %v3001_v9 = vpop.f32.mrf.mxu0 }
 0x385   :  { %v2880_v62 = vadd.f32 %v2879_v53, %v2761_v47  ;;  %v2645_v53 = vadd.f32 %v2644_v28, %v5306_v15  ;;  %v291_v15 = vld [vmem:[%s6021_s2 + $0x6e4] sm:$0xf] }
 0x386   :  { %2691 = vmatmul.f32.gmra.mxu1 %v1174_v60 }
 0x387   :  { %v2999_v31 = vadd.f32 %v2998_v19, %v2880_v62  ;;  %2810 = vmatmul.f32.gmra.mxu2 %v1175_v43  ;;  %3130 = vmatmul.msk.f32.gmra.mxu0 %vm1408_vm8, %v1177_v63  ;;  %v733_v19 = vunpack.c.l.bf16 %v291_v15 }
 0x389   :  { %3073 = vst.msk [vmem:[%s6022_s3 + $0x70] sm:$0xff] %vm3058_vm9, %v2999_v31  ;;  %2935 = vmatmul.f32.gmra.mxu3 %v1202_v6  ;;  %v1203_v17 = vmul.f32 %v5334_v27, %v733_v19 }
 0x38a   :  { %v2763_v56 = vpop.f32.mrf.mxu2 }
 0x38b   :  { %v2764_v55 = vadd.f32 %v2763_v56, %v2645_v53  ;;  %v2647_v30 = vpop.f32.mrf.mxu1 }
 0x38c   :  { %v2888_v12 = vpop.f32.mrf.mxu3  ;;  %v3004_v4 = vpop.f32.mrf.mxu0  ;;  %v2648_v13 = vadd.f32 %v2647_v30, %v5325_v22 }
 0x38d   :  { %v2883_v2 = vadd.f32 %v2882_v58, %v2764_v55 }
 0x38e   :  { %2694 = vmatmul.f32.gmra.mxu1 %v1187_v61 }
 0x38f   :  { %v3002_v21 = vadd.f32 %v3001_v9, %v2883_v2  ;;  %2813 = vmatmul.f32.gmra.mxu2 %v1188_v8  ;;  %3131 = vmatmul.msk.f32.gmra.mxu0 %vm1408_vm8, %v1190_v49 }
 0x391   :  { %3074 = vst.msk [vmem:[%s6022_s3 + $0x78] sm:$0xff] %vm3058_vm9, %v3002_v21 }
 0x392   :  { %v2766_v58 = vpop.f32.mrf.mxu2 }
 0x393   :  { %v2767_v33 = vadd.f32 %v2766_v58, %v2648_v13  ;;  %v2650_v37 = vpop.f32.mrf.mxu1 }
 0x394   :  { %v2891_v46 = vpop.f32.mrf.mxu3  ;;  %v3007_v0 = vpop.f32.mrf.mxu0  ;;  %v2651_v22 = vadd.f32 %v2650_v37, %v5347_v25 }
 0x395   :  { %v2886_v44 = vadd.f32 %v2885_v48, %v2767_v33 }
 0x396   :  { %2697 = vmatmul.f32.gmra.mxu1 %v1200_v1 }
 0x397   :  { %v3005_v51 = vadd.f32 %v3004_v4, %v2886_v44  ;;  %2816 = vmatmul.f32.gmra.mxu2 %v1201_v57  ;;  %3132 = vmatmul.msk.f32.gmra.mxu0 %vm1408_vm8, %v1203_v17 }
 0x399   :  { %3075 = vst.msk [vmem:[%s6022_s3 + $0x80] sm:$0xff] %vm3058_vm9, %v3005_v51 }
 0x39a   :  { %v2769_v42 = vpop.f32.mrf.mxu2 }
 0x39b   :  { %v2770_v40 = vadd.f32 %v2769_v42, %v2651_v22  ;;  %v2653_v50 = vpop.f32.mrf.mxu1 }
 0x39c   :  { %v2894_v47 = vpop.f32.mrf.mxu3  ;;  %v3010_v60 = vpop.f32.mrf.mxu0  ;;  %v2654_v28 = vadd.f32 %v2653_v50, %v5364_v34 }
 0x39d   :  { %v2889_v27 = vadd.f32 %v2888_v12, %v2770_v40 }
 0x39f   :  { %v3008_v43 = vadd.f32 %v3007_v0, %v2889_v27 }
 0x3a1   :  { %3076 = vst.msk [vmem:[%s6022_s3 + $0x88] sm:$0xff] %vm3058_vm9, %v3008_v43 }
 0x3a2   :  { %v2772_v25 = vpop.f32.mrf.mxu2 }
 0x3a3   :  { %v2773_v63 = vadd.f32 %v2772_v25, %v2654_v28  ;;  %v2656_v48 = vpop.f32.mrf.mxu1 }
 0x3a4   :  { %v2897_v62 = vpop.f32.mrf.mxu3  ;;  %v3013_v6 = vpop.f32.mrf.mxu0  ;;  %v2657_v31 = vadd.f32 %v2656_v48, %v5381_v32 }
 0x3a5   :  { %v2892_v9 = vadd.f32 %v2891_v46, %v2773_v63 }
 0x3a7   :  { %v3011_v14 = vadd.f32 %v3010_v60, %v2892_v9 }
 0x3a9   :  { %3077 = vst.msk [vmem:[%s6022_s3 + $0x90] sm:$0xff] %vm3058_vm9, %v3011_v14 }
 0x3aa   :  { %v2775_v34 = vpop.f32.mrf.mxu2 }
 0x3ab   :  { %v2776_v59 = vadd.f32 %v2775_v34, %v2657_v31  ;;  %v2659_v41 = vpop.f32.mrf.mxu1 }
 0x3ac   :  { %v2900_v5 = vpop.f32.mrf.mxu3  ;;  %v3016_v53 = vpop.f32.mrf.mxu0  ;;  %v2660_v55 = vadd.f32 %v2659_v41, %v5398_v7 }
 0x3ad   :  { %v2895_v10 = vadd.f32 %v2894_v47, %v2776_v59 }
 0x3af   :  { %v3014_v56 = vadd.f32 %v3013_v6, %v2895_v10 }
 0x3b1   :  { %3078 = vst.msk [vmem:[%s6022_s3 + $0x98] sm:$0xff] %vm3058_vm9, %v3014_v56 }
 0x3b2   :  { %v2778_v32 = vpop.f32.mrf.mxu2 }
 0x3b3   :  { %v2779_v61 = vadd.f32 %v2778_v32, %v2660_v55  ;;  %v2662_v8 = vpop.f32.mrf.mxu1 }
 0x3b4   :  { %v2903_v30 = vpop.f32.mrf.mxu3  ;;  %v3019_v12 = vpop.f32.mrf.mxu0  ;;  %v2663_v4 = vadd.f32 %v2662_v8, %v5415_v26 }
 0x3b5   :  { %v2898_v49 = vadd.f32 %v2897_v62, %v2779_v61 }
 0x3b7   :  { %v3017_v2 = vadd.f32 %v3016_v53, %v2898_v49 }
 0x3b9   :  { %3079 = vst.msk [vmem:[%s6022_s3 + $0xa0] sm:$0xff] %vm3058_vm9, %v3017_v2 }
 0x3ba   :  { %v2781_v7 = vpop.f32.mrf.mxu2 }
 0x3bb   :  { %v2782_v15 = vadd.f32 %v2781_v7, %v2663_v4  ;;  %v2665_v21 = vpop.f32.mrf.mxu1 }
 0x3bc   :  { %v2906_v18 = vpop.f32.mrf.mxu3  ;;  %v3022_v29 = vpop.f32.mrf.mxu0  ;;  %v2666_v13 = vadd.f32 %v2665_v21, %v5432_v54 }
 0x3bd   :  { %v2901_v45 = vadd.f32 %v2900_v5, %v2782_v15 }
 0x3bf   :  { %v3020_v19 = vadd.f32 %v3019_v12, %v2901_v45 }
 0x3c1   :  { %3080 = vst.msk [vmem:[%s6022_s3 + $0xa8] sm:$0xff] %vm3058_vm9, %v3020_v19 }
 0x3c2   :  { %v2784_v26 = vpop.f32.mrf.mxu2 }
 0x3c3   :  { %v2785_v58 = vadd.f32 %v2784_v26, %v2666_v13  ;;  %v2668_v33 = vpop.f32.mrf.mxu1 }
 0x3c4   :  { %v2909_v1 = vpop.f32.mrf.mxu3  ;;  %v3025_v37 = vpop.f32.mrf.mxu0  ;;  %v2669_v46 = vadd.f32 %v2668_v33, %v5449_v3 }
 0x3c5   :  { %v2904_v57 = vadd.f32 %v2903_v30, %v2785_v58 }
 0x3c7   :  { %v3023_v17 = vadd.f32 %v3022_v29, %v2904_v57 }
 0x3c9   :  { %3081 = vst.msk [vmem:[%s6022_s3 + $0xb0] sm:$0xff] %vm3058_vm9, %v3023_v17 }
 0x3ca   :  { %v2787_v54 = vpop.f32.mrf.mxu2 }
 0x3cb   :  { %v2788_v44 = vadd.f32 %v2787_v54, %v2669_v46  ;;  %v2671_v0 = vpop.f32.mrf.mxu1 }
 0x3cc   :  { %v2912_v51 = vpop.f32.mrf.mxu3  ;;  %v3028_v42 = vpop.f32.mrf.mxu0  ;;  %v2672_v50 = vadd.f32 %v2671_v0, %v5466_v35 }
 0x3cd   :  { %v2907_v22 = vadd.f32 %v2906_v18, %v2788_v44 }
 0x3cf   :  { %v3026_v40 = vadd.f32 %v3025_v37, %v2907_v22 }
 0x3d1   :  { %3082 = vst.msk [vmem:[%s6022_s3 + $0xb8] sm:$0xff] %vm3058_vm9, %v3026_v40 }
 0x3d2   :  { %v2790_v3 = vpop.f32.mrf.mxu2 }
 0x3d3   :  { %v2791_v47 = vadd.f32 %v2790_v3, %v2672_v50  ;;  %v2674_v27 = vpop.f32.mrf.mxu1 }
 0x3d4   :  { %v2915_v60 = vpop.f32.mrf.mxu3  ;;  %v3031_v28 = vpop.f32.mrf.mxu0  ;;  %v2675_v63 = vadd.f32 %v2674_v27, %v5483_v16 }
 0x3d5   :  { %v2910_v43 = vadd.f32 %v2909_v1, %v2791_v47 }
 0x3d7   :  { %v3029_v25 = vadd.f32 %v3028_v42, %v2910_v43 }
 0x3d9   :  { %3083 = vst.msk [vmem:[%s6022_s3 + $0xc0] sm:$0xff] %vm3058_vm9, %v3029_v25 }
 0x3da   :  { %v2793_v35 = vpop.f32.mrf.mxu2 }
 0x3db   :  { %v2794_v48 = vadd.f32 %v2793_v35, %v2675_v63  ;;  %v2677_v62 = vpop.f32.mrf.mxu1 }
 0x3dc   :  { %v3034_v6 = vpop.f32.mrf.mxu0  ;;  %v2918_v14 = vpop.f32.mrf.mxu3  ;;  %v2678_v34 = vadd.f32 %v2677_v62, %v5500_v24 }
 0x3dd   :  { %v2913_v9 = vadd.f32 %v2912_v51, %v2794_v48 }
 0x3df   :  { %v3032_v31 = vadd.f32 %v3031_v28, %v2913_v9 }
 0x3e1   :  { %3084 = vst.msk [vmem:[%s6022_s3 + $0xc8] sm:$0xff] %vm3058_vm9, %v3032_v31 }
 0x3e2   :  { %v2796_v16 = vpop.f32.mrf.mxu2 }
 0x3e3   :  { %v2797_v59 = vadd.f32 %v2796_v16, %v2678_v34  ;;  %v2680_v41 = vpop.f32.mrf.mxu1 }
 0x3e4   :  { %v3037_v10 = vpop.f32.mrf.mxu0  ;;  %v2921_v56 = vpop.f32.mrf.mxu3  ;;  %v2681_v55 = vadd.f32 %v2680_v41, %v5517_v52 }
 0x3e5   :  { %v2916_v5 = vadd.f32 %v2915_v60, %v2797_v59 }
 0x3e7   :  { %v3035_v53 = vadd.f32 %v3034_v6, %v2916_v5 }
 0x3e9   :  { %3085 = vst.msk [vmem:[%s6022_s3 + $0xd0] sm:$0xff] %vm3058_vm9, %v3035_v53 }
 0x3ea   :  { %v2799_v24 = vpop.f32.mrf.mxu2 }
 0x3eb   :  { %v2800_v32 = vadd.f32 %v2799_v24, %v2681_v55  ;;  %v2683_v61 = vpop.f32.mrf.mxu1 }
 0x3ec   :  { %v3040_v30 = vpop.f32.mrf.mxu0  ;;  %v2684_v12 = vadd.f32 %v2683_v61, %v5534_v20  ;;  %v2924_v52 = vpop.f32.mrf.mxu3 }
 0x3ed   :  { %v2919_v8 = vadd.f32 %v2918_v14, %v2800_v32 }
 0x3ef   :  { %v3038_v49 = vadd.f32 %v3037_v10, %v2919_v8 }
 0x3f1   :  { %3086 = vst.msk [vmem:[%s6022_s3 + $0xd8] sm:$0xff] %vm3058_vm9, %v3038_v49 }
 0x3f2   :  { %v2802_v2 = vpop.f32.mrf.mxu2 }
 0x3f3   :  { %v2803_v4 = vadd.f32 %v2802_v2, %v2684_v12  ;;  %v2686_v7 = vpop.f32.mrf.mxu1 }
 0x3f4   :  { %v3043_v21 = vpop.f32.mrf.mxu0  ;;  %v2687_v45 = vadd.f32 %v2686_v7, %v5551_v36  ;;  %v2927_v13 = vpop.f32.mrf.mxu3 }
 0x3f5   :  { %v2922_v15 = vadd.f32 %v2921_v56, %v2803_v4 }
 0x3f7   :  { %v3041_v18 = vadd.f32 %v3040_v30, %v2922_v15 }
 0x3f9   :  { %3087 = vst.msk [vmem:[%s6022_s3 + $0xe0] sm:$0xff] %vm3058_vm9, %v3041_v18 }
 0x3fa   :  { %v2805_v20 = vpop.f32.mrf.mxu2 }
 0x3fb   :  { %v2806_v29 = vadd.f32 %v2805_v20, %v2687_v45  ;;  %v2689_v19 = vpop.f32.mrf.mxu1 }
 0x3fc   :  { %v3046_v58 = vpop.f32.mrf.mxu0  ;;  %v2690_v1 = vadd.f32 %v2689_v19, %v5568_v23  ;;  %v2930_v46 = vpop.f32.mrf.mxu3 }
 0x3fd   :  { %v2925_v26 = vadd.f32 %v2924_v52, %v2806_v29 }
 0x3ff   :  { %v3044_v33 = vadd.f32 %v3043_v21, %v2925_v26 }
 0x401   :  { %3088 = vst.msk [vmem:[%s6022_s3 + $0xe8] sm:$0xff] %vm3058_vm9, %v3044_v33 }
 0x402   :  { %v2808_v36 = vpop.f32.mrf.mxu2 }
 0x403   :  { %v2809_v57 = vadd.f32 %v2808_v36, %v2690_v1  ;;  %v2692_v37 = vpop.f32.mrf.mxu1 }
 0x404   :  { %v3049_v44 = vpop.f32.mrf.mxu0  ;;  %v2693_v0 = vadd.f32 %v2692_v37, %v5585_v39  ;;  %v2933_v50 = vpop.f32.mrf.mxu3 }
 0x405   :  { %v2928_v17 = vadd.f32 %v2927_v13, %v2809_v57 }
 0x407   :  { %v3047_v54 = vadd.f32 %v3046_v58, %v2928_v17 }
 0x409   :  { %3089 = vst.msk [vmem:[%s6022_s3 + $0xf0] sm:$0xff] %vm3058_vm9, %v3047_v54 }
 0x40a   :  { %v2811_v23 = vpop.f32.mrf.mxu2 }
 0x40b   :  { %v2812_v51 = vadd.f32 %v2811_v23, %v2693_v0  ;;  %v2695_v22 = vpop.f32.mrf.mxu1 }
 0x40c   :  { %v2696_v3 = vadd.f32 %v2695_v22, %v5602_v11  ;;  %v3052_v39 = vpop.f32.mrf.mxu0  ;;  %v2936_v11 = vpop.f32.mrf.mxu3 }
 0x40d   :  { %v2931_v42 = vadd.f32 %v2930_v46, %v2812_v51 }
 0x40f   :  { %v3050_v40 = vadd.f32 %v3049_v44, %v2931_v42 }
 0x411   :  { %3090 = vst.msk [vmem:[%s6022_s3 + $0xf8] sm:$0xff] %vm3058_vm9, %v3050_v40 }
 0x412   :  { %v2814_v47 = vpop.f32.mrf.mxu2 }
 0x413   :  { %v2815_v27 = vadd.f32 %v2814_v47, %v2696_v3  ;;  %v2698_v43 = vpop.f32.mrf.mxu1 }
 0x414   :  { %v2699_v25 = vadd.f32 %v2698_v43, %v5619_v38  ;;  %v3055_v48 = vpop.f32.mrf.mxu0 }
 0x415   :  { %v2934_v60 = vadd.f32 %v2933_v50, %v2815_v27 }
 0x417   :  { %v3053_v28 = vadd.f32 %v3052_v39, %v2934_v60 }
 0x419   :  { %3091 = vst.msk [vmem:[%s6022_s3 + $0x100] sm:$0xff] %vm3058_vm9, %v3053_v28 }
 0x41a   :  { %v2817_v63 = vpop.f32.mrf.mxu2 }
 0x41b   :  { %v2818_v35 = vadd.f32 %v2817_v63, %v2699_v25 }
 0x41d   :  { %v2937_v62 = vadd.f32 %v2936_v11, %v2818_v35 }
 0x41f   :  { %v3056_v9 = vadd.f32 %v3055_v48, %v2937_v62 }
 0x421   :  { %3092 = vst.msk [vmem:[%s6022_s3 + $0x108] sm:$0xff] %vm3058_vm9, %v3056_v9 }

</bundles_post_ra>
